<compile_context>
chip_gen: v7x
topology: tpu7x:2x2x1
jax: 0.10.0
libtpu: 0.0.40
codegen_flags: <defaults>
</compile_context>

<pallas_src>
import functools

import jax
import jax.numpy as jnp
from jax import lax
from jax.experimental import pallas as pl
from jax.experimental.pallas import tpu as pltpu

EPS = 1e-5
LANES = 128


def _round_up(x, m):
    return (x + m - 1) // m * m


# ----------------------------------------------------------------------------
# In-kernel helpers
# ----------------------------------------------------------------------------
def _conv3x3(act, w_ref):
    """3x3 'valid' conv of a haloed tile as 9 lane-dense MXU matmuls.

    act   : (TR+2, W+2, Cin)  bf16 activation tile (halo rows/cols included)
    w_ref : (3, 3, Cin, Cout) bf16 weight ref (Cin/Cout padded to 128 lanes)
    returns (TR*W, Cout) float32 accumulator.
    """
    trp2, wp2, _ = act.shape
    tr, wdt = trp2 - 2, wp2 - 2
    cout = w_ref.shape[-1]
    acc = jnp.zeros((tr * wdt, cout), jnp.float32)
    # dx outer so the sublane-shifting width slice happens 3x, not 9x.
    for dx in range(3):
        a_dx = act[:, dx:dx + wdt, :]
        for dy in range(3):
            xs = a_dx[dy:dy + tr].reshape(tr * wdt, -1)
            acc = acc + jnp.dot(xs, w_ref[dy, dx],
                                preferred_element_type=jnp.float32)
    return acc


def _write_partial_stats(st_ref, acc):
    # st_ref: (2, C).  Row 0: per-channel sum, row 1: per-channel sum-of-squares.
    st_ref[0:1, :] = jnp.sum(acc, axis=0, keepdims=True)
    st_ref[1:2, :] = jnp.sum(acc * acc, axis=0, keepdims=True)


# ----------------------------------------------------------------------------
# Kernels
# ----------------------------------------------------------------------------
def _conv_stats_kernel(x_ref, w_ref, y_ref, st_ref):
    """Stage 1: conv1 on a haloed, zero-padded input tile + partial BN1 stats."""
    acc = _conv3x3(x_ref[...], w_ref)
    tr, wdt, cout = y_ref.shape
    y_ref[...] = acc.reshape(tr, wdt, cout).astype(y_ref.dtype)
    _write_partial_stats(st_ref, acc)


def _bn_relu_conv_stats_kernel(x_ref, scale_ref, shift_ref, w_ref,
                               y_ref, st_ref, *, img_h, row_tile):
    """Stage 2: BN1 + ReLU (image-border kept zero) + conv2 + partial BN2 stats."""
    i = pl.program_id(1)
    trp2, wp2, c = x_ref.shape
    w_img = wp2 - 2

    scale = scale_ref[...].reshape(1, 1, c)
    shift = shift_ref[...].reshape(1, 1, c)
    act = jnp.maximum(x_ref[...] * scale + shift, 0.0)

    # The tile is a window of the zero-padded raw conv1 output; positions that
    # fall on the image border padding must stay exactly zero after BN+ReLU.
    row = lax.broadcasted_iota(jnp.int32, (trp2, wp2, 1), 0) + i * row_tile
    col = lax.broadcasted_iota(jnp.int32, (trp2, wp2, 1), 1)
    valid = (row >= 1) & (row <= img_h) & (col >= 1) & (col <= w_img)
    act = jnp.where(valid, act, 0.0).astype(jnp.bfloat16)

    acc = _conv3x3(act, w_ref)
    tr, wdt, cout = y_ref.shape
    y_ref[...] = acc.reshape(tr, wdt, cout).astype(y_ref.dtype)
    _write_partial_stats(st_ref, acc)


def _bn_relu_kernel(x_ref, scale_ref, shift_ref, o_ref):
    """Stage 3: BN2 + ReLU (pointwise, fully parallel over tiles)."""
    c = o_ref.shape[-1]
    scale = scale_ref[...].reshape(1, 1, c)
    shift = shift_ref[...].reshape(1, 1, c)
    o_ref[...] = jnp.maximum(x_ref[...] * scale + shift, 0.0).astype(o_ref.dtype)


# ----------------------------------------------------------------------------
# Wrapper
# ----------------------------------------------------------------------------
def _pick_row_tile(h, w, c, budget_bytes=4 * 1024 * 1024):
    """Largest divisor of H whose haloed f32 input tile fits the budget."""
    best = 1
    for tr in range(1, h + 1):
        if h % tr == 0 and (tr + 2) * (w + 2) * c * 4 <= budget_bytes:
            best = tr
    return best


def _halo_row_tiles(xp, tr):
    """(N, H+2, W+2, C) zero-padded -> (N, T, tr+2, W+2, C) overlapping windows.

    Built from static slices (no gather).
    TODO(synk): replace this wrapper-side halo duplication (one extra HBM pass,
    ~2/tr row overhead) with a manual halo DMA inside the kernel.
    """
    t = (xp.shape[1] - 2) // tr
    return jnp.stack([xp[:, i * tr:i * tr + tr + 2] for i in range(t)], axis=1)


def _finalize_bn(stats, gamma, beta, inv_count):
    """Tiny O(C) wrapper glue: partial (sum, sumsq) -> BN scale & shift."""
    s = jnp.sum(stats, axis=0)                       # (2, C)
    mean = s[0:1, :] * inv_count
    var = s[1:2, :] * inv_count - mean * mean
    scale = gamma * lax.rsqrt(var + EPS)
    shift = beta - mean * scale
    return scale, shift


def double_conv(x_nchw, params, row_tile=None):
    """Public API matching the PyTorch module: NCHW in, NCHW out."""
    w1, g1, b1, w2, g2, b2 = params
    n, cin, h, w = x_nchw.shape
    cout = w1.shape[-1]
    cin_p = _round_up(cin, LANES)
    cout_p = _round_up(cout, LANES)

    tr = row_tile if row_tile is not None else _pick_row_tile(
        h, w, max(cin_p, cout_p))
    assert h % tr == 0, f"row_tile {tr} must divide H={h}"
    t = h // tr
    inv_count = 1.0 / float(n * h * w)
    grid = (n, t)
    trp2, wp2 = tr + 2, w + 2

    cparams = pltpu.CompilerParams(
        dimension_semantics=("parallel", "parallel"),
        vmem_limit_bytes=64 * 1024 * 1024,
    )

    # ---- layout glue: NCHW -> NHWC, channel pad to 128 lanes, zero halo pad,
    #      per-row-tile halo windows, bf16 weight/operand casts. ------------
    x = jnp.transpose(x_nchw, (0, 2, 3, 1))
    x = jnp.pad(x, ((0, 0), (0, 0), (0, 0), (0, cin_p - cin)))
    xp = jnp.pad(x, ((0, 0), (1, 1), (1, 1), (0, 0)))
    x_tiles = _halo_row_tiles(xp, tr).astype(jnp.bfloat16)

    w1p = jnp.pad(w1, ((0, 0), (0, 0), (0, cin_p - cin),
                       (0, cout_p - cout))).astype(jnp.bfloat16)
    w2p = jnp.pad(w2, ((0, 0), (0, 0), (0, cout_p - cout),
                       (0, cout_p - cout))).astype(jnp.bfloat16)
    g1p = jnp.pad(g1.reshape(1, -1), ((0, 0), (0, cout_p - cout)))
    b1p = jnp.pad(b1.reshape(1, -1), ((0, 0), (0, cout_p - cout)))
    g2p = jnp.pad(g2.reshape(1, -1), ((0, 0), (0, cout_p - cout)))
    b2p = jnp.pad(b2.reshape(1, -1), ((0, 0), (0, cout_p - cout)))

    tile_in_cin = pl.BlockSpec((None, None, trp2, wp2, cin_p),
                               lambda ni, ti: (ni, ti, 0, 0, 0))
    tile_in_cout = pl.BlockSpec((None, None, trp2, wp2, cout_p),
                                lambda ni, ti: (ni, ti, 0, 0, 0))
    tile_out = pl.BlockSpec((None, tr, w, cout_p),
                            lambda ni, ti: (ni, ti, 0, 0))
    stats_out = pl.BlockSpec((None, 2, cout_p),
                             lambda ni, ti: (ni * t + ti, 0, 0))
    vec_spec = pl.BlockSpec((1, cout_p), lambda ni, ti: (0, 0))

    conv_out_shapes = (
        jax.ShapeDtypeStruct((n, h, w, cout_p), jnp.float32),
        jax.ShapeDtypeStruct((n * t, 2, cout_p), jnp.float32),
    )

    # ---- stage 1: conv1 + partial BN1 stats --------------------------------
    y1_raw, stats1 = pl.pallas_call(
        _conv_stats_kernel,
        grid=grid,
        in_specs=[
            tile_in_cin,
            pl.BlockSpec((3, 3, cin_p, cout_p), lambda ni, ti: (0, 0, 0, 0)),
        ],
        out_specs=(tile_out, stats_out),
        out_shape=conv_out_shapes,
        compiler_params=cparams,
    )(x_tiles, w1p)

    # O(C) BN1 finalize outside the kernel (scalar-ish glue, not worth a tile).
    scale1, shift1 = _finalize_bn(stats1, g1p, b1p, inv_count)

    # ---- stage 2: BN1 + ReLU + conv2 + partial BN2 stats --------------------
    y1p = jnp.pad(y1_raw, ((0, 0), (1, 1), (1, 1), (0, 0)))
    y1_tiles = _halo_row_tiles(y1p, tr)

    y2_raw, stats2 = pl.pallas_call(
        functools.partial(_bn_relu_conv_stats_kernel, img_h=h, row_tile=tr),
        grid=grid,
        in_specs=[
            tile_in_cout,
            vec_spec,
            vec_spec,
            pl.BlockSpec((3, 3, cout_p, cout_p), lambda ni, ti: (0, 0, 0, 0)),
        ],
        out_specs=(tile_out, stats_out),
        out_shape=conv_out_shapes,
        compiler_params=cparams,
    )(y1_tiles, scale1, shift1, w2p)

    scale2, shift2 = _finalize_bn(stats2, g2p, b2p, inv_count)

    # ---- stage 3: BN2 + ReLU -------------------------------------------------
    out_nhwc = pl.pallas_call(
        _bn_relu_kernel,
        grid=grid,
        in_specs=[tile_out, vec_spec, vec_spec],
        out_specs=tile_out,
        out_shape=jax.ShapeDtypeStruct((n, h, w, cout_p), jnp.float32),
        compiler_params=cparams,
    )(y2_raw, scale2, shift2)

    out_nhwc = out_nhwc[..., :cout]                    # drop lane padding
    return jnp.transpose(out_nhwc, (0, 3, 1, 2)).astype(x_nchw.dtype)


# ----------------------------------------------------------------------------
# Parameters & reference
# ----------------------------------------------------------------------------
def init_params(key, cin, cout):
    """Deterministic synthetic parameters matching the nn.Module shapes."""
    k1, k2, k3, k4, k5, k6 = jax.random.split(key, 6)
    bound1 = (1.0 / (cin * 9)) ** 0.5
    bound2 = (1.0 / (cout * 9)) ** 0.5
    w1 = jax.random.uniform(k1, (3, 3, cin, cout), jnp.float32, -bound1, bound1)
    w2 = jax.random.uniform(k2, (3, 3, cout, cout), jnp.float32, -bound2, bound2)
    g1 = (1.0 + 0.1 * jax.random.normal(k3, (cout,))).reshape(1, cout).astype(jnp.float32)
    b1 = (0.1 * jax.random.normal(k4, (cout,))).reshape(1, cout).astype(jnp.float32)
    g2 = (1.0 + 0.1 * jax.random.normal(k5, (cout,))).reshape(1, cout).astype(jnp.float32)
    b2 = (0.1 * jax.random.normal(k6, (cout,))).reshape(1, cout).astype(jnp.float32)
    return (w1, g1, b1, w2, g2, b2)


def reference(x_nchw, params):
    """Pure-JAX reference of the PyTorch forward (train-mode BN).

    Models the kernel's MXU numerics exactly: conv operands rounded to bf16,
    accumulation in f32.
    """
    w1, g1, b1, w2, g2, b2 = params

    def conv(x, w_hwio):
        xb = x.astype(jnp.bfloat16).astype(jnp.float32)
        wb = w_hwio.astype(jnp.bfloat16).astype(jnp.float32)
        w_oihw = jnp.transpose(wb, (3, 2, 0, 1))
        return lax.conv_general_dilated(
            xb, w_oihw, window_strides=(1, 1), padding=((1, 1), (1, 1)),
            dimension_numbers=("NCHW", "OIHW", "NCHW"),
            precision=lax.Precision.HIGHEST)

    def bn_relu(x, g, b):
        mean = jnp.mean(x, axis=(0, 2, 3), keepdims=True)
        var = jnp.mean((x - mean) ** 2, axis=(0, 2, 3), keepdims=True)
        y = (x - mean) * lax.rsqrt(var + EPS) * g.reshape(1, -1, 1, 1) \
            + b.reshape(1, -1, 1, 1)
        return jnp.maximum(y, 0.0)

    y = bn_relu(conv(x_nchw, w1), g1, b1)
    y = bn_relu(conv(y, w2), g2, b2)
    return y


if __name__ == "__main__":
    key = jax.random.PRNGKey(0)
    kx, kp = jax.random.split(key)

    N, Cin, H, W = 2, 4, 16, 16
    Cout = 8
    x = jax.random.normal(kx, (N, Cin, H, W), jnp.float32)
    params = init_params(kp, Cin, Cout)

    # row_tile=8 -> grid (N=2, T=2) per stage: exercises the multi-tile + halo
    # path rather than the trivial single-tile case.
    run = jax.jit(functools.partial(double_conv, row_tile=8))
    out = jax.block_until_ready(run(x, params))

    ref = jax.block_until_ready(reference(x, params))
    assert out.shape == (N, Cout, H, W), out.shape
    max_err = float(jnp.max(jnp.abs(out - ref)))
    assert max_err < 3e-3, f"mismatch vs reference: max_err={max_err}"

    print("KERNEL_OK")
</pallas_src>

<mosaic_0001>
module attributes {stable_mosaic.version = 11 : i64} {
  func.func @_conv_stats_kernel(%arg0: i32, %arg1: i32, %arg2: memref<1x1x10x18x128xbf16, #tpu.memory_space<vmem>>, %arg3: memref<3x3x128x128xbf16, #tpu.memory_space<vmem>>, %arg4: memref<1x8x16x128xf32, #tpu.memory_space<vmem>>, %arg5: memref<1x2x128xf32, #tpu.memory_space<vmem>>) attributes {dimension_semantics = [#tpu.dimension_semantics<parallel>, #tpu.dimension_semantics<parallel>], iteration_bounds = array<i64: 2, 2>, scalar_prefetch = 0 : i64, scratch_operands = 0 : i64, tpu.core_type = #tpu.core_type<tc>, window_params = [{transform_indices = @transform_0, window_bounds = array<i64: 1, 1, 10, 18, 128>}, {pipeline_mode = #tpu.pipeline_mode<synchronous>, transform_indices = @transform_1, window_bounds = array<i64: 3, 3, 128, 128>}, {transform_indices = @transform_2, window_bounds = array<i64: 1, 8, 16, 128>}, {transform_indices = @transform_3, window_bounds = array<i64: 1, 2, 128>}]} {
    %c0 = arith.constant 0 : index
    %c0_0 = arith.constant 0 : index
    %c0_1 = arith.constant 0 : index
    %c0_2 = arith.constant 0 : index
    %c0_3 = arith.constant 0 : index
    %0 = vector.load %arg2[%c0, %c0_0, %c0_1, %c0_2, %c0_3] : memref<1x1x10x18x128xbf16, #tpu.memory_space<vmem>>, vector<1x1x10x18x128xbf16>
    %1 = vector.shape_cast %0 : vector<1x1x10x18x128xbf16> to vector<10x18x128xbf16>
    %cst = arith.constant 0.000000e+00 : f32
    %2 = vector.broadcast %cst : f32 to vector<128x128xf32>
    %3 = vector.extract_strided_slice %1 {offsets = [0, 0, 0], sizes = [10, 16, 128], strides = [1, 1, 1]} : vector<10x18x128xbf16> to vector<10x16x128xbf16>
    %4 = vector.extract_strided_slice %3 {offsets = [0, 0, 0], sizes = [8, 16, 128], strides = [1, 1, 1]} : vector<10x16x128xbf16> to vector<8x16x128xbf16>
    %5 = vector.shape_cast %4 : vector<8x16x128xbf16> to vector<128x128xbf16>
    %c0_4 = arith.constant 0 : index
    %c0_5 = arith.constant 0 : index
    %c0_6 = arith.constant 0 : index
    %c0_7 = arith.constant 0 : index
    %6 = vector.load %arg3[%c0_4, %c0_5, %c0_6, %c0_7] : memref<3x3x128x128xbf16, #tpu.memory_space<vmem>>, vector<1x1x128x128xbf16>
    %7 = vector.shape_cast %6 : vector<1x1x128x128xbf16> to vector<128x128xbf16>
    %cst_8 = arith.constant dense<0.000000e+00> : vector<128x128xf32>
    %8 = tpu.matmul %5, %7, %cst_8 {dimension_numbers = #tpu.dot_dimension_numbers<[1], [0], [0], [1], [0, 0, 1, 1], [], []>} : vector<128x128xbf16>, vector<128x128xbf16>, vector<128x128xf32> -> vector<128x128xf32>
    %9 = arith.addf %2, %8 : vector<128x128xf32>
    %10 = vector.extract_strided_slice %3 {offsets = [1, 0, 0], sizes = [8, 16, 128], strides = [1, 1, 1]} : vector<10x16x128xbf16> to vector<8x16x128xbf16>
    %11 = vector.shape_cast %10 : vector<8x16x128xbf16> to vector<128x128xbf16>
    %c1 = arith.constant 1 : index
    %c0_9 = arith.constant 0 : index
    %c0_10 = arith.constant 0 : index
    %c0_11 = arith.constant 0 : index
    %12 = vector.load %arg3[%c1, %c0_9, %c0_10, %c0_11] : memref<3x3x128x128xbf16, #tpu.memory_space<vmem>>, vector<1x1x128x128xbf16>
    %13 = vector.shape_cast %12 : vector<1x1x128x128xbf16> to vector<128x128xbf16>
    %cst_12 = arith.constant dense<0.000000e+00> : vector<128x128xf32>
    %14 = tpu.matmul %11, %13, %cst_12 {dimension_numbers = #tpu.dot_dimension_numbers<[1], [0], [0], [1], [0, 0, 1, 1], [], []>} : vector<128x128xbf16>, vector<128x128xbf16>, vector<128x128xf32> -> vector<128x128xf32>
    %15 = arith.addf %9, %14 : vector<128x128xf32>
    %16 = vector.extract_strided_slice %3 {offsets = [2, 0, 0], sizes = [8, 16, 128], strides = [1, 1, 1]} : vector<10x16x128xbf16> to vector<8x16x128xbf16>
    %17 = vector.shape_cast %16 : vector<8x16x128xbf16> to vector<128x128xbf16>
    %c2 = arith.constant 2 : index
    %c0_13 = arith.constant 0 : index
    %c0_14 = arith.constant 0 : index
    %c0_15 = arith.constant 0 : index
    %18 = vector.load %arg3[%c2, %c0_13, %c0_14, %c0_15] : memref<3x3x128x128xbf16, #tpu.memory_space<vmem>>, vector<1x1x128x128xbf16>
    %19 = vector.shape_cast %18 : vector<1x1x128x128xbf16> to vector<128x128xbf16>
    %cst_16 = arith.constant dense<0.000000e+00> : vector<128x128xf32>
    %20 = tpu.matmul %17, %19, %cst_16 {dimension_numbers = #tpu.dot_dimension_numbers<[1], [0], [0], [1], [0, 0, 1, 1], [], []>} : vector<128x128xbf16>, vector<128x128xbf16>, vector<128x128xf32> -> vector<128x128xf32>
    %21 = arith.addf %15, %20 : vector<128x128xf32>
    %22 = vector.extract_strided_slice %1 {offsets = [0, 1, 0], sizes = [10, 16, 128], strides = [1, 1, 1]} : vector<10x18x128xbf16> to vector<10x16x128xbf16>
    %23 = vector.extract_strided_slice %22 {offsets = [0, 0, 0], sizes = [8, 16, 128], strides = [1, 1, 1]} : vector<10x16x128xbf16> to vector<8x16x128xbf16>
    %24 = vector.shape_cast %23 : vector<8x16x128xbf16> to vector<128x128xbf16>
    %c0_17 = arith.constant 0 : index
    %c1_18 = arith.constant 1 : index
    %c0_19 = arith.constant 0 : index
    %c0_20 = arith.constant 0 : index
    %25 = vector.load %arg3[%c0_17, %c1_18, %c0_19, %c0_20] : memref<3x3x128x128xbf16, #tpu.memory_space<vmem>>, vector<1x1x128x128xbf16>
    %26 = vector.shape_cast %25 : vector<1x1x128x128xbf16> to vector<128x128xbf16>
    %cst_21 = arith.constant dense<0.000000e+00> : vector<128x128xf32>
    %27 = tpu.matmul %24, %26, %cst_21 {dimension_numbers = #tpu.dot_dimension_numbers<[1], [0], [0], [1], [0, 0, 1, 1], [], []>} : vector<128x128xbf16>, vector<128x128xbf16>, vector<128x128xf32> -> vector<128x128xf32>
    %28 = arith.addf %21, %27 : vector<128x128xf32>
    %29 = vector.extract_strided_slice %22 {offsets = [1, 0, 0], sizes = [8, 16, 128], strides = [1, 1, 1]} : vector<10x16x128xbf16> to vector<8x16x128xbf16>
    %30 = vector.shape_cast %29 : vector<8x16x128xbf16> to vector<128x128xbf16>
    %c1_22 = arith.constant 1 : index
    %c1_23 = arith.constant 1 : index
    %c0_24 = arith.constant 0 : index
    %c0_25 = arith.constant 0 : index
    %31 = vector.load %arg3[%c1_22, %c1_23, %c0_24, %c0_25] : memref<3x3x128x128xbf16, #tpu.memory_space<vmem>>, vector<1x1x128x128xbf16>
    %32 = vector.shape_cast %31 : vector<1x1x128x128xbf16> to vector<128x128xbf16>
    %cst_26 = arith.constant dense<0.000000e+00> : vector<128x128xf32>
    %33 = tpu.matmul %30, %32, %cst_26 {dimension_numbers = #tpu.dot_dimension_numbers<[1], [0], [0], [1], [0, 0, 1, 1], [], []>} : vector<128x128xbf16>, vector<128x128xbf16>, vector<128x128xf32> -> vector<128x128xf32>
    %34 = arith.addf %28, %33 : vector<128x128xf32>
    %35 = vector.extract_strided_slice %22 {offsets = [2, 0, 0], sizes = [8, 16, 128], strides = [1, 1, 1]} : vector<10x16x128xbf16> to vector<8x16x128xbf16>
    %36 = vector.shape_cast %35 : vector<8x16x128xbf16> to vector<128x128xbf16>
    %c2_27 = arith.constant 2 : index
    %c1_28 = arith.constant 1 : index
    %c0_29 = arith.constant 0 : index
    %c0_30 = arith.constant 0 : index
    %37 = vector.load %arg3[%c2_27, %c1_28, %c0_29, %c0_30] : memref<3x3x128x128xbf16, #tpu.memory_space<vmem>>, vector<1x1x128x128xbf16>
    %38 = vector.shape_cast %37 : vector<1x1x128x128xbf16> to vector<128x128xbf16>
    %cst_31 = arith.constant dense<0.000000e+00> : vector<128x128xf32>
    %39 = tpu.matmul %36, %38, %cst_31 {dimension_numbers = #tpu.dot_dimension_numbers<[1], [0], [0], [1], [0, 0, 1, 1], [], []>} : vector<128x128xbf16>, vector<128x128xbf16>, vector<128x128xf32> -> vector<128x128xf32>
    %40 = arith.addf %34, %39 : vector<128x128xf32>
    %41 = vector.extract_strided_slice %1 {offsets = [0, 2, 0], sizes = [10, 16, 128], strides = [1, 1, 1]} : vector<10x18x128xbf16> to vector<10x16x128xbf16>
    %42 = vector.extract_strided_slice %41 {offsets = [0, 0, 0], sizes = [8, 16, 128], strides = [1, 1, 1]} : vector<10x16x128xbf16> to vector<8x16x128xbf16>
    %43 = vector.shape_cast %42 : vector<8x16x128xbf16> to vector<128x128xbf16>
    %c0_32 = arith.constant 0 : index
    %c2_33 = arith.constant 2 : index
    %c0_34 = arith.constant 0 : index
    %c0_35 = arith.constant 0 : index
    %44 = vector.load %arg3[%c0_32, %c2_33, %c0_34, %c0_35] : memref<3x3x128x128xbf16, #tpu.memory_space<vmem>>, vector<1x1x128x128xbf16>
    %45 = vector.shape_cast %44 : vector<1x1x128x128xbf16> to vector<128x128xbf16>
    %cst_36 = arith.constant dense<0.000000e+00> : vector<128x128xf32>
    %46 = tpu.matmul %43, %45, %cst_36 {dimension_numbers = #tpu.dot_dimension_numbers<[1], [0], [0], [1], [0, 0, 1, 1], [], []>} : vector<128x128xbf16>, vector<128x128xbf16>, vector<128x128xf32> -> vector<128x128xf32>
    %47 = arith.addf %40, %46 : vector<128x128xf32>
    %48 = vector.extract_strided_slice %41 {offsets = [1, 0, 0], sizes = [8, 16, 128], strides = [1, 1, 1]} : vector<10x16x128xbf16> to vector<8x16x128xbf16>
    %49 = vector.shape_cast %48 : vector<8x16x128xbf16> to vector<128x128xbf16>
    %c1_37 = arith.constant 1 : index
    %c2_38 = arith.constant 2 : index
    %c0_39 = arith.constant 0 : index
    %c0_40 = arith.constant 0 : index
    %50 = vector.load %arg3[%c1_37, %c2_38, %c0_39, %c0_40] : memref<3x3x128x128xbf16, #tpu.memory_space<vmem>>, vector<1x1x128x128xbf16>
    %51 = vector.shape_cast %50 : vector<1x1x128x128xbf16> to vector<128x128xbf16>
    %cst_41 = arith.constant dense<0.000000e+00> : vector<128x128xf32>
    %52 = tpu.matmul %49, %51, %cst_41 {dimension_numbers = #tpu.dot_dimension_numbers<[1], [0], [0], [1], [0, 0, 1, 1], [], []>} : vector<128x128xbf16>, vector<128x128xbf16>, vector<128x128xf32> -> vector<128x128xf32>
    %53 = arith.addf %47, %52 : vector<128x128xf32>
    %54 = vector.extract_strided_slice %41 {offsets = [2, 0, 0], sizes = [8, 16, 128], strides = [1, 1, 1]} : vector<10x16x128xbf16> to vector<8x16x128xbf16>
    %55 = vector.shape_cast %54 : vector<8x16x128xbf16> to vector<128x128xbf16>
    %c2_42 = arith.constant 2 : index
    %c2_43 = arith.constant 2 : index
    %c0_44 = arith.constant 0 : index
    %c0_45 = arith.constant 0 : index
    %56 = vector.load %arg3[%c2_42, %c2_43, %c0_44, %c0_45] : memref<3x3x128x128xbf16, #tpu.memory_space<vmem>>, vector<1x1x128x128xbf16>
    %57 = vector.shape_cast %56 : vector<1x1x128x128xbf16> to vector<128x128xbf16>
    %cst_46 = arith.constant dense<0.000000e+00> : vector<128x128xf32>
    %58 = tpu.matmul %55, %57, %cst_46 {dimension_numbers = #tpu.dot_dimension_numbers<[1], [0], [0], [1], [0, 0, 1, 1], [], []>} : vector<128x128xbf16>, vector<128x128xbf16>, vector<128x128xf32> -> vector<128x128xf32>
    %59 = arith.addf %53, %58 : vector<128x128xf32>
    %60 = vector.shape_cast %59 : vector<128x128xf32> to vector<8x16x128xf32>
    %c0_47 = arith.constant 0 : index
    %c0_48 = arith.constant 0 : index
    %c0_49 = arith.constant 0 : index
    %c0_50 = arith.constant 0 : index
    %61 = vector.load %arg4[%c0_47, %c0_48, %c0_49, %c0_50] : memref<1x8x16x128xf32, #tpu.memory_space<vmem>>, vector<1x8x16x128xf32>
    %62 = vector.shape_cast %61 : vector<1x8x16x128xf32> to vector<8x16x128xf32>
    %63 = vector.shape_cast %60 : vector<8x16x128xf32> to vector<1x8x16x128xf32>
    tpu.vector_store %arg4[%c0_47, %c0_48, %c0_49, %c0_50], %63 {strides = array<i32>} : memref<1x8x16x128xf32, #tpu.memory_space<vmem>>, vector<1x8x16x128xf32>,
    %cst_51 = arith.constant dense<0.000000e+00> : vector<128xf32>
    %64 = vector.multi_reduction <add>, %59, %cst_51 [0] : vector<128x128xf32> to vector<128xf32>
    %65 = vector.shape_cast %64 : vector<128xf32> to vector<1x128xf32>
    %c0_52 = arith.constant 0 : index
    %c0_53 = arith.constant 0 : index
    %c0_54 = arith.constant 0 : index
    %66 = vector.load %arg5[%c0_52, %c0_53, %c0_54] : memref<1x2x128xf32, #tpu.memory_space<vmem>>, vector<1x1x128xf32>
    %67 = vector.shape_cast %66 : vector<1x1x128xf32> to vector<1x128xf32>
    %68 = vector.shape_cast %65 : vector<1x128xf32> to vector<1x1x128xf32>
    tpu.vector_store %arg5[%c0_52, %c0_53, %c0_54], %68 {strides = array<i32>} : memref<1x2x128xf32, #tpu.memory_space<vmem>>, vector<1x1x128xf32>,
    %69 = arith.mulf %59, %59 : vector<128x128xf32>
    %cst_55 = arith.constant dense<0.000000e+00> : vector<128xf32>
    %70 = vector.multi_reduction <add>, %69, %cst_55 [0] : vector<128x128xf32> to vector<128xf32>
    %71 = vector.shape_cast %70 : vector<128xf32> to vector<1x128xf32>
    %c0_56 = arith.constant 0 : index
    %c1_57 = arith.constant 1 : index
    %c0_58 = arith.constant 0 : index
    %72 = vector.load %arg5[%c0_56, %c1_57, %c0_58] : memref<1x2x128xf32, #tpu.memory_space<vmem>>, vector<1x1x128xf32>
    %73 = vector.shape_cast %72 : vector<1x1x128xf32> to vector<1x128xf32>
    %74 = vector.shape_cast %71 : vector<1x128xf32> to vector<1x1x128xf32>
    tpu.vector_store %arg5[%c0_56, %c1_57, %c0_58], %74 {strides = array<i32>} : memref<1x2x128xf32, #tpu.memory_space<vmem>>, vector<1x1x128xf32>,
    return
  }
  func.func @transform_0(%arg0: i32, %arg1: i32) -> (i32, i32, i32, i32, i32) {
    %c0_i32 = arith.constant 0 : i32
    %c0_i32_0 = arith.constant 0 : i32
    %c0_i32_1 = arith.constant 0 : i32
    %c0_i32_2 = arith.constant 0 : i32
    return %arg0, %arg1, %c0_i32, %c0_i32_0, %c0_i32_1 : i32, i32, i32, i32, i32
  }
  func.func @transform_1(%arg0: i32, %arg1: i32) -> (i32, i32, i32, i32) {
    %c0_i32 = arith.constant 0 : i32
    %c0_i32_0 = arith.constant 0 : i32
    %c0_i32_1 = arith.constant 0 : i32
    %c0_i32_2 = arith.constant 0 : i32
    %c0_i32_3 = arith.constant 0 : i32
    return %c0_i32, %c0_i32_0, %c0_i32_1, %c0_i32_2 : i32, i32, i32, i32
  }
  func.func @transform_2(%arg0: i32, %arg1: i32) -> (i32, i32, i32, i32) {
    %c0_i32 = arith.constant 0 : i32
    %c0_i32_0 = arith.constant 0 : i32
    %c0_i32_1 = arith.constant 0 : i32
    return %arg0, %arg1, %c0_i32, %c0_i32_0 : i32, i32, i32, i32
  }
  func.func @transform_3(%arg0: i32, %arg1: i32) -> (i32, i32, i32) {
    %c2_i32 = arith.constant 2 : i32
    %0 = arith.muli %arg0, %c2_i32 : i32
    %1 = arith.addi %0, %arg1 : i32
    %c0_i32 = arith.constant 0 : i32
    %c0_i32_0 = arith.constant 0 : i32
    %c0_i32_1 = arith.constant 0 : i32
    return %1, %c0_i32, %c0_i32_0 : i32, i32, i32
  }
}

module attributes {stable_mosaic.version = 11 : i64} {
  func.func @_bn_relu_conv_stats_kernel(%arg0: i32, %arg1: i32, %arg2: memref<1x1x10x18x128xf32, #tpu.memory_space<vmem>>, %arg3: memref<1x128xf32, #tpu.memory_space<vmem>>, %arg4: memref<1x128xf32, #tpu.memory_space<vmem>>, %arg5: memref<3x3x128x128xbf16, #tpu.memory_space<vmem>>, %arg6: memref<1x8x16x128xf32, #tpu.memory_space<vmem>>, %arg7: memref<1x2x128xf32, #tpu.memory_space<vmem>>) attributes {dimension_semantics = [#tpu.dimension_semantics<parallel>, #tpu.dimension_semantics<parallel>], iteration_bounds = array<i64: 2, 2>, scalar_prefetch = 0 : i64, scratch_operands = 0 : i64, tpu.core_type = #tpu.core_type<tc>, window_params = [{transform_indices = @transform_0, window_bounds = array<i64: 1, 1, 10, 18, 128>}, {pipeline_mode = #tpu.pipeline_mode<synchronous>, transform_indices = @transform_1, window_bounds = array<i64: 1, 128>}, {pipeline_mode = #tpu.pipeline_mode<synchronous>, transform_indices = @transform_2, window_bounds = array<i64: 1, 128>}, {pipeline_mode = #tpu.pipeline_mode<synchronous>, transform_indices = @transform_3, window_bounds = array<i64: 3, 3, 128, 128>}, {transform_indices = @transform_4, window_bounds = array<i64: 1, 8, 16, 128>}, {transform_indices = @transform_5, window_bounds = array<i64: 1, 2, 128>}]} {
    %c0 = arith.constant 0 : index
    %c0_0 = arith.constant 0 : index
    %0 = vector.load %arg3[%c0, %c0_0] : memref<1x128xf32, #tpu.memory_space<vmem>>, vector<1x128xf32>
    %1 = vector.shape_cast %0 : vector<1x128xf32> to vector<1x1x128xf32>
    %c0_1 = arith.constant 0 : index
    %c0_2 = arith.constant 0 : index
    %2 = vector.load %arg4[%c0_1, %c0_2] : memref<1x128xf32, #tpu.memory_space<vmem>>, vector<1x128xf32>
    %3 = vector.shape_cast %2 : vector<1x128xf32> to vector<1x1x128xf32>
    %c0_3 = arith.constant 0 : index
    %c0_4 = arith.constant 0 : index
    %c0_5 = arith.constant 0 : index
    %c0_6 = arith.constant 0 : index
    %c0_7 = arith.constant 0 : index
    %4 = vector.load %arg2[%c0_3, %c0_4, %c0_5, %c0_6, %c0_7] : memref<1x1x10x18x128xf32, #tpu.memory_space<vmem>>, vector<1x1x10x18x128xf32>
    %5 = vector.shape_cast %4 : vector<1x1x10x18x128xf32> to vector<10x18x128xf32>
    %6 = vector.broadcast %1 : vector<1x1x128xf32> to vector<10x18x128xf32>
    %7 = arith.mulf %5, %6 : vector<10x18x128xf32>
    %8 = vector.broadcast %3 : vector<1x1x128xf32> to vector<10x18x128xf32>
    %9 = arith.addf %7, %8 : vector<10x18x128xf32>
    %cst = arith.constant 0.000000e+00 : f32
    %10 = vector.broadcast %cst : f32 to vector<10x18x128xf32>
    %11 = arith.maximumf %9, %10 : vector<10x18x128xf32>
    %12 = tpu.iota {dimensions = array<i32: 0>} : vector<10x18x1xi32>
    %c8_i32 = arith.constant 8 : i32
    %13 = arith.muli %arg1, %c8_i32 : i32
    %14 = vector.broadcast %13 : i32 to vector<10x18x1xi32>
    %15 = arith.addi %12, %14 : vector<10x18x1xi32>
    %16 = tpu.iota {dimensions = array<i32: 1>} : vector<10x18x1xi32>
    %c1_i32 = arith.constant 1 : i32
    %17 = vector.broadcast %c1_i32 : i32 to vector<10x18x1xi32>
    %18 = arith.cmpi sge, %15, %17 : vector<10x18x1xi32>
    %c16_i32 = arith.constant 16 : i32
    %19 = vector.broadcast %c16_i32 : i32 to vector<10x18x1xi32>
    %20 = arith.cmpi sle, %15, %19 : vector<10x18x1xi32>
    %21 = arith.andi %18, %20 : vector<10x18x1xi1>
    %c1_i32_8 = arith.constant 1 : i32
    %22 = vector.broadcast %c1_i32_8 : i32 to vector<10x18x1xi32>
    %23 = arith.cmpi sge, %16, %22 : vector<10x18x1xi32>
    %24 = arith.andi %21, %23 : vector<10x18x1xi1>
    %c16_i32_9 = arith.constant 16 : i32
    %25 = vector.broadcast %c16_i32_9 : i32 to vector<10x18x1xi32>
    %26 = arith.cmpi sle, %16, %25 : vector<10x18x1xi32>
    %27 = arith.andi %24, %26 : vector<10x18x1xi1>
    %cst_10 = arith.constant 0.000000e+00 : f32
    %28 = vector.shape_cast %27 : vector<10x18x1xi1> to vector<10x18x1xi1>
    %29 = vector.broadcast %28 : vector<10x18x1xi1> to vector<10x18x128xi1>
    %30 = vector.broadcast %cst_10 : f32 to vector<10x18x128xf32>
    %31 = arith.select %29, %11, %30 : vector<10x18x128xi1>, vector<10x18x128xf32>
    %32 = arith.truncf %31 : vector<10x18x128xf32> to vector<10x18x128xbf16>
    %cst_11 = arith.constant 0.000000e+00 : f32
    %33 = vector.broadcast %cst_11 : f32 to vector<128x128xf32>
    %34 = vector.extract_strided_slice %32 {offsets = [0, 0, 0], sizes = [10, 16, 128], strides = [1, 1, 1]} : vector<10x18x128xbf16> to vector<10x16x128xbf16>
    %35 = vector.extract_strided_slice %34 {offsets = [0, 0, 0], sizes = [8, 16, 128], strides = [1, 1, 1]} : vector<10x16x128xbf16> to vector<8x16x128xbf16>
    %36 = vector.shape_cast %35 : vector<8x16x128xbf16> to vector<128x128xbf16>
    %c0_12 = arith.constant 0 : index
    %c0_13 = arith.constant 0 : index
    %c0_14 = arith.constant 0 : index
    %c0_15 = arith.constant 0 : index
    %37 = vector.load %arg5[%c0_12, %c0_13, %c0_14, %c0_15] : memref<3x3x128x128xbf16, #tpu.memory_space<vmem>>, vector<1x1x128x128xbf16>
    %38 = vector.shape_cast %37 : vector<1x1x128x128xbf16> to vector<128x128xbf16>
    %cst_16 = arith.constant dense<0.000000e+00> : vector<128x128xf32>
    %39 = tpu.matmul %36, %38, %cst_16 {dimension_numbers = #tpu.dot_dimension_numbers<[1], [0], [0], [1], [0, 0, 1, 1], [], []>} : vector<128x128xbf16>, vector<128x128xbf16>, vector<128x128xf32> -> vector<128x128xf32>
    %40 = arith.addf %33, %39 : vector<128x128xf32>
    %41 = vector.extract_strided_slice %34 {offsets = [1, 0, 0], sizes = [8, 16, 128], strides = [1, 1, 1]} : vector<10x16x128xbf16> to vector<8x16x128xbf16>
    %42 = vector.shape_cast %41 : vector<8x16x128xbf16> to vector<128x128xbf16>
    %c1 = arith.constant 1 : index
    %c0_17 = arith.constant 0 : index
    %c0_18 = arith.constant 0 : index
    %c0_19 = arith.constant 0 : index
    %43 = vector.load %arg5[%c1, %c0_17, %c0_18, %c0_19] : memref<3x3x128x128xbf16, #tpu.memory_space<vmem>>, vector<1x1x128x128xbf16>
    %44 = vector.shape_cast %43 : vector<1x1x128x128xbf16> to vector<128x128xbf16>
    %cst_20 = arith.constant dense<0.000000e+00> : vector<128x128xf32>
    %45 = tpu.matmul %42, %44, %cst_20 {dimension_numbers = #tpu.dot_dimension_numbers<[1], [0], [0], [1], [0, 0, 1, 1], [], []>} : vector<128x128xbf16>, vector<128x128xbf16>, vector<128x128xf32> -> vector<128x128xf32>
    %46 = arith.addf %40, %45 : vector<128x128xf32>
    %47 = vector.extract_strided_slice %34 {offsets = [2, 0, 0], sizes = [8, 16, 128], strides = [1, 1, 1]} : vector<10x16x128xbf16> to vector<8x16x128xbf16>
    %48 = vector.shape_cast %47 : vector<8x16x128xbf16> to vector<128x128xbf16>
    %c2 = arith.constant 2 : index
    %c0_21 = arith.constant 0 : index
    %c0_22 = arith.constant 0 : index
    %c0_23 = arith.constant 0 : index
    %49 = vector.load %arg5[%c2, %c0_21, %c0_22, %c0_23] : memref<3x3x128x128xbf16, #tpu.memory_space<vmem>>, vector<1x1x128x128xbf16>
    %50 = vector.shape_cast %49 : vector<1x1x128x128xbf16> to vector<128x128xbf16>
    %cst_24 = arith.constant dense<0.000000e+00> : vector<128x128xf32>
    %51 = tpu.matmul %48, %50, %cst_24 {dimension_numbers = #tpu.dot_dimension_numbers<[1], [0], [0], [1], [0, 0, 1, 1], [], []>} : vector<128x128xbf16>, vector<128x128xbf16>, vector<128x128xf32> -> vector<128x128xf32>
    %52 = arith.addf %46, %51 : vector<128x128xf32>
    %53 = vector.extract_strided_slice %32 {offsets = [0, 1, 0], sizes = [10, 16, 128], strides = [1, 1, 1]} : vector<10x18x128xbf16> to vector<10x16x128xbf16>
    %54 = vector.extract_strided_slice %53 {offsets = [0, 0, 0], sizes = [8, 16, 128], strides = [1, 1, 1]} : vector<10x16x128xbf16> to vector<8x16x128xbf16>
    %55 = vector.shape_cast %54 : vector<8x16x128xbf16> to vector<128x128xbf16>
    %c0_25 = arith.constant 0 : index
    %c1_26 = arith.constant 1 : index
    %c0_27 = arith.constant 0 : index
    %c0_28 = arith.constant 0 : index
    %56 = vector.load %arg5[%c0_25, %c1_26, %c0_27, %c0_28] : memref<3x3x128x128xbf16, #tpu.memory_space<vmem>>, vector<1x1x128x128xbf16>
    %57 = vector.shape_cast %56 : vector<1x1x128x128xbf16> to vector<128x128xbf16>
    %cst_29 = arith.constant dense<0.000000e+00> : vector<128x128xf32>
    %58 = tpu.matmul %55, %57, %cst_29 {dimension_numbers = #tpu.dot_dimension_numbers<[1], [0], [0], [1], [0, 0, 1, 1], [], []>} : vector<128x128xbf16>, vector<128x128xbf16>, vector<128x128xf32> -> vector<128x128xf32>
    %59 = arith.addf %52, %58 : vector<128x128xf32>
    %60 = vector.extract_strided_slice %53 {offsets = [1, 0, 0], sizes = [8, 16, 128], strides = [1, 1, 1]} : vector<10x16x128xbf16> to vector<8x16x128xbf16>
    %61 = vector.shape_cast %60 : vector<8x16x128xbf16> to vector<128x128xbf16>
    %c1_30 = arith.constant 1 : index
    %c1_31 = arith.constant 1 : index
    %c0_32 = arith.constant 0 : index
    %c0_33 = arith.constant 0 : index
    %62 = vector.load %arg5[%c1_30, %c1_31, %c0_32, %c0_33] : memref<3x3x128x128xbf16, #tpu.memory_space<vmem>>, vector<1x1x128x128xbf16>
    %63 = vector.shape_cast %62 : vector<1x1x128x128xbf16> to vector<128x128xbf16>
    %cst_34 = arith.constant dense<0.000000e+00> : vector<128x128xf32>
    %64 = tpu.matmul %61, %63, %cst_34 {dimension_numbers = #tpu.dot_dimension_numbers<[1], [0], [0], [1], [0, 0, 1, 1], [], []>} : vector<128x128xbf16>, vector<128x128xbf16>, vector<128x128xf32> -> vector<128x128xf32>
    %65 = arith.addf %59, %64 : vector<128x128xf32>
    %66 = vector.extract_strided_slice %53 {offsets = [2, 0, 0], sizes = [8, 16, 128], strides = [1, 1, 1]} : vector<10x16x128xbf16> to vector<8x16x128xbf16>
    %67 = vector.shape_cast %66 : vector<8x16x128xbf16> to vector<128x128xbf16>
    %c2_35 = arith.constant 2 : index
    %c1_36 = arith.constant 1 : index
    %c0_37 = arith.constant 0 : index
    %c0_38 = arith.constant 0 : index
    %68 = vector.load %arg5[%c2_35, %c1_36, %c0_37, %c0_38] : memref<3x3x128x128xbf16, #tpu.memory_space<vmem>>, vector<1x1x128x128xbf16>
    %69 = vector.shape_cast %68 : vector<1x1x128x128xbf16> to vector<128x128xbf16>
    %cst_39 = arith.constant dense<0.000000e+00> : vector<128x128xf32>
    %70 = tpu.matmul %67, %69, %cst_39 {dimension_numbers = #tpu.dot_dimension_numbers<[1], [0], [0], [1], [0, 0, 1, 1], [], []>} : vector<128x128xbf16>, vector<128x128xbf16>, vector<128x128xf32> -> vector<128x128xf32>
    %71 = arith.addf %65, %70 : vector<128x128xf32>
    %72 = vector.extract_strided_slice %32 {offsets = [0, 2, 0], sizes = [10, 16, 128], strides = [1, 1, 1]} : vector<10x18x128xbf16> to vector<10x16x128xbf16>
    %73 = vector.extract_strided_slice %72 {offsets = [0, 0, 0], sizes = [8, 16, 128], strides = [1, 1, 1]} : vector<10x16x128xbf16> to vector<8x16x128xbf16>
    %74 = vector.shape_cast %73 : vector<8x16x128xbf16> to vector<128x128xbf16>
    %c0_40 = arith.constant 0 : index
    %c2_41 = arith.constant 2 : index
    %c0_42 = arith.constant 0 : index
    %c0_43 = arith.constant 0 : index
    %75 = vector.load %arg5[%c0_40, %c2_41, %c0_42, %c0_43] : memref<3x3x128x128xbf16, #tpu.memory_space<vmem>>, vector<1x1x128x128xbf16>
    %76 = vector.shape_cast %75 : vector<1x1x128x128xbf16> to vector<128x128xbf16>
    %cst_44 = arith.constant dense<0.000000e+00> : vector<128x128xf32>
    %77 = tpu.matmul %74, %76, %cst_44 {dimension_numbers = #tpu.dot_dimension_numbers<[1], [0], [0], [1], [0, 0, 1, 1], [], []>} : vector<128x128xbf16>, vector<128x128xbf16>, vector<128x128xf32> -> vector<128x128xf32>
    %78 = arith.addf %71, %77 : vector<128x128xf32>
    %79 = vector.extract_strided_slice %72 {offsets = [1, 0, 0], sizes = [8, 16, 128], strides = [1, 1, 1]} : vector<10x16x128xbf16> to vector<8x16x128xbf16>
    %80 = vector.shape_cast %79 : vector<8x16x128xbf16> to vector<128x128xbf16>
    %c1_45 = arith.constant 1 : index
    %c2_46 = arith.constant 2 : index
    %c0_47 = arith.constant 0 : index
    %c0_48 = arith.constant 0 : index
    %81 = vector.load %arg5[%c1_45, %c2_46, %c0_47, %c0_48] : memref<3x3x128x128xbf16, #tpu.memory_space<vmem>>, vector<1x1x128x128xbf16>
    %82 = vector.shape_cast %81 : vector<1x1x128x128xbf16> to vector<128x128xbf16>
    %cst_49 = arith.constant dense<0.000000e+00> : vector<128x128xf32>
    %83 = tpu.matmul %80, %82, %cst_49 {dimension_numbers = #tpu.dot_dimension_numbers<[1], [0], [0], [1], [0, 0, 1, 1], [], []>} : vector<128x128xbf16>, vector<128x128xbf16>, vector<128x128xf32> -> vector<128x128xf32>
    %84 = arith.addf %78, %83 : vector<128x128xf32>
    %85 = vector.extract_strided_slice %72 {offsets = [2, 0, 0], sizes = [8, 16, 128], strides = [1, 1, 1]} : vector<10x16x128xbf16> to vector<8x16x128xbf16>
    %86 = vector.shape_cast %85 : vector<8x16x128xbf16> to vector<128x128xbf16>
    %c2_50 = arith.constant 2 : index
    %c2_51 = arith.constant 2 : index
    %c0_52 = arith.constant 0 : index
    %c0_53 = arith.constant 0 : index
    %87 = vector.load %arg5[%c2_50, %c2_51, %c0_52, %c0_53] : memref<3x3x128x128xbf16, #tpu.memory_space<vmem>>, vector<1x1x128x128xbf16>
    %88 = vector.shape_cast %87 : vector<1x1x128x128xbf16> to vector<128x128xbf16>
    %cst_54 = arith.constant dense<0.000000e+00> : vector<128x128xf32>
    %89 = tpu.matmul %86, %88, %cst_54 {dimension_numbers = #tpu.dot_dimension_numbers<[1], [0], [0], [1], [0, 0, 1, 1], [], []>} : vector<128x128xbf16>, vector<128x128xbf16>, vector<128x128xf32> -> vector<128x128xf32>
    %90 = arith.addf %84, %89 : vector<128x128xf32>
    %91 = vector.shape_cast %90 : vector<128x128xf32> to vector<8x16x128xf32>
    %c0_55 = arith.constant 0 : index
    %c0_56 = arith.constant 0 : index
    %c0_57 = arith.constant 0 : index
    %c0_58 = arith.constant 0 : index
    %92 = vector.load %arg6[%c0_55, %c0_56, %c0_57, %c0_58] : memref<1x8x16x128xf32, #tpu.memory_space<vmem>>, vector<1x8x16x128xf32>
    %93 = vector.shape_cast %92 : vector<1x8x16x128xf32> to vector<8x16x128xf32>
    %94 = vector.shape_cast %91 : vector<8x16x128xf32> to vector<1x8x16x128xf32>
    tpu.vector_store %arg6[%c0_55, %c0_56, %c0_57, %c0_58], %94 {strides = array<i32>} : memref<1x8x16x128xf32, #tpu.memory_space<vmem>>, vector<1x8x16x128xf32>,
    %cst_59 = arith.constant dense<0.000000e+00> : vector<128xf32>
    %95 = vector.multi_reduction <add>, %90, %cst_59 [0] : vector<128x128xf32> to vector<128xf32>
    %96 = vector.shape_cast %95 : vector<128xf32> to vector<1x128xf32>
    %c0_60 = arith.constant 0 : index
    %c0_61 = arith.constant 0 : index
    %c0_62 = arith.constant 0 : index
    %97 = vector.load %arg7[%c0_60, %c0_61, %c0_62] : memref<1x2x128xf32, #tpu.memory_space<vmem>>, vector<1x1x128xf32>
    %98 = vector.shape_cast %97 : vector<1x1x128xf32> to vector<1x128xf32>
    %99 = vector.shape_cast %96 : vector<1x128xf32> to vector<1x1x128xf32>
    tpu.vector_store %arg7[%c0_60, %c0_61, %c0_62], %99 {strides = array<i32>} : memref<1x2x128xf32, #tpu.memory_space<vmem>>, vector<1x1x128xf32>,
    %100 = arith.mulf %90, %90 : vector<128x128xf32>
    %cst_63 = arith.constant dense<0.000000e+00> : vector<128xf32>
    %101 = vector.multi_reduction <add>, %100, %cst_63 [0] : vector<128x128xf32> to vector<128xf32>
    %102 = vector.shape_cast %101 : vector<128xf32> to vector<1x128xf32>
    %c0_64 = arith.constant 0 : index
    %c1_65 = arith.constant 1 : index
    %c0_66 = arith.constant 0 : index
    %103 = vector.load %arg7[%c0_64, %c1_65, %c0_66] : memref<1x2x128xf32, #tpu.memory_space<vmem>>, vector<1x1x128xf32>
    %104 = vector.shape_cast %103 : vector<1x1x128xf32> to vector<1x128xf32>
    %105 = vector.shape_cast %102 : vector<1x128xf32> to vector<1x1x128xf32>
    tpu.vector_store %arg7[%c0_64, %c1_65, %c0_66], %105 {strides = array<i32>} : memref<1x2x128xf32, #tpu.memory_space<vmem>>, vector<1x1x128xf32>,
    return
  }
  func.func @transform_0(%arg0: i32, %arg1: i32) -> (i32, i32, i32, i32, i32) {
    %c0_i32 = arith.constant 0 : i32
    %c0_i32_0 = arith.constant 0 : i32
    %c0_i32_1 = arith.constant 0 : i32
    %c0_i32_2 = arith.constant 0 : i32
    return %arg0, %arg1, %c0_i32, %c0_i32_0, %c0_i32_1 : i32, i32, i32, i32, i32
  }
  func.func @transform_1(%arg0: i32, %arg1: i32) -> (i32, i32) {
    %c0_i32 = arith.constant 0 : i32
    %c0_i32_0 = arith.constant 0 : i32
    %c0_i32_1 = arith.constant 0 : i32
    return %c0_i32, %c0_i32_0 : i32, i32
  }
  func.func @transform_2(%arg0: i32, %arg1: i32) -> (i32, i32) {
    %c0_i32 = arith.constant 0 : i32
    %c0_i32_0 = arith.constant 0 : i32
    %c0_i32_1 = arith.constant 0 : i32
    return %c0_i32, %c0_i32_0 : i32, i32
  }
  func.func @transform_3(%arg0: i32, %arg1: i32) -> (i32, i32, i32, i32) {
    %c0_i32 = arith.constant 0 : i32
    %c0_i32_0 = arith.constant 0 : i32
    %c0_i32_1 = arith.constant 0 : i32
    %c0_i32_2 = arith.constant 0 : i32
    %c0_i32_3 = arith.constant 0 : i32
    return %c0_i32, %c0_i32_0, %c0_i32_1, %c0_i32_2 : i32, i32, i32, i32
  }
  func.func @transform_4(%arg0: i32, %arg1: i32) -> (i32, i32, i32, i32) {
    %c0_i32 = arith.constant 0 : i32
    %c0_i32_0 = arith.constant 0 : i32
    %c0_i32_1 = arith.constant 0 : i32
    return %arg0, %arg1, %c0_i32, %c0_i32_0 : i32, i32, i32, i32
  }
  func.func @transform_5(%arg0: i32, %arg1: i32) -> (i32, i32, i32) {
    %c2_i32 = arith.constant 2 : i32
    %0 = arith.muli %arg0, %c2_i32 : i32
    %1 = arith.addi %0, %arg1 : i32
    %c0_i32 = arith.constant 0 : i32
    %c0_i32_0 = arith.constant 0 : i32
    %c0_i32_1 = arith.constant 0 : i32
    return %1, %c0_i32, %c0_i32_0 : i32, i32, i32
  }
}

module attributes {stable_mosaic.version = 11 : i64} {
  func.func @_bn_relu_kernel(%arg0: i32, %arg1: i32, %arg2: memref<1x8x16x128xf32, #tpu.memory_space<vmem>>, %arg3: memref<1x128xf32, #tpu.memory_space<vmem>>, %arg4: memref<1x128xf32, #tpu.memory_space<vmem>>, %arg5: memref<1x8x16x128xf32, #tpu.memory_space<vmem>>) attributes {dimension_semantics = [#tpu.dimension_semantics<parallel>, #tpu.dimension_semantics<parallel>], iteration_bounds = array<i64: 2, 2>, scalar_prefetch = 0 : i64, scratch_operands = 0 : i64, tpu.core_type = #tpu.core_type<tc>, window_params = [{transform_indices = @transform_0, window_bounds = array<i64: 1, 8, 16, 128>}, {pipeline_mode = #tpu.pipeline_mode<synchronous>, transform_indices = @transform_1, window_bounds = array<i64: 1, 128>}, {pipeline_mode = #tpu.pipeline_mode<synchronous>, transform_indices = @transform_2, window_bounds = array<i64: 1, 128>}, {transform_indices = @transform_3, window_bounds = array<i64: 1, 8, 16, 128>}]} {
    %c0 = arith.constant 0 : index
    %c0_0 = arith.constant 0 : index
    %0 = vector.load %arg3[%c0, %c0_0] : memref<1x128xf32, #tpu.memory_space<vmem>>, vector<1x128xf32>
    %1 = vector.shape_cast %0 : vector<1x128xf32> to vector<1x1x128xf32>
    %c0_1 = arith.constant 0 : index
    %c0_2 = arith.constant 0 : index
    %2 = vector.load %arg4[%c0_1, %c0_2] : memref<1x128xf32, #tpu.memory_space<vmem>>, vector<1x128xf32>
    %3 = vector.shape_cast %2 : vector<1x128xf32> to vector<1x1x128xf32>
    %c0_3 = arith.constant 0 : index
    %c0_4 = arith.constant 0 : index
    %c0_5 = arith.constant 0 : index
    %c0_6 = arith.constant 0 : index
    %4 = vector.load %arg2[%c0_3, %c0_4, %c0_5, %c0_6] : memref<1x8x16x128xf32, #tpu.memory_space<vmem>>, vector<1x8x16x128xf32>
    %5 = vector.shape_cast %4 : vector<1x8x16x128xf32> to vector<8x16x128xf32>
    %6 = vector.broadcast %1 : vector<1x1x128xf32> to vector<8x16x128xf32>
    %7 = arith.mulf %5, %6 : vector<8x16x128xf32>
    %8 = vector.broadcast %3 : vector<1x1x128xf32> to vector<8x16x128xf32>
    %9 = arith.addf %7, %8 : vector<8x16x128xf32>
    %cst = arith.constant 0.000000e+00 : f32
    %10 = vector.broadcast %cst : f32 to vector<8x16x128xf32>
    %11 = arith.maximumf %9, %10 : vector<8x16x128xf32>
    %c0_7 = arith.constant 0 : index
    %c0_8 = arith.constant 0 : index
    %c0_9 = arith.constant 0 : index
    %c0_10 = arith.constant 0 : index
    %12 = vector.load %arg5[%c0_7, %c0_8, %c0_9, %c0_10] : memref<1x8x16x128xf32, #tpu.memory_space<vmem>>, vector<1x8x16x128xf32>
    %13 = vector.shape_cast %12 : vector<1x8x16x128xf32> to vector<8x16x128xf32>
    %14 = vector.shape_cast %11 : vector<8x16x128xf32> to vector<1x8x16x128xf32>
    tpu.vector_store %arg5[%c0_7, %c0_8, %c0_9, %c0_10], %14 {strides = array<i32>} : memref<1x8x16x128xf32, #tpu.memory_space<vmem>>, vector<1x8x16x128xf32>,
    return
  }
  func.func @transform_0(%arg0: i32, %arg1: i32) -> (i32, i32, i32, i32) {
    %c0_i32 = arith.constant 0 : i32
    %c0_i32_0 = arith.constant 0 : i32
    %c0_i32_1 = arith.constant 0 : i32
    return %arg0, %arg1, %c0_i32, %c0_i32_0 : i32, i32, i32, i32
  }
  func.func @transform_1(%arg0: i32, %arg1: i32) -> (i32, i32) {
    %c0_i32 = arith.constant 0 : i32
    %c0_i32_0 = arith.constant 0 : i32
    %c0_i32_1 = arith.constant 0 : i32
    return %c0_i32, %c0_i32_0 : i32, i32
  }
  func.func @transform_2(%arg0: i32, %arg1: i32) -> (i32, i32) {
    %c0_i32 = arith.constant 0 : i32
    %c0_i32_0 = arith.constant 0 : i32
    %c0_i32_1 = arith.constant 0 : i32
    return %c0_i32, %c0_i32_0 : i32, i32
  }
  func.func @transform_3(%arg0: i32, %arg1: i32) -> (i32, i32, i32, i32) {
    %c0_i32 = arith.constant 0 : i32
    %c0_i32_0 = arith.constant 0 : i32
    %c0_i32_1 = arith.constant 0 : i32
    return %arg0, %arg1, %c0_i32, %c0_i32_0 : i32, i32, i32, i32
  }
}

</mosaic_0001>

<bundles_post_ra>
// kernel: double_conv.5
= control target key start
LH: loop header
LB: loop body
LE: loop exit
PB: predicated region body
PF: predicated region fallthrough
CT: control target
= control target key end

     0   :  { %s1154_s0 = inlined_call_operand.hbm [shape: f32[2,16,16,128], index: 0, kind: input, shape index: {}]   ;;  %s1155_s1 = inlined_call_operand.hbm [shape: f32[1,128], index: 1, kind: input, shape index: {}]   ;;  %s1156_s2 = inlined_call_operand.hbm [shape: f32[1,128], index: 2, kind: input, shape index: {}]   ;;  %s1157_s3 = inlined_call_operand.hbm [shape: f32[2,16,16,128], index: 3, kind: output, shape index: {}]  }
   0x1   :  { %1166 = sst [smem:[#allocation14_spill]] %s1155_s1 }
   0x2   :  { %1167 = sst [smem:[#allocation15_spill]] %s1156_s2 }
   0x3   :  { %8 = vsyncpa [#allocation3], 0 }
   0x4   :  { %10 = vsyncpa [#allocation3 + $0x1], 0 }
   0x5   :  { %11 = vsyncpa [#allocation6], 0 }
   0x6   :  { %12 = vsyncpa [#allocation4], 0 }
   0x7   :  { %14 = vsyncpa [#allocation4 + $0x1], 0  ;;  %s803_s12 = smov 0   ;;  %s805_s13 = smov 0  }
   0x8   :  { %s807_s14 = smov 0   ;;  %s809_s15 = smov 0  }
   0x9   :  { %s811_s16 = smov 0   ;;  %s813_s17 = smov 0  }
   0xa   :  { %s815_s18 = smov 0   ;;  %s817_s19 = smov 0  }
   0xb LB: > { %1168 = sst [smem:[#allocation12_spill]] %s765_s17  ;;  %s455_s20 = sadd.s32 4294967295, %s773_s19   ;;  %s773_s19 = sphi %s817_s19, %s20_s19   ;;  %s769_s18 = sphi %s815_s18, %s1193_s18   ;;  %s765_s17 = sphi %s813_s17, %s1188_s17   ;;  %s761_s16 = sphi %s811_s16, %s1192_s16   ;;  %s757_s15 = sphi %s809_s15, %s1187_s15   ;;  %s753_s14 = sphi %s807_s14, %s1191_s14   ;;  %s749_s13 = sphi %s805_s13, %s1190_s13   ;;  %s745_s12 = sphi %s803_s12, %s1189_s12  }
   0xc   : > { %s456_s21 = sadd.s32 4294967294, %s773_s19   ;;  %p48_p0 = scmp.ne.s32.totalorder %s753_s14, %s749_s13 }
   0xd   : > { %p49_p1 = scmp.eq.s32.totalorder %s773_s19, 0  ;;  %p54_p2 = scmp.ne.s32.totalorder %s749_s13, %s745_s12 }
   0xe   : > { %p851_p3 = scmp.eq.s32.totalorder %s455_s20, 0  ;;  %p122_p4 = scmp.eq.s32.totalorder %s455_s20, 3 }
   0xf   : > { %p855_p5 = por %p49_p1, %p48_p0  ;;  %p128_p6 = scmp.eq.s32.totalorder %s456_s21, 3 }
  0x10   : > { %s1169_s23 = scalar_select %p851_p3, 1, 0 }
  0x11   : > { %p861_p7 = por %p851_p3, %p54_p2  ;;  %p865_p8 = por %p122_p4, %p48_p0 }
  0x12   : > { %p869_p9 = por %p128_p6, %p54_p2  ;;  %p457_p10 = scmp.ge.s32.totalorder %s773_s19, 1 }
  0x13   : > { %s1171_s25 = scalar_select %p861_p7, 1, 0 }
  0x14   : > { %s1172_s26 = scalar_select %p865_p8, 1, 0 }
  0x15   : > { %s1173_s27 = scalar_select %p869_p9, 1, 0 }
  0x16   : > { %p135_p11 = scmp.lt.s32.totalorder %s773_s19, 5  ;;  %s775_s29 = smov [#allocation5]  }
  0x17   : > { %s148_s30 = sshll.u32 %s775_s29, 4  ;;  %p511_p13 = scmp.lt.s32.totalorder %s773_s19, 4  ;;  %s149_s30 = int_to_ptr.vmem [resolvable:$true] %s148_s30 }
  0x18   : > { %p875_p12 = pnand %p457_p10, %p135_p11  ;;  %s776_s5 = smov [#allocation7]  }
  0x19   : > { %p884_p1 = pnand %p511_p13, %p855_p5  ;;  %s159_s6 = sshll.u32 %s776_s5, 4  ;;  %s894_s6 = int_to_ptr.vmem [resolvable:$true] %s159_s6 }
  0x1a   : > { %s1174_s28 = scalar_select %p875_p12, 1, 0 }
  0x1b   : > { %p494_p0 = pneg %p875_p12  ;;  %s1177_s1 = sld [smem:[#allocation14_spill]] }
  0x1c   : > { %s1175_s4 = scalar_select %p884_p1, 1, 0 }
  0x1d   : > { %p890_p2 = pnand %p494_p0, %p851_p3 }
  0x1f   : > { %p587_p5 = pneg %p890_p2 }
  0x21   : > { %s585_s10 = scalar_lea.hbm %s1177_s1, 16 }
  0x22   : > { %p586_p4 = scmp.ne.s32.totalorder %s1177_s1, %s585_s10  ;;  %p592_p11 = scmp.lt.u32.totalorder %s585_s10, %s1177_s1 }
  0x24   : > { %p588_p6 = pnand %p587_p5, %p586_p4 }
  0x26   : > { %p589_p10 = pneg %p588_p6 }
  0x28   : > { %p594_p13 = pnand %p592_p11, %p589_p10 }
  0x2a   : > { %597 = shalt.err (!%p594_p13)
}
  0x2b   : > { %s598_s29 = scalar_lea.vmem %s149_s30, 16  ;;  %s605_s5 = scalar_lea.vmem %s149_s30, 32 }
  0x2c   : > { %p599_p0 = scmp.ne.s32.totalorder %s149_s30, %s598_s29  ;;  %p606_p3 = scmp.lt.s32.totalorder %s149_s30, %s149_s30 }
  0x2d   : > { %p607_p7 = scmp.lt.s32.totalorder %s605_s5, %s598_s29 }
  0x2e   : > { %p601_p9 = pnand %p599_p0, %p587_p5 }
  0x2f   : > { %p608_p12 = por %p607_p7, %p606_p3 }
  0x30   : > { %p602_p8 = pneg %p601_p9 }
  0x32   : > { %p609_p1 = pnand %p608_p12, %p602_p8 }
  0x34   : > { %612 = shalt.err (!%p609_p1)
}
  0x35   : > { %497 = dma.hbm_to_vmem [thread:$0]  (!%p890_p2), %s1177_s1, 16, %s149_s30, [#allocation6]  }
  0x36   : > { %s1178_s2 = sld [smem:[#allocation15_spill]] }
  0x3c   : > { %s613_s20 = scalar_lea.hbm %s1178_s2, 16 }
  0x3d   : > { %p614_p9 = scmp.ne.s32.totalorder %s1178_s2, %s613_s20  ;;  %p620_p8 = scmp.lt.u32.totalorder %s613_s20, %s1178_s2 }
  0x3f   : > { %p616_p3 = pnand %p614_p9, %p587_p5 }
  0x41   : > { %p617_p7 = pneg %p616_p3 }
  0x43   : > { %p622_p12 = pnand %p620_p8, %p617_p7 }
  0x45   : > { %625 = shalt.err (!%p622_p12)
}
  0x46   : > { %s626_s30 = scalar_lea.vmem %s894_s6, 16  ;;  %s633_s8 = scalar_lea.vmem %s894_s6, 32 }
  0x47   : > { %p627_p1 = scmp.ne.s32.totalorder %s894_s6, %s626_s30  ;;  %p634_p10 = scmp.lt.s32.totalorder %s894_s6, %s894_s6 }
  0x48   : > { %p635_p11 = scmp.lt.s32.totalorder %s633_s8, %s626_s30 }
  0x49   : > { %p629_p4 = pnand %p627_p1, %p587_p5 }
  0x4a   : > { %p636_p13 = por %p635_p11, %p634_p10 }
  0x4b   : > { %p630_p6 = pneg %p629_p4 }
  0x4d   : > { %p637_p0 = pnand %p636_p13, %p630_p6 }
  0x4f   : > { %640 = shalt.err (!%p637_p0)
}
  0x50   : > { %500 = dma.hbm_to_vmem [thread:$0]  (!%p890_p2), %s1178_s2, 16, %s894_s6, [#allocation6]  }
  0x51   : > { %s29_s11 = sadd.s32 1, %s765_s17  ;;  %s32_s20 = sadd.s32 1, %s769_s18 }
  0x52   : > { %p30_p5 = scmp.ge.s32.totalorder %s29_s11, 2  ;;  %s170_s21 = sand.u32 1, %s753_s14  }
  0x53   : > { %s461_s24 = sshll.u32 %s170_s21, 7  ;;  %s480_s29 = sshll.u32 %s765_s17, 4 }
  0x54   : > { %s1195_s11 = smov (%p30_p5, %s29_s11), 0  ;;  %s1197_s20 = smov (!%p30_p5, %s32_s20), %s769_s18 }
  0x55   : > { %1179 = sst [smem:[#allocation13_spill]] %s1195_s11  ;;  %s37_s7 = ssub.s32 %s765_s17, %s1195_s11 }
  0x56   : > { %p34_p9 = scmp.ge.s32.totalorder %s1197_s20, 2  ;;  %s464_s5 = sshll.u32 %s769_s18, 5 }
  0x57   : > { %s174_s30 = scalar_lea.vmem [#allocation2], %s461_s24  ;;  %s181_s8 = sadd.s32 %s480_s29, %s464_s5 }
  0x58   : > { %s184_s6 = sshll.u32 %s174_s30, 4  ;;  %s1199_s20 = smov (%p34_p9, %s1197_s20), 0  ;;  %s956_s6 = int_to_ptr.vmem [resolvable:$true] %s184_s6 }
  0x59   : > { %s36_s9 = ssub.s32 %s769_s18, %s1199_s20  ;;  %s465_s10 = sshll.u32 %s181_s8, 7 }
  0x5a   : > { %s38_s22 = sor.u32 %s37_s7, %s36_s9  ;;  %s963_s11 = scalar_lea.hbm %s1154_s0, %s465_s10 }
  0x5b   : > { %p39_p2 = scmp.eq.s32.totalorder %s38_s22, 0  ;;  %s1180_s24 = sadd.s32 1, %s753_s14 }
  0x5c   : > { %s970_s17 = scalar_lea.sflag [#allocation3], %s170_s21  ;;  %s641_s29 = scalar_lea.hbm %s963_s11, 2048 }
  0x5d   : > { %s968_s30 = scalar_select %p39_p2, %s753_s14, %s1180_s24  }
  0x5e   : > { %p642_p3 = scmp.ne.s32.totalorder %s963_s11, %s641_s29  ;;  %p1181_p7 = scmp.ne.s32.totalorder %s1175_s4, 0 }
  0x5f   : > { %s646_s7 = scalar_lea.hbm %s1154_s0, 8192  ;;  %p647_p4 = scmp.lt.u32.totalorder %s963_s11, %s1154_s0 }
  0x60   : > { %p643_p8 = pneg %p1181_p7  ;;  %p648_p6 = scmp.lt.u32.totalorder %s646_s7, %s641_s29 }
  0x61   : > { %p650_p11 = scmp.lt.u32.totalorder %s641_s29, %s963_s11 }
  0x62   : > { %p644_p12 = pnand %p643_p8, %p642_p3  ;;  %p649_p10 = por %p648_p6, %p647_p4 }
  0x64   : > { %p645_p1 = pneg %p644_p12  ;;  %p651_p13 = por %p650_p11, %p649_p10 }
  0x66   : > { %p652_p0 = pnand %p651_p13, %p645_p1 }
  0x68   : > { %655 = shalt.err (!%p652_p0)
}
  0x69   : > { %s656_s22 = scalar_lea.vmem %s956_s6, 2048  ;;  %s777_s21 = smov [#allocation2]  }
  0x6a   : > { %p657_p5 = scmp.ne.s32.totalorder %s956_s6, %s656_s22  ;;  %s661_s9 = sshll.u32 %s777_s21, 4  ;;  %s662_s9 = int_to_ptr.vmem [resolvable:$false] %s661_s9 }
  0x6b   : > { %s663_s10 = scalar_lea.vmem %s662_s9, 4096  ;;  %p664_p3 = scmp.lt.s32.totalorder %s956_s6, %s662_s9 }
  0x6c   : > { %p659_p9 = pnand %p657_p5, %p643_p8  ;;  %p665_p12 = scmp.lt.s32.totalorder %s663_s10, %s656_s22 }
  0x6e   : > { %p660_p2 = pneg %p659_p9  ;;  %p666_p4 = por %p665_p12, %p664_p3 }
  0x70   : > { %p667_p6 = pnand %p666_p4, %p660_p2 }
  0x72   : > { %670 = shalt.err (!%p667_p6)
}
  0x73   : > { %s778_s24 = smov 128   ;;  %s779_s29 = smov 8  }
  0x74   : > { %504 = dma.hbm_to_vmem [thread:$0]  (!%p1181_p7), %s963_s11, 2048, %s956_s6, %s970_s17, %s778_s24, %s778_s24, %s779_s29  }
  0x75   : > { %p1182_p8 = scmp.ne.s32.totalorder %s1174_s28, 0 }
  0x76   : > { %s1001_s1 = sand.u32 (!%p1182_p8), 1, %s749_s13   ;;  %p1183_p1 = scmp.ne.s32.totalorder (!%p1182_p8), %s1171_s25, 0 }
  0x77   : > { %196 = sbr.rel (%p1182_p8) target bundleno = 163 (0xa3), region = 32  ;;  %s467_s2 = sshll.u32 (!%p1182_p8), %s1001_s1, 7 }
  0x78   : > { %s199_s7 = scalar_lea.sflag (!%p1182_p8), [#allocation3], %s1001_s1  ;;  %s1007_s5 = scalar_lea.vmem (!%p1182_p8), [#allocation2], %s467_s2 }
  0x7e   : > { %732 = dma.done.wait (%p1183_p1), %s199_s7, 2048  }
  0x7f   : > { %734 = vsyncadd (%p1183_p1), %s199_s7, 4294965248  ;;  %p1184_p7 = scmp.ne.s32.totalorder %s1169_s23, 0 }
  0x81   : > { %736 = dma.done.wait (%p1184_p7), [#allocation6], 32  }
  0x82   : > { %738 = vsyncadd (%p1184_p7), [#allocation6], 4294967264  ;;  %v1017_v0 = vld [vmem:[#allocation5] ss:$0 sm:$0xff]  ;;  %v1019_v1 = vld [vmem:[#allocation7] ss:$0 sm:$0xff] }
  0x83   : > { %v237_v2 = vld [vmem:[%s1007_s5] sm:$0xff]  ;;  %v238_v4 = vld [vmem:[%s1007_s5 + $0x8] sm:$0xff]  ;;  %v239_v5 = vld [vmem:[%s1007_s5 + $0x10] sm:$0xff]  ;;  %s481_s17 = sshll.u32 %s757_s15, 4  ;;  %s476_s23 = sshll.u32 %s761_s16, 5 }
  0x84   : > { %v259_v3 = vmul.f32 %v1017_v0, %v237_v2  ;;  %v240_v6 = vld [vmem:[%s1007_s5 + $0x18] sm:$0xff]  ;;  %v260_v7 = vmul.f32 %v1017_v0, %v238_v4  ;;  %v261_v8 = vmul.f32 %v1017_v0, %v239_v5  ;;  %v241_v10 = vld [vmem:[%s1007_s5 + $0x20] sm:$0xff]  ;;  %v242_v11 = vld [vmem:[%s1007_s5 + $0x28] sm:$0xff]  ;;  %s1056_s15 = scalar_lea.vmem [#allocation8], %s467_s2  ;;  %s1061_s16 = sadd.s32 %s481_s17, %s476_s23 }
  0x85   : > { %v262_v9 = vmul.f32 %v1017_v0, %v240_v6  ;;  %v243_v12 = vld [vmem:[%s1007_s5 + $0x30] sm:$0xff]  ;;  %v263_v14 = vmul.f32 %v1017_v0, %v241_v10  ;;  %v264_v15 = vmul.f32 %v1017_v0, %v242_v11  ;;  %v244_v17 = vld [vmem:[%s1007_s5 + $0x38] sm:$0xff]  ;;  %v245_v22 = vld [vmem:[%s1007_s5 + $0x40] sm:$0xff]  ;;  %s477_s25 = sshll.u32 %s1061_s16, 7  ;;  %s346_s28 = sshll.u32 %s1056_s15, 4  ;;  %s1093_s28 = int_to_ptr.vmem [resolvable:$true] %s346_s28 }
  0x86   : > { %v281_v13 = vadd.f32 %v1019_v1, %v259_v3  ;;  %v265_v16 = vmul.f32 %v1017_v0, %v243_v12  ;;  %v282_v18 = vadd.f32 %v1019_v1, %v260_v7  ;;  %v283_v19 = vadd.f32 %v1019_v1, %v261_v8  ;;  %v246_v27 = vld [vmem:[%s1007_s5 + $0x48] sm:$0xff]  ;;  %v247_v28 = vld [vmem:[%s1007_s5 + $0x50] sm:$0xff]  ;;  %v248_v29 = vld [vmem:[%s1007_s5 + $0x58] sm:$0xff]  ;;  %s1091_s6 = scalar_lea.hbm %s1157_s3, %s477_s25  ;;  %s330_s8 = scalar_lea.sflag [#allocation4], %s1001_s1 }
  0x87   : > { %v284_v20 = vadd.f32 %v1019_v1, %v262_v9  ;;  %v266_v21 = vmul.f32 %v1017_v0, %v244_v17  ;;  %v285_v24 = vadd.f32 %v1019_v1, %v263_v14  ;;  %v286_v25 = vadd.f32 %v1019_v1, %v264_v15  ;;  %v249_v34 = vld [vmem:[%s1007_s5 + $0x60] sm:$0xff]  ;;  %v250_v35 = vld [vmem:[%s1007_s5 + $0x68] sm:$0xff]  ;;  %v251_v36 = vld [vmem:[%s1007_s5 + $0x70] sm:$0xff]  ;;  %s671_s22 = scalar_lea.vmem %s1093_s28, 2048  ;;  %p1185_p11 = scmp.ne.s32.totalorder %s1172_s26, 0 }
  0x88   : > { %v297_v23 = vmax.f32 %v281_v13, 0.0  ;;  %v287_v26 = vadd.f32 %v1019_v1, %v265_v16  ;;  %v298_v30 = vmax.f32 %v282_v18, 0.0  ;;  %v299_v31 = vmax.f32 %v283_v19, 0.0  ;;  %v252_v41 = vld [vmem:[%s1007_s5 + $0x78] sm:$0xff]  ;;  %p672_p10 = scmp.ne.s32.totalorder %s1093_s28, %s671_s22  ;;  %s780_s21 = smov [#allocation8]  }
  0x89   : > { %v300_v32 = vmax.f32 %v284_v20, 0.0  ;;  %v288_v33 = vadd.f32 %v1019_v1, %v266_v21  ;;  %v301_v37 = vmax.f32 %v285_v24, 0.0  ;;  %v302_v38 = vmax.f32 %v286_v25, 0.0  ;;  %s675_s9 = sshll.u32 %s780_s21, 4  ;;  %s676_s9 = int_to_ptr.vmem [resolvable:$false] %s675_s9 }
  0x8a   : > { %313 = vst [vmem:[%s1056_s15] sm:$0xff] %v297_v23  ;;  %v303_v39 = vmax.f32 %v287_v26, 0.0  ;;  %v267_v40 = vmul.f32 %v1017_v0, %v245_v22  ;;  %314 = vst [vmem:[%s1056_s15 + $0x8] sm:$0xff] %v298_v30  ;;  %v268_v43 = vmul.f32 %v1017_v0, %v246_v27  ;;  %v269_v44 = vmul.f32 %v1017_v0, %v247_v28  ;;  %p673_p13 = pnand %p672_p10, %p1185_p11  ;;  %s677_s10 = scalar_lea.vmem %s676_s9, 4096 }
  0x8b   : > { %315 = vst [vmem:[%s1056_s15 + $0x10] sm:$0xff] %v299_v31  ;;  %316 = vst [vmem:[%s1056_s15 + $0x18] sm:$0xff] %v300_v32  ;;  %v304_v42 = vmax.f32 %v288_v33, 0.0  ;;  %v270_v45 = vmul.f32 %v1017_v0, %v248_v29  ;;  %v271_v47 = vmul.f32 %v1017_v0, %v249_v34  ;;  %v272_v48 = vmul.f32 %v1017_v0, %v250_v35  ;;  %p678_p5 = scmp.lt.s32.totalorder %s1093_s28, %s676_s9  ;;  %p679_p9 = scmp.lt.s32.totalorder %s677_s10, %s671_s22 }
  0x8c   : > { %317 = vst [vmem:[%s1056_s15 + $0x20] sm:$0xff] %v301_v37  ;;  %318 = vst [vmem:[%s1056_s15 + $0x28] sm:$0xff] %v302_v38  ;;  %v289_v46 = vadd.f32 %v1019_v1, %v267_v40  ;;  %v273_v49 = vmul.f32 %v1017_v0, %v251_v36  ;;  %v290_v50 = vadd.f32 %v1019_v1, %v268_v43  ;;  %p674_p0 = pneg %p673_p13 }
  0x8d   : > { %319 = vst [vmem:[%s1056_s15 + $0x30] sm:$0xff] %v303_v39  ;;  %320 = vst [vmem:[%s1056_s15 + $0x38] sm:$0xff] %v304_v42  ;;  %v291_v51 = vadd.f32 %v1019_v1, %v269_v44  ;;  %v292_v52 = vadd.f32 %v1019_v1, %v270_v45  ;;  %v274_v53 = vmul.f32 %v1017_v0, %v252_v41  ;;  %p680_p2 = por %p679_p9, %p678_p5 }
  0x8e   : > { %v305_v54 = vmax.f32 %v289_v46, 0.0  ;;  %v293_v55 = vadd.f32 %v1019_v1, %v271_v47  ;;  %v294_v56 = vadd.f32 %v1019_v1, %v272_v48  ;;  %v295_v57 = vadd.f32 %v1019_v1, %v273_v49 }
  0x8f   : > { %v306_v58 = vmax.f32 %v290_v50, 0.0  ;;  %v307_v59 = vmax.f32 %v291_v51, 0.0  ;;  %v308_v60 = vmax.f32 %v292_v52, 0.0  ;;  %v296_v61 = vadd.f32 %v1019_v1, %v274_v53  ;;  %p681_p3 = pnand %p680_p2, %p674_p0 }
  0x90   : > { %321 = vst [vmem:[%s1056_s15 + $0x40] sm:$0xff] %v305_v54  ;;  %v309_v62 = vmax.f32 %v293_v55, 0.0  ;;  %v310_v63 = vmax.f32 %v294_v56, 0.0  ;;  %v311_v0 = vmax.f32 %v295_v57, 0.0 }
  0x91   : > { %322 = vst [vmem:[%s1056_s15 + $0x48] sm:$0xff] %v306_v58  ;;  %323 = vst [vmem:[%s1056_s15 + $0x50] sm:$0xff] %v307_v59  ;;  %v312_v2 = vmax.f32 %v296_v61, 0.0 }
  0x92   : > { %324 = vst [vmem:[%s1056_s15 + $0x58] sm:$0xff] %v308_v60  ;;  %325 = vst [vmem:[%s1056_s15 + $0x60] sm:$0xff] %v309_v62 }
  0x93   : > { %326 = vst [vmem:[%s1056_s15 + $0x68] sm:$0xff] %v310_v63  ;;  %327 = vst [vmem:[%s1056_s15 + $0x70] sm:$0xff] %v311_v0 }
  0x94   : > { %328 = vst [vmem:[%s1056_s15 + $0x78] sm:$0xff] %v312_v2 }
  0x95   : > { %684 = shalt.err (!%p681_p3)
}
  0x96   : > { %s685_s24 = scalar_lea.hbm %s1091_s6, 2048  ;;  %s689_s7 = scalar_lea.hbm %s1157_s3, 8192 }
  0x97   : > { %p686_p12 = scmp.ne.s32.totalorder %s1091_s6, %s685_s24  ;;  %p690_p8 = scmp.lt.u32.totalorder %s1091_s6, %s1157_s3 }
  0x98   : > { %p691_p1 = scmp.lt.u32.totalorder %s689_s7, %s685_s24  ;;  %p693_p10 = scmp.lt.u32.totalorder %s685_s24, %s1091_s6 }
  0x99   : > { %p687_p4 = pnand %p686_p12, %p1185_p11 }
  0x9a   : > { %p692_p7 = por %p691_p1, %p690_p8 }
  0x9b   : > { %p688_p6 = pneg %p687_p4 }
  0x9c   : > { %p694_p13 = por %p693_p10, %p692_p7 }
  0x9e   : > { %p695_p0 = pnand %p694_p13, %p688_p6 }
  0xa0   : > { %698 = shalt.err (!%p695_p0)
}
  0xa1   : > { %s781_s23 = smov 128   ;;  %s782_s15 = smov 8  }
  0xa2   : > { %492 = dma.vmem_to_hbm [thread:$0]  (%p1185_p11), %s1093_s28, 2048, %s1091_s6, %s330_s8, %s781_s23, %s781_s23, %s782_s15  }
  0xa3 PF: > { %p514_p5 = scmp.ge.s32.totalorder %s773_s19, 2  ;;  %s361_s16 = sand.u32 1, %s745_s12  }
  0xa4   : > { %p1186_p9 = scmp.ne.s32.totalorder %s1173_s27, 0  ;;  %s362_s25 = scalar_lea.sflag [#allocation4], %s361_s16 }
  0xa6   : > { %p506_p2 = pnand %p514_p5, %p1186_p9 }
  0xa8   : > { %740 = dma.done.wait (!%p506_p2), %s362_s25, 2048  }
  0xa9   : > { %742 = vsyncadd (!%p506_p2), %s362_s25, 4294965248  ;;  %s20_s19 = sadd.s32 1, %s773_s19   ;;  %s1187_s15 = sld [smem:[#allocation12_spill]] }
  0xaa   : > { %p17_p3 = scmp.ge.s32.totalorder %s20_s19, 6   ;;  %s1188_s17 = sld [smem:[#allocation13_spill]] }
  0xab   : > { %s1189_s12 = smov %s749_s13  ;;  %s1190_s13 = smov %s753_s14 }
  0xac   : > { %s1191_s14 = smov %s968_s30  ;;  %s1192_s16 = smov %s769_s18 }
  0xad   : > { %s1193_s18 = smov %s1199_s20  ;;  %19 = sbr.rel (!%p17_p3) target bundleno = 11 (0xb), region = 85 }
  0xb4   :  { %367 = vsyncpa [#allocation3], 1 }
  0xb5   :  { %369 = vsyncpa [#allocation3 + $0x1], 1 }
  0xb6   :  { %370 = vsyncpa [#allocation6], 1 }
  0xb7   :  { %371 = vsyncpa [#allocation4], 1 }
  0xb8   :  { %373 = vsyncpa [#allocation4 + $0x1], 1 }

// kernel: double_conv.3
= control target key start
LH: loop header
LB: loop body
LE: loop exit
PB: predicated region body
PF: predicated region fallthrough
CT: control target
= control target key end

     0   :  { %s4532_s0 = inlined_call_operand.hbm [shape: bf16[2,2,10,18,128], index: 0, kind: input, shape index: {}]   ;;  %s4533_s1 = inlined_call_operand.hbm [shape: bf16[3,3,128,128], index: 1, kind: input, shape index: {}]   ;;  %s4534_s2 = inlined_call_operand.hbm [shape: f32[2,16,16,128], index: 2, kind: output, shape index: {0}]   ;;  %s4535_s3 = inlined_call_operand.hbm [shape: f32[4,2,128], index: 3, kind: output, shape index: {1}]  }
   0x1   :  { %4555 = sst [smem:[#allocation21_spill]] %s4533_s1 }
   0x2   :  { %4556 = sst [smem:[#allocation22_spill]] %s4534_s2 }
   0x3   :  { %4557 = sst [smem:[#allocation23_spill]] %s4535_s3 }
   0x4   :  { %9 = vsyncpa [#allocation3], 0 }
   0x5   :  { %11 = vsyncpa [#allocation3 + $0x1], 0 }
   0x6   :  { %12 = vsyncpa [#allocation6], 0 }
   0x7   :  { %13 = vsyncpa [#allocation4], 0 }
   0x8   :  { %15 = vsyncpa [#allocation4 + $0x1], 0 }
   0x9   :  { %16 = vsyncpa [#allocation9], 0 }
   0xa   :  { %18 = vsyncpa [#allocation9 + $0x1], 0  ;;  %s3718_s12 = smov 0   ;;  %s3720_s13 = smov 0  }
   0xb   :  { %s3722_s14 = smov 0   ;;  %s3724_s15 = smov 0  }
   0xc   :  { %s3726_s16 = smov 0   ;;  %s3728_s17 = smov 0  }
   0xd   :  { %s3730_s18 = smov 0   ;;  %s3732_s19 = smov 0  }
   0xe   :  { %s3734_s20 = smov 0   ;;  %s3736_s21 = smov 0  }
   0xf   :  { %s3738_s22 = smov 0  }
  0x10 LB: > { %4558 = sst [smem:[#allocation14_spill]] %s3648_s12  ;;  %s2553_s23 = sadd.s32 4294967295, %s3688_s22   ;;  %s3688_s22 = sphi %s3738_s22, %s24_s22   ;;  %s3684_s21 = sphi %s3736_s21, %s4610_s21   ;;  %s3680_s20 = sphi %s3734_s20, %s4609_s20   ;;  %s3676_s19 = sphi %s3732_s19, %s4608_s19   ;;  %s3672_s18 = sphi %s3730_s18, %s4607_s18   ;;  %s3668_s17 = sphi %s3728_s17, %s4606_s17   ;;  %s3664_s16 = sphi %s3726_s16, %s4605_s16   ;;  %s3660_s15 = sphi %s3724_s15, %s4604_s15   ;;  %s3656_s14 = sphi %s3722_s14, %s4603_s14   ;;  %s3652_s13 = sphi %s3720_s13, %s4602_s13   ;;  %s3648_s12 = sphi %s3718_s12, %s4600_s12  }
  0x11   : > { %4559 = sst [smem:[#allocation15_spill]] %s3652_s13  ;;  %s2554_s24 = sadd.s32 4294967294, %s3688_s22  }
  0x12   : > { %4560 = sst [smem:[#allocation16_spill]] %s3660_s15  ;;  %p58_p0 = scmp.ne.s32.totalorder %s3664_s16, %s3660_s15 }
  0x13   : > { %p3777_p1 = scmp.eq.s32.totalorder %s2553_s23, 0  ;;  %p3781_p2 = scmp.eq.s32.totalorder %s2553_s23, 3 }
  0x14   : > { %p111_p3 = scmp.eq.s32.totalorder %s2554_s24, 3  ;;  %p134_p6 = scmp.ne.s32.totalorder %s3656_s14, %s3652_s13 }
  0x15   : > { %s4561_s25 = scalar_select %p3777_p1, 1, 0 }
  0x16   : > { %s4562_s26 = scalar_select %p3781_p2, 1, 0 }
  0x17   : > { %p3787_p4 = por %p3777_p1, %p58_p0  ;;  %p3791_p5 = por %p111_p3, %p58_p0 }
  0x18   : > { %p140_p7 = scmp.ne.s32.totalorder %s3652_s13, %s3648_s12  ;;  %p2557_p8 = scmp.ge.s32.totalorder %s3688_s22, 1 }
  0x19   : > { %s4563_s27 = scalar_select %p3787_p4, 1, 0 }
  0x1a   : > { %s4564_s28 = scalar_select %p3791_p5, 1, 0 }
  0x1b   : > { %p3802_p9 = por %p134_p6, %p3781_p2  ;;  %p148_p10 = scmp.lt.s32.totalorder %s3688_s22, 5 }
  0x1c   : > { %4565 = sst [smem:[#allocation17_spill]] %s4564_s28  ;;  %p3807_p11 = por %p140_p7, %p111_p3 }
  0x1d   : > { %s4566_s29 = scalar_select %p3802_p9, 1, 0 }
  0x1e   : > { %s4568_s30 = scalar_select %p3807_p11, 1, 0 }
  0x1f   : > { %4567 = sst [smem:[#allocation18_spill]] %s4566_s29  ;;  %p3811_p12 = pnand %p2557_p8, %p148_p10 }
  0x20   : > { %4569 = sst [smem:[#allocation19_spill]] %s4568_s30  ;;  %s3690_s5 = smov [#allocation5]  }
  0x21   : > { %s4570_s4 = scalar_select %p3811_p12, 1, 0 }
  0x22   : > { %s160_s6 = sshll.u32 %s3690_s5, 4  ;;  %p3278_p13 = pneg %p3811_p12  ;;  %s161_s6 = int_to_ptr.vmem [resolvable:$true] %s160_s6 }
  0x23   : > { %s4572_s1 = sld [smem:[#allocation21_spill]] }
  0x24   : > { %p3819_p0 = pnand %p3278_p13, %p3777_p1 }
  0x26   : > { %p3474_p6 = pneg %p3819_p0 }
  0x29   : > { %s3472_s10 = scalar_lea.hbm %s4572_s1, 9216 }
  0x2a   : > { %p3473_p3 = scmp.ne.s32.totalorder %s4572_s1, %s3472_s10  ;;  %p3479_p10 = scmp.lt.u32.totalorder %s3472_s10, %s4572_s1 }
  0x2c   : > { %p3475_p7 = pnand %p3474_p6, %p3473_p3 }
  0x2e   : > { %p3476_p8 = pneg %p3475_p7 }
  0x30   : > { %p3481_p13 = pnand %p3479_p10, %p3476_p8 }
  0x32   : > { %3484 = shalt.err (!%p3481_p13)
}
  0x33   : > { %s3485_s30 = scalar_lea.vmem %s161_s6, 9216  ;;  %p3493_p1 = scmp.lt.s32.totalorder %s161_s6, %s161_s6 }
  0x34   : > { %p3486_p11 = scmp.ne.s32.totalorder %s161_s6, %s3485_s30  ;;  %p3494_p4 = scmp.lt.s32.totalorder %s3485_s30, %s3485_s30 }
  0x36   : > { %p3488_p5 = pnand %p3486_p11, %p3474_p6  ;;  %p3495_p12 = por %p3494_p4, %p3493_p1 }
  0x38   : > { %p3489_p9 = pneg %p3488_p5 }
  0x3a   : > { %p3496_p2 = pnand %p3495_p12, %p3489_p9 }
  0x3c   : > { %3499 = shalt.err (!%p3496_p2)
}
  0x3d   : > { %s4543_s8 = smov 64   ;;  %s4544_s9 = smov 4  }
  0x3e   : > { %3281 = dma.hbm_to_vmem [thread:$0]  (!%p3819_p0), %s4572_s1, 9216, %s161_s6, [#allocation6], %s4543_s8, %s4543_s8, %s4544_s9  }
  0x3f   : > { %s124_s11 = sadd.s32 1, %s3656_s14  ;;  %s33_s23 = sadd.s32 1, %s3680_s20 }
  0x40   : > { %p34_p1 = scmp.ge.s32.totalorder %s33_s23, 2  ;;  %s36_s24 = sadd.s32 1, %s3684_s21 }
  0x41   : > { %p52_p2 = scmp.ne.s32.totalorder %s3668_s17, %s3664_s16  ;;  %p53_p4 = scmp.eq.s32.totalorder %s3688_s22, 0 }
  0x42   : > { %s4612_s23 = smov (%p34_p1, %s33_s23), 0  ;;  %s4614_s24 = smov (!%p34_p1, %s36_s24), %s3684_s21 }
  0x43   : > { %s41_s7 = ssub.s32 %s3680_s20, %s4612_s23  ;;  %s45_s5 = sadd.s32 1, %s3668_s17 }
  0x44   : > { %p38_p5 = scmp.ge.s32.totalorder %s4614_s24, 2  ;;  %p4573_p9 = scmp.ne.s32.totalorder %s4562_s26, 0 }
  0x45   : > { %p3860_p12 = por %p53_p4, %p52_p2  ;;  %s2555_s10 = sshll.u32 %s3684_s21, 1 }
  0x46   : > { %p3856_p11 = por %p4573_p9, %p52_p2  ;;  %s4616_s24 = smov (%p38_p5, %s4614_s24), 0 }
  0x47   : > { %4576 = sst [smem:[#allocation20_spill]] %s4616_s24  ;;  %s118_s8 = sadd.s32 %s3680_s20, %s2555_s10 }
  0x48   : > { %p3294_p0 = scmp.lt.s32.totalorder %s3688_s22, 4  ;;  %s40_s26 = ssub.s32 %s3684_s21, %s4616_s24 }
  0x49   : > { %s2556_s9 = sshll.u32 %s4616_s24, 1  ;;  %s42_s1 = sor.u32 %s41_s7, %s40_s26 }
  0x4a   : > { %s120_s12 = sadd.s32 %s2556_s9, %s4612_s23  ;;  %p43_p3 = scmp.eq.s32.totalorder %s42_s1, 0 }
  0x4b   : > { %s121_s28 = ssub.s32 %s118_s8, %s120_s12  ;;  %s174_s15 = sand.u32 1, %s3668_s17  }
  0x4c   : > { %p122_p6 = scmp.eq.s32.totalorder %s121_s28, 0  ;;  %s3264_s13 = smul.u32 120, %s174_s15 }
  0x4d   : > { %s3875_s3 = scalar_select %p43_p3, %s3668_s17, %s45_s5  }
  0x4e   : > { %s3878_s29 = scalar_select %p122_p6, %s3656_s14, %s124_s11  }
  0x4f   : > { %p3882_p7 = pnand %p3294_p0, %p3860_p12  ;;  %s3265_s10 = smul.u32 30, %s3680_s20 }
  0x50   : > { %s3266_s24 = smul.u32 60, %s3684_s21  ;;  %s178_s7 = scalar_lea.vmem [#allocation2], %s3264_s13 }
  0x51   : > { %s187_s9 = sshll.u32 %s178_s7, 4  ;;  %s3895_s5 = scalar_lea.sflag [#allocation3], %s174_s15  ;;  %s3888_s9 = int_to_ptr.vmem [resolvable:$true] %s187_s9 }
  0x52   : > { %s184_s1 = sadd.s32 %s3266_s24, %s3265_s10  ;;  %p3502_p10 = pneg %p3882_p7 }
  0x53   : > { %s2560_s12 = sshll.u32 %s184_s1, 6  ;;  %s3505_s26 = scalar_lea.hbm %s4532_s0, 7680 }
  0x54   : > { %s3893_s11 = scalar_lea.hbm %s4532_s0, %s2560_s12 }
  0x55   : > { %s3500_s30 = scalar_lea.hbm %s3893_s11, 1920  ;;  %p3506_p2 = scmp.lt.u32.totalorder %s3893_s11, %s4532_s0 }
  0x56   : > { %p3501_p8 = scmp.ne.s32.totalorder %s3893_s11, %s3500_s30  ;;  %p3507_p4 = scmp.lt.u32.totalorder %s3505_s26, %s3500_s30 }
  0x57   : > { %p3509_p9 = scmp.lt.u32.totalorder %s3500_s30, %s3893_s11 }
  0x58   : > { %p3503_p13 = pnand %p3502_p10, %p3501_p8  ;;  %p3508_p5 = por %p3507_p4, %p3506_p2 }
  0x5a   : > { %p3504_p1 = pneg %p3503_p13  ;;  %p3510_p12 = por %p3509_p9, %p3508_p5 }
  0x5c   : > { %p3511_p0 = pnand %p3510_p12, %p3504_p1 }
  0x5e   : > { %3514 = shalt.err (!%p3511_p0)
}
  0x5f   : > { %s3515_s15 = scalar_lea.vmem %s3888_s9, 1920  ;;  %s3693_s1 = smov [#allocation2]  }
  0x60   : > { %p3516_p3 = scmp.ne.s32.totalorder %s3888_s9, %s3515_s15  ;;  %s3520_s12 = sshll.u32 %s3693_s1, 4  ;;  %s3521_s12 = int_to_ptr.vmem [resolvable:$false] %s3520_s12 }
  0x61   : > { %s3522_s28 = scalar_lea.vmem %s3521_s12, 3840  ;;  %p3523_p13 = scmp.lt.s32.totalorder %s3888_s9, %s3521_s12 }
  0x62   : > { %p3518_p6 = pnand %p3516_p3, %p3502_p10  ;;  %p3524_p2 = scmp.lt.s32.totalorder %s3522_s28, %s3515_s15 }
  0x64   : > { %p3519_p8 = pneg %p3518_p6  ;;  %p3525_p4 = por %p3524_p2, %p3523_p13 }
  0x66   : > { %p3526_p5 = pnand %p3525_p4, %p3519_p8 }
  0x68   : > { %3529 = shalt.err (!%p3526_p5)
}
  0x69   : > { %s4578_s8 = smov 4   ;;  %s4579_s30 = smov 64  }
  0x6a   : > { %3285 = dma.hbm_to_vmem [thread:$0]  (!%p3882_p7), %s3893_s11, 1920, %s3888_s9, %s3895_s5, %s4579_s30, %s4579_s30, %s4578_s8  }
  0x6b   : > { %p4580_p10 = scmp.ne.s32.totalorder %s4570_s4, 0 }
  0x6c   : > { %s3929_s13 = sand.u32 (!%p4580_p10), 1, %s3664_s16   ;;  %p4581_p1 = scmp.ne.s32.totalorder (!%p4580_p10), %s4563_s27, 0 }
  0x6d   : > { %199 = sbr.rel (%p4580_p10) target bundleno = 570 (0x23a), region = 28  ;;  %s202_s26 = scalar_lea.sflag (!%p4580_p10), [#allocation3], %s3929_s13 }
  0x6e   : > { %s3267_s24 = smul.u32 (!%p4580_p10), 120, %s3929_s13 }
  0x70   : > { %s3933_s10 = scalar_lea.vmem (!%p4580_p10), [#allocation2], %s3267_s24 }
  0x74   : > { %3631 = dma.done.wait (%p4581_p1), %s202_s26, 1920  }
  0x75   : > { %3633 = vsyncadd (%p4581_p1), %s202_s26, 4294965376  ;;  %p4582_p7 = scmp.ne.s32.totalorder %s4561_s25, 0 }
  0x77   : > { %3635 = dma.done.wait (%p4582_p7), [#allocation6], 9216  }
  0x78   : > { %3637 = vsyncadd (%p4582_p7), [#allocation6], 4294958080  ;;  %v3390_v0 = vld [vmem:[#allocation5 + $0xc0] sm:$0xff]   ;;  %v3392_v2 = vld [vmem:[#allocation5 + $0xc8] sm:$0xff]   ;;  %vm832_vm0 = vsmask.f32 3328 }
  0x79   : > { %v3391_v1 = vld [vmem:[#allocation5 + $0x100] sm:$0xff]   ;;  %2832 = vmatprep.subr.bf16.mxu1 %v3390_v0  ;;  %v3393_v3 = vld [vmem:[#allocation5 + $0x108] sm:$0xff]   ;;  %v3394_v4 = vld [vmem:[#allocation5 + $0xd0] sm:$0xff]   ;;  %vm833_vm1 = vsmask.f32 7440  ;;  %vm1657_vm2 = vcmask 1042432  }
  0x7a   : > { %2960 = vmatprep.subr.bf16.mxu0 %v3391_v1  ;;  %2833 = vmatpush3.bf16.msra.mxu1 %v3390_v0  ;;  %v3395_v5 = vld [vmem:[#allocation5 + $0x110] sm:$0xff]   ;;  %v3396_v6 = vld [vmem:[#allocation5 + $0xd8] sm:$0xff]   ;;  %v3398_v8 = vld [vmem:[#allocation5 + $0xe0] sm:$0xff]   ;;  %vm1658_vm3 = vcmask 1046532   ;;  %s2563_s2 = sshll.u32 %s3929_s13, 7  ;;  %s2687_s27 = sshll.u32 %s3672_s18, 4 }
  0x7b   : > { %2961 = vmatpush3.bf16.msra.mxu0 %v3391_v1  ;;  %2834 = vmatprep.subr.bf16.mxu1 %v3392_v2  ;;  %v3397_v7 = vld [vmem:[#allocation5 + $0x118] sm:$0xff]   ;;  %v3399_v9 = vld [vmem:[#allocation5 + $0x120] sm:$0xff]   ;;  %v3400_v10 = vld [vmem:[#allocation5 + $0xe8] sm:$0xff]   ;;  %s4361_s25 = scalar_lea.vmem [#allocation7], %s2563_s2  ;;  %s2681_s4 = sshll.u32 %s3676_s19, 5 }
  0x7c   : > { %2962 = vmatprep.subr.bf16.mxu0 %v3393_v3  ;;  %v244_v11 = vld [vmem:[%s3933_s10 + $0xc] sm:$0xf]  ;;  %v245_v12 = vld [vmem:[%s3933_s10 + $0x10] sm:$0xf]  ;;  %v246_v13 = vld [vmem:[%s3933_s10 + $0x14] sm:$0x1]  ;;  %s2401_s9 = sadd.s32 %s2687_s27, %s2681_s4 }
  0x7d   : > { %v3401_v14 = vld [vmem:[#allocation5 + $0x128] sm:$0xff]   ;;  %v3946_v15 = vcombine.low %v244_v11, %v245_v12  ;;  %v860_v16 = vshrl.u32 %v244_v11, 16  ;;  %v863_v17 = vshll.u32 %v244_v11, 16  ;;  %v873_v18 = vshrl.u32 %v245_v12, 16  ;;  %v3402_v25 = vld [vmem:[#allocation5 + $0xf0] sm:$0xff]   ;;  %vm3957_vm4 = vmor %vm1657_vm2, %vm1658_vm3  ;;  %s2404_s11 = sshll.u32 %s4361_s25, 4  ;;  %s4402_s11 = int_to_ptr.vmem [resolvable:$true] %s2404_s11 }
  0x7e   : > { %2835 = vmatpush3.bf16.msra.mxu1 %v3392_v2  ;;  %v3949_v19 = vld [vmem:[%s3933_s10 + $0x18] sm:$0xf]  ;;  %v2634_v20 = vrot.slane %v244_v11, 9  ;;  %v1669_v21 = vrot.slane %v245_v12, 5  ;;  %v869_v22 = vshll.u32 %v245_v12, 16  ;;  %v879_v23 = vshll.u32 %v246_v13, 16  ;;  %vm3969_vm5 = vmor %vm832_vm0, %vm833_vm1 }
  0x7f   : > { %2963 = vmatpush3.bf16.msra.mxu0 %v3393_v3  ;;  %2836 = vmatprep.subr.bf16.mxu1 %v3394_v4  ;;  %v3952_v24 = vld [vmem:[%s3933_s10 + $0x1c] sm:$0xf]  ;;  %v862_v26 = vrot.slane %v860_v16, 4  ;;  %v865_v27 = vrot.slane %v863_v17, 5  ;;  %v875_v28 = vrot.slane %v873_v18, 4  ;;  %v1672_v33 = vrot.slane %v246_v13, 5 }
  0x80   : > { %2964 = vmatprep.subr.bf16.mxu0 %v3395_v5  ;;  %2848 = vmatprep.mubr.bf16.mxu1 %v3946_v15  ;;  %v1671_v30 = vrot.slane %v1669_v21, 4  ;;  %v871_v31 = vrot.slane %v869_v22, 5  ;;  %v881_v32 = vrot.slane %v879_v23, 5  ;;  %v3403_v34 = vld [vmem:[#allocation5 + $0x130] sm:$0xff]   ;;  %v884_v36 = vshrl.u32 %v3949_v19, 16  ;;  %v3404_v40 = vld [vmem:[#allocation5 + $0xf8] sm:$0xff]  }
  0x81   : > { %v866_v35 = vor.u32 %v865_v27, %v862_v26  ;;  %v887_v37 = vshll.u32 %v3949_v19, 16  ;;  %v897_v38 = vshrl.u32 %v3952_v24, 16  ;;  %v3965_v39 = vld [vmem:[%s3933_s10 + $0x20] sm:$0x1]  ;;  %v893_v43 = vshll.u32 %v3952_v24, 16  ;;  %v3405_v50 = vld [vmem:[#allocation5 + $0x138] sm:$0xff]  }
  0x82   : > { %2837 = vmatpush3.bf16.msra.mxu1 %v3394_v4  ;;  %v876_v42 = vor.u32 %v875_v28, %v871_v31  ;;  %v903_v44 = vshll.u32 %v3965_v39, 16  ;;  %v1670_v45 = vsel %vm3957_vm4, %v2634_v20, %v1669_v21  ;;  %v886_v47 = vrot.slane %v884_v36, 4  ;;  %v3982_v57 = vld [vmem:[%s3933_s10 + $0x24] sm:$0xf]  ;;  %v3408_v60 = vld [vmem:[#allocation5] sm:$0xff]   ;;  %v3463_v41 = vld [vmem:[#allocation5 + $0x178] sm:$0xff]  }
  0x83   : > { %2965 = vmatpush3.bf16.msra.mxu0 %v3395_v5  ;;  %2838 = vmatprep.subr.bf16.mxu1 %v3396_v6  ;;  %v867_v46 = vrot.slane %v866_v35, 4  ;;  %v889_v48 = vrot.slane %v887_v37, 5  ;;  %v899_v49 = vrot.slane %v897_v38, 4  ;;  %v895_v52 = vrot.slane %v893_v43, 5  ;;  %v3989_v62 = vld [vmem:[%s3933_s10 + $0x28] sm:$0xf] }
  0x84   : > { %2966 = vmatprep.subr.bf16.mxu0 %v3397_v7  ;;  %v877_v51 = vrot.slane %v876_v42, 4  ;;  %v905_v53 = vrot.slane %v903_v44, 5  ;;  %v1673_v54 = vsel %vm3957_vm4, %v1671_v30, %v1672_v33  ;;  %v908_v63 = vshrl.u32 %v3982_v57, 16  ;;  %v3994_v1 = vld [vmem:[%s3933_s10 + $0x2c] sm:$0x1]  ;;  %v3409_v13 = vld [vmem:[#allocation5 + $0x1c0] sm:$0xff]  }
  0x85   : > { %v872_v55 = vsel %vm3969_vm5, %v867_v46, %v871_v31  ;;  %v890_v56 = vor.u32 %v889_v48, %v886_v47  ;;  %v3984_v58 = vcombine.low %v1670_v45, %v1673_v54  ;;  %v900_v61 = vor.u32 %v899_v49, %v895_v52  ;;  %v4000_v5 = vld [vmem:[%s3933_s10 + $0x30] sm:$0xf]  ;;  %v4018_v22 = vld [vmem:[%s3933_s10 + $0x38] sm:$0x1]  ;;  %v3414_v45 = vld [vmem:[#allocation5 + $0x10] sm:$0xff]   ;;  %s2682_s5 = sshll.u32 %s2401_s9, 7 }
  0x86   : > { %2839 = vmatpush3.bf16.msra.mxu1 %v3396_v6  ;;  %v882_v59 = vsel %vm3969_vm5, %v877_v51, %v881_v32  ;;  %v911_v0 = vshll.u32 %v3982_v57, 16  ;;  %v921_v4 = vshrl.u32 %v3989_v62, 16  ;;  %v4003_v6 = vld [vmem:[%s3933_s10 + $0x34] sm:$0xf]  ;;  %v4009_v11 = vcombine.low %v3949_v19, %v3952_v24  ;;  %v3410_v28 = vld [vmem:[#allocation5 + $0x8] sm:$0xff]   ;;  %s4589_s1 = sld [smem:[#allocation22_spill]] }
  0x87   : > { %2967 = vmatpush3.bf16.msra.mxu0 %v3397_v7  ;;  %2840 = vmatprep.subr.bf16.mxu1 %v3398_v8  ;;  %v3996_v2 = vcombine.low %v872_v55, %v882_v59  ;;  %v891_v3 = vrot.slane %v890_v56, 4  ;;  %v901_v7 = vrot.slane %v900_v61, 4  ;;  %v927_v16 = vshll.u32 %v3994_v1, 16  ;;  %v4039_v47 = vld [vmem:[%s3933_s10 + $0x3c] sm:$0xf]  ;;  %v3415_v59 = vld [vmem:[#allocation5 + $0x1d0] sm:$0xff]  }
  0x88   : > { %2968 = vmatprep.subr.bf16.mxu0 %v3399_v9  ;;  %v932_v21 = vshrl.u32 %v4000_v5, 16  ;;  %v935_v26 = vshll.u32 %v4000_v5, 16  ;;  %v945_v27 = vshrl.u32 %v4003_v6, 16  ;;  %v941_v33 = vshll.u32 %v4003_v6, 16  ;;  %v4042_v48 = vld [vmem:[%s3933_s10 + $0x40] sm:$0xf] }
  0x89   : > { %2976 = vmatprep.mubr.bf16.mxu0 %v3996_v2  ;;  %v896_v12 = vsel %vm3969_vm5, %v891_v3, %v895_v52  ;;  %v906_v17 = vsel %vm3969_vm5, %v901_v7, %v905_v53  ;;  %v4027_v35 = vcombine.low %v3982_v57, %v3989_v62  ;;  %v951_v38 = vshll.u32 %v4018_v22, 16  ;;  %v4048_v53 = vld [vmem:[%s3933_s10 + $0x44] sm:$0x1]  ;;  %v4051_v54 = vld [vmem:[%s3933_s10 + $0x48] sm:$0xf]  ;;  %s2383_s28 = scalar_lea.sflag [#allocation4], %s3929_s13 }
  0x8a   : > { %2841 = vmatpush3.bf16.msra.mxu1 %v3398_v8  ;;  %v910_v8 = vrot.slane %v908_v63, 4  ;;  %v4020_v23 = vcombine.low %v896_v12, %v906_v17  ;;  %v934_v32 = vrot.slane %v932_v21, 4  ;;  %v937_v36 = vrot.slane %v935_v26, 5  ;;  %v4059_v63 = vld [vmem:[%s3933_s10 + $0x4c] sm:$0xf]  ;;  %s3530_s8 = scalar_lea.vmem %s4402_s11, 2048 }
  0x8b   : > { %2969 = vmatpush3.bf16.msra.mxu0 %v3399_v9  ;;  %2842 = vmatprep.subr.bf16.mxu1 %v3400_v10  ;;  %v913_v9 = vrot.slane %v911_v0, 5  ;;  %v947_v37 = vrot.slane %v945_v27, 4  ;;  %v943_v43 = vrot.slane %v941_v33, 5  ;;  %v4036_v44 = vcombine.low %v4000_v5, %v4003_v6  ;;  %v3416_v3 = vld [vmem:[#allocation5 + $0x18] sm:$0xff]   ;;  %p3531_p9 = scmp.ne.s32.totalorder %s4402_s11, %s3530_s8  ;;  %s3694_s30 = smov [#allocation7]  }
  0x8c   : > { %2970 = vmatprep.subr.bf16.mxu0 %v3401_v14  ;;  %v938_v46 = vor.u32 %v937_v36, %v934_v32  ;;  %v953_v51 = vrot.slane %v951_v38, 5  ;;  %v956_v52 = vshrl.u32 %v4039_v47, 16  ;;  %v969_v61 = vshrl.u32 %v4042_v48, 16  ;;  %v3417_v17 = vld [vmem:[#allocation5 + $0x1d8] sm:$0xff]   ;;  %v3420_v36 = vld [vmem:[#allocation5 + $0x20] sm:$0xff]   ;;  %s4409_s12 = scalar_lea.hbm %s4589_s1, %s2682_s5  ;;  %s3534_s24 = sshll.u32 %s3694_s30, 4  ;;  %s3535_s24 = int_to_ptr.vmem [resolvable:$false] %s3534_s24 }
  0x8d   : > { %v914_v18 = vor.u32 %v913_v9, %v910_v8  ;;  %v965_v7 = vshll.u32 %v4042_v48, 16  ;;  %v975_v8 = vshll.u32 %v4048_v53, 16  ;;  %v980_v21 = vshrl.u32 %v4051_v54, 16  ;;  %p3532_p12 = pnand %p3531_p9, %p3856_p11  ;;  %s3536_s26 = scalar_lea.vmem %s3535_s24, 4096 }
  0x8e   : > { %2843 = vmatpush3.bf16.msra.mxu1 %v3400_v10  ;;  %v917_v10 = vshll.u32 %v3989_v62, 16  ;;  %v939_v56 = vrot.slane %v938_v46, 4  ;;  %v983_v27 = vshll.u32 %v4051_v54, 16  ;;  %v989_v32 = vshll.u32 %v4059_v63, 16  ;;  %v3421_v46 = vld [vmem:[#allocation5 + $0x1e0] sm:$0xff]   ;;  %p3537_p3 = scmp.lt.s32.totalorder %s4402_s11, %s3535_s24  ;;  %p3538_p6 = scmp.lt.s32.totalorder %s3536_s26, %s3530_s8 }
  0x8f   : > { %2971 = vmatpush3.bf16.msra.mxu0 %v3401_v14  ;;  %2844 = vmatprep.subr.bf16.mxu1 %v3402_v25  ;;  %v923_v14 = vrot.slane %v921_v4, 4  ;;  %v915_v30 = vrot.slane %v914_v18, 4  ;;  %v958_v4 = vrot.slane %v956_v52, 4  ;;  %v967_v18 = vrot.slane %v965_v7, 5  ;;  %v4095_v52 = vld [vmem:[%s3933_s10 + $0x58] sm:$0xf]  ;;  %p3533_p0 = pneg %p3532_p12 }
  0x90   : > { %2972 = vmatprep.subr.bf16.mxu0 %v3403_v34  ;;  %v919_v20 = vrot.slane %v917_v10, 5  ;;  %v944_v9 = vsel %vm3969_vm5, %v939_v56, %v943_v43  ;;  %v4068_v10 = vcombine.low %v4039_v47, %v4042_v48  ;;  %v4098_v56 = vld [vmem:[%s3933_s10 + $0x5c] sm:$0x1]  ;;  %v4108_v7 = vld [vmem:[%s3933_s10 + $0x60] sm:$0xf]  ;;  %p3539_p8 = por %p3538_p6, %p3537_p3 }
  0x92   : > { %2845 = vmatpush3.bf16.msra.mxu1 %v3402_v25  ;;  %v929_v25 = vrot.slane %v927_v16, 5  ;;  %v924_v31 = vor.u32 %v923_v14, %v919_v20  ;;  %v4071_v14 = vld [vmem:[%s3933_s10 + $0x50] sm:$0x1]  ;;  %p3540_p13 = pnand %p3539_p8, %p3533_p0 }
  0x93   : > { %2973 = vmatpush3.bf16.msra.mxu0 %v3403_v34  ;;  %2846 = vmatprep.subr.bf16.mxu1 %v3404_v40  ;;  %v3411_v34 = vld [vmem:[#allocation5 + $0x1c8] sm:$0xff]   ;;  %v999_v33 = vshll.u32 %v4071_v14, 16 }
  0x94   : > { %2974 = vmatprep.subr.bf16.mxu0 %v3405_v50  ;;  %v925_v42 = vrot.slane %v924_v31, 4  ;;  %v982_v31 = vrot.slane %v980_v21, 4 }
  0x96   : > { %2847 = vmatpush3.bf16.msra.mxu1 %v3404_v40  ;;  %v920_v40 = vsel %vm3969_vm5, %v915_v30, %v919_v20  ;;  %v930_v49 = vsel %vm3969_vm5, %v925_v42, %v929_v25  ;;  %v977_v20 = vrot.slane %v975_v8, 5  ;;  %v991_v42 = vrot.slane %v989_v32, 5  ;;  %v4111_v8 = vld [vmem:[%s3933_s10 + $0x64] sm:$0xf] }
  0x97   : > { %2975 = vmatpush3.bf16.msra.mxu0 %v3405_v50  ;;  %2864 = vmatprep.subr.bf16.mxu1 %v3408_v60  ;;  %v948_v50 = vor.u32 %v947_v37, %v943_v43  ;;  %v4054_v55 = vcombine.low %v920_v40, %v930_v49  ;;  %v985_v37 = vrot.slane %v983_v27, 5  ;;  %v1001_v43 = vrot.slane %v999_v33, 5 }
  0x98   : > { %2992 = vmatprep.subr.bf16.mxu0 %v3409_v13  ;;  %v4089_v49 = vcombine.low %v4051_v54, %v4059_v63  ;;  %v1023_v27 = vshll.u32 %v4098_v56, 16 }
  0x99   : > { %2849 = vmatmul.mubr.bf16.vlgmr.msra.gmra.mrb[0].mxu1 %v4009_v11  ;;  %v949_v0 = vrot.slane %v948_v50, 4  ;;  %v986_v50 = vor.u32 %v985_v37, %v982_v31  ;;  %v4123_v31 = vld [vmem:[%s3933_s10 + $0x68] sm:$0x1] }
  0x9a   : > { %2977 = vmatmul.mubr.bf16.vlgmr.msra.gmra.mrb[0].mxu0 %v4020_v23  ;;  %2865 = vmatpush3.bf16.msra.mxu1 %v3408_v60  ;;  %v959_v60 = vshll.u32 %v4039_v47, 16  ;;  %v1025_v33 = vrot.slane %v1023_v27, 5 }
  0x9b   : > { %2993 = vmatpush3.bf16.msra.mxu0 %v3409_v13  ;;  %2866 = vmatprep.subr.bf16.mxu1 %v3410_v28  ;;  %v971_v13 = vrot.slane %v969_v61, 4  ;;  %v954_v16 = vsel %vm3969_vm5, %v949_v0, %v953_v51  ;;  %v4092_v51 = vld [vmem:[%s3933_s10 + $0x54] sm:$0xf]  ;;  %v3422_v61 = vld [vmem:[#allocation5 + $0x28] sm:$0xff]  }
  0x9c   : > { %2994 = vmatprep.subr.bf16.mxu0 %v3411_v34  ;;  %2852 = vmatprep.mubr.bf16.mxu1 %v4027_v35  ;;  %v961_v12 = vrot.slane %v959_v60, 5  ;;  %v4076_v25 = vcombine.low %v944_v9, %v954_v16  ;;  %v4104_v0 = vcombine.low %v4092_v51, %v4095_v52  ;;  %v1007_v16 = vshll.u32 %v4092_v51, 16 }
  0x9d   : > { %2980 = vmatprep.mubr.bf16.mxu0 %v4054_v55  ;;  %v972_v30 = vor.u32 %v971_v13, %v967_v18  ;;  %v3423_v13 = vld [vmem:[#allocation5 + $0x1e8] sm:$0xff]  }
  0x9e   : > { %2867 = vmatpush3.bf16.msra.mxu1 %v3410_v28  ;;  %v962_v26 = vor.u32 %v961_v12, %v958_v4  ;;  %v993_v28 = vshrl.u32 %v4059_v63, 16  ;;  %v1004_v4 = vshrl.u32 %v4092_v51, 16  ;;  %v987_v12 = vrot.slane %v986_v50, 4  ;;  %v3426_v50 = vld [vmem:[#allocation5 + $0x30] sm:$0xff]  }
  0x9f   : > { %2995 = vmatpush3.bf16.msra.mxu0 %v3411_v34  ;;  %2868 = vmatprep.subr.bf16.mxu1 %v3414_v45  ;;  %v973_v40 = vrot.slane %v972_v30, 4 }
  0xa0   : > { %2996 = vmatprep.subr.bf16.mxu0 %v3415_v59  ;;  %v963_v34 = vrot.slane %v962_v26, 4  ;;  %v995_v38 = vrot.slane %v993_v28, 4  ;;  %v1006_v21 = vrot.slane %v1004_v4, 4  ;;  %v1013_v26 = vshll.u32 %v4095_v52, 16 }
  0xa1   : > { %2853 = vmatmul.mubr.bf16.gmra.mrb[4].mxu1 %v4036_v44  ;;  %v1009_v28 = vrot.slane %v1007_v16, 5  ;;  %v3427_v16 = vld [vmem:[#allocation5 + $0x1f0] sm:$0xff]  }
  0xa2   : > { %2981 = vmatmul.mubr.bf16.gmra.mrb[4].mxu0 %v4076_v25  ;;  %2869 = vmatpush3.bf16.msra.mxu1 %v3414_v45  ;;  %v968_v45 = vsel %vm3969_vm5, %v963_v34, %v967_v18  ;;  %v996_v60 = vor.u32 %v995_v38, %v991_v42  ;;  %v1017_v18 = vshrl.u32 %v4095_v52, 16  ;;  %v1015_v32 = vrot.slane %v1013_v26, 5 }
  0xa3   : > { %2997 = vmatpush3.bf16.msra.mxu0 %v3415_v59  ;;  %2870 = vmatprep.subr.bf16.mxu1 %v3416_v3  ;;  %v978_v59 = vsel %vm3969_vm5, %v973_v40, %v977_v20  ;;  %v1238_v34 = vshrl.u32 %v4108_v7, 16  ;;  %v1010_v38 = vor.u32 %v1009_v28, %v1006_v21  ;;  %v1241_v40 = vshll.u32 %v4108_v7, 16  ;;  %v4142_v21 = vld [vmem:[%s3933_s10] sm:$0xf] }
  0xa4   : > { %2998 = vmatprep.subr.bf16.mxu0 %v3417_v17  ;;  %2856 = vmatprep.mubr.bf16.mxu1 %v4068_v10  ;;  %v4113_v9 = vcombine.low %v968_v45, %v978_v59  ;;  %v997_v20 = vrot.slane %v996_v60, 4  ;;  %v1019_v30 = vrot.slane %v1017_v18, 4  ;;  %v1247_v59 = vshll.u32 %v4111_v8, 16 }
  0xa5   : > { %v1257_v60 = vshll.u32 %v4123_v31, 16  ;;  %v1243_v4 = vrot.slane %v1241_v40, 5 }
  0xa6   : > { %2871 = vmatpush3.bf16.msra.mxu1 %v3416_v3  ;;  %2984 = vmatprep.mubr.bf16.mxu0 %v4113_v9  ;;  %v992_v3 = vsel %vm3969_vm5, %v987_v12, %v991_v42  ;;  %v1251_v42 = vshrl.u32 %v4111_v8, 16  ;;  %v1020_v45 = vor.u32 %v1019_v30, %v1015_v32 }
  0xa7   : > { %2999 = vmatpush3.bf16.msra.mxu0 %v3417_v17  ;;  %2872 = vmatprep.subr.bf16.mxu1 %v3420_v36  ;;  %v1002_v17 = vsel %vm3969_vm5, %v997_v20, %v1001_v43  ;;  %v1240_v43 = vrot.slane %v1238_v34, 4  ;;  %v1249_v20 = vrot.slane %v1247_v59, 5  ;;  %v3428_v34 = vld [vmem:[#allocation5 + $0x38] sm:$0xff]  }
  0xa8   : > { %3000 = vmatprep.subr.bf16.mxu0 %v3421_v46  ;;  %v4129_v37 = vcombine.low %v992_v3, %v1002_v17  ;;  %v1253_v12 = vrot.slane %v1251_v42, 4  ;;  %v1021_v18 = vrot.slane %v1020_v45, 4  ;;  %v4147_v3 = vld [vmem:[%s3933_s10 + $0x4] sm:$0xf]  ;;  %v1259_v17 = vrot.slane %v1257_v60, 5  ;;  %v3429_v42 = vld [vmem:[#allocation5 + $0x1f8] sm:$0xff]  }
  0xa9   : > { %2857 = vmatmul.mubr.bf16.gmra.mrb[8].mxu1 %v4089_v49  ;;  %v1244_v27 = vor.u32 %v1243_v4, %v1240_v43  ;;  %v3432_v45 = vld [vmem:[#allocation5 + $0x80] sm:$0xff]   ;;  %v4167_v60 = vld [vmem:[%s3933_s10 + $0x6c] sm:$0xf] }
  0xaa   : > { %2873 = vmatpush3.bf16.msra.mxu1 %v3420_v36  ;;  %2860 = vmatprep.mubr.bf16.mxu1 %v4104_v0  ;;  %v1011_v36 = vrot.slane %v1010_v38, 4  ;;  %v1026_v28 = vsel %vm3969_vm5, %v1021_v18, %v1025_v33  ;;  %v1254_v30 = vor.u32 %v1253_v12, %v1249_v20  ;;  %v3431_v33 = vld [vmem:[#allocation5 + $0x180] sm:$0xff]   ;;  %v3435_v4 = vld [vmem:[#allocation5 + $0x190] sm:$0xff]   ;;  %v1444_v18 = vshrl.u32 %v4167_v60, 16 }
  0xab   : > { %3001 = vmatpush3.bf16.msra.mxu0 %v3421_v46  ;;  %2874 = vmatprep.subr.bf16.mxu1 %v3422_v61  ;;  %v4139_v46 = vcombine.low %v4108_v7, %v4111_v8  ;;  %v1245_v40 = vrot.slane %v1244_v27, 4  ;;  %v4171_v12 = vld [vmem:[%s3933_s10 + $0x70] sm:$0xf] }
  0xac   : > { %2985 = vmatmul.mubr.bf16.gmra.mrb[8].mxu0 %v4129_v37  ;;  %3002 = vmatprep.subr.bf16.mxu0 %v3423_v13  ;;  %v1016_v26 = vsel %vm3969_vm5, %v1011_v36, %v1015_v32  ;;  %v1255_v32 = vrot.slane %v1254_v30, 4  ;;  %v3434_v36 = vld [vmem:[#allocation5 + $0x88] sm:$0xff]   ;;  %v3437_v27 = vld [vmem:[#allocation5 + $0x198] sm:$0xff]   ;;  %v1453_v30 = vshll.u32 %v4171_v12, 16 }
  0xad   : > { %v4151_v38 = vcombine.low %v1016_v26, %v1026_v28  ;;  %v4177_v26 = vld [vmem:[%s3933_s10 + $0x74] sm:$0x1]  ;;  %v1676_v28 = vrot.slane %v3952_v24, 5 }
  0xae   : > { %2875 = vmatpush3.bf16.msra.mxu1 %v3422_v61  ;;  %v2581_v61 = vcombine.low %v4142_v21, %v4147_v3  ;;  %v1260_v43 = vsel %vm3969_vm5, %v1255_v32, %v1259_v17  ;;  %v3436_v17 = vld [vmem:[#allocation5 + $0x90] sm:$0xff]   ;;  %v1463_v24 = vshll.u32 %v4177_v26, 16 }
  0xaf   : > { %3003 = vmatpush3.bf16.msra.mxu0 %v3423_v13  ;;  %2876 = vmatprep.subr.bf16.mxu1 %v3426_v50  ;;  %v1250_v13 = vsel %vm3969_vm5, %v1245_v40, %v1249_v20  ;;  %v1447_v20 = vshll.u32 %v4167_v60, 16 }
  0xb0   : > { %3004 = vmatprep.subr.bf16.mxu0 %v3427_v16  ;;  %2988 = vmatprep.mubr.bf16.mxu0 %v4151_v38  ;;  %v4161_v59 = vcombine.low %v1250_v13, %v1260_v43  ;;  %v3438_v13 = vld [vmem:[#allocation5 + $0x98] sm:$0xff]   ;;  %v1678_v43 = vrot.slane %v1676_v28, 4 }
  0xb1   : > { %2861 = vmatmul.mubr.bf16.gmra.mrb[12].mxu1 %v4139_v46  ;;  %v1449_v40 = vrot.slane %v1447_v20, 5  ;;  %v2636_v20 = vrot.slane %v3982_v57, 9 }
  0xb2   : > { %2877 = vmatpush3.bf16.msra.mxu1 %v3426_v50  ;;  %2880 = vmatprep.mubr.bf16.mxu1 %v2581_v61  ;;  %v3433_v50 = vld [vmem:[#allocation5 + $0x188] sm:$0xff]  }
  0xb3   : > { %3005 = vmatpush3.bf16.msra.mxu0 %v3427_v16  ;;  %2878 = vmatprep.subr.bf16.mxu1 %v3428_v34  ;;  %v2635_v16 = vrot.slane %v3949_v19, 9  ;;  %v1457_v19 = vshrl.u32 %v4171_v12, 16 }
  0xb4   : > { %3006 = vmatprep.subr.bf16.mxu0 %v3429_v42  ;;  %2989 = vmatmul.mubr.bf16.gmra.mrb[12].mxu0 %v4161_v59 }
  0xb5   : > { %3008 = vmatprep.mubr.bf16.mxu0 %v4020_v23  ;;  %v1677_v61 = vsel %vm3957_vm4, %v2635_v16, %v1676_v28  ;;  %v3439_v16 = vld [vmem:[#allocation5 + $0x1a0] sm:$0xff]  }
  0xb6   : > { %2879 = vmatpush3.bf16.msra.mxu1 %v3428_v34  ;;  %v1446_v34 = vrot.slane %v1444_v18, 4  ;;  %v3440_v28 = vld [vmem:[#allocation5 + $0xa0] sm:$0xff]  }
  0xb7   : > { %3007 = vmatpush3.bf16.msra.mxu0 %v3429_v42  ;;  %2896 = vmatprep.subr.bf16.mxu1 %v3431_v33  ;;  %v1683_v42 = vrot.slane %v3989_v62, 5  ;;  %v3441_v62 = vld [vmem:[#allocation5 + $0x1a8] sm:$0xff]  }
  0xb8   : > { %3024 = vmatprep.subr.bf16.mxu0 %v3432_v45  ;;  %v1450_v18 = vor.u32 %v1449_v40, %v1446_v34  ;;  %v2637_v34 = vrot.slane %v4000_v5, 9  ;;  %v1690_v40 = vrot.slane %v4003_v6, 5  ;;  %v1697_v6 = vrot.slane %v4042_v48, 5  ;;  %v3443_v48 = vld [vmem:[#allocation5 + $0x1b0] sm:$0xff]  }
  0xb9   : > { %2881 = vmatmul.mubr.bf16.vlgmr.msra.gmra.mrb[0].mxu1 %v3946_v15  ;;  %v4554_v15 = vrot.slane %v4147_v3, 5  ;;  %v1684_v57 = vsel %vm3957_vm4, %v2636_v20, %v1683_v42 }
  0xba   : > { %2897 = vmatpush3.bf16.msra.mxu1 %v3431_v33  ;;  %2884 = vmatprep.mubr.bf16.mxu1 %v4009_v11  ;;  %v4195_v33 = vrot.slane %v1453_v30, 5  ;;  %v4207_v30 = vrot.slane %v1463_v24, 5  ;;  %v1692_v5 = vrot.slane %v1690_v40, 4 }
  0xbb   : > { %2898 = vmatprep.subr.bf16.mxu1 %v3433_v50  ;;  %v4192_v32 = vrot.slane %v4554_v15, 4  ;;  %v4202_v15 = vld [vmem:[%s3933_s10 + $0x8] sm:$0x1] }
  0xbc   : > { %3009 = vmatmul.mubr.bf16.vlgmr.msra.gmra.mrb[0].mxu0 %v4054_v55 }
  0xbd   : > { %3025 = vmatpush3.bf16.msra.mxu0 %v3432_v45  ;;  %3012 = vmatprep.mubr.bf16.mxu0 %v4076_v25  ;;  %v1459_v45 = vrot.slane %v1457_v19, 4  ;;  %v1685_v19 = vrot.slane %v1683_v42, 4  ;;  %v2638_v42 = vrot.slane %v4039_v47, 9 }
  0xbe   : > { %2899 = vmatpush3.bf16.msra.mxu1 %v3433_v50  ;;  %3026 = vmatprep.subr.bf16.mxu0 %v3434_v36  ;;  %v1679_v50 = vrot.slane %v3965_v39, 5 }
  0xbf   : > { %2900 = vmatprep.subr.bf16.mxu1 %v3435_v4  ;;  %v1698_v20 = vsel %vm3957_vm4, %v2638_v42, %v1697_v6 }
  0xc1   : > { %2885 = vmatmul.mubr.bf16.gmra.mrb[4].mxu1 %v4027_v35  ;;  %3027 = vmatpush3.bf16.msra.mxu0 %v3434_v36  ;;  %v1680_v36 = vsel %vm3957_vm4, %v1678_v43, %v1679_v50  ;;  %v1665_v43 = vrot.slane %v4202_v15, 5  ;;  %v1700_v50 = vrot.slane %v4048_v53, 5  ;;  %v1707_v53 = vrot.slane %v4071_v14, 5 }
  0xc2   : > { %2901 = vmatpush3.bf16.msra.mxu1 %v3435_v4  ;;  %2888 = vmatprep.mubr.bf16.mxu1 %v4036_v44  ;;  %v1686_v4 = vrot.slane %v3994_v1, 5  ;;  %v4209_v39 = vcombine.low %v1677_v61, %v1680_v36  ;;  %v1460_v1 = vor.u32 %v1459_v45, %v4195_v33  ;;  %v1451_v61 = vrot.slane %v1450_v18, 4 }
  0xc3   : > { %2902 = vmatprep.subr.bf16.mxu1 %v3437_v27  ;;  %3028 = vmatprep.subr.bf16.mxu0 %v3436_v17  ;;  %v1691_v45 = vsel %vm3957_vm4, %v2637_v34, %v1690_v40  ;;  %v2639_v36 = vrot.slane %v4051_v54, 9  ;;  %v1714_v34 = vrot.slane %v4098_v56, 5 }
  0xc4   : > { %3013 = vmatmul.mubr.bf16.gmra.mrb[4].mxu0 %v4113_v9  ;;  %v1687_v24 = vsel %vm3957_vm4, %v1685_v19, %v1686_v4  ;;  %v1461_v47 = vrot.slane %v1460_v1, 4  ;;  %v1699_v4 = vrot.slane %v1697_v6, 4  ;;  %v2640_v19 = vrot.slane %v4092_v51, 9  ;;  %v3446_v6 = vld [vmem:[#allocation5 + $0xb8] sm:$0xff]  }
  0xc5   : > { %3029 = vmatpush3.bf16.msra.mxu0 %v3436_v17  ;;  %3016 = vmatprep.mubr.bf16.mxu0 %v4129_v37  ;;  %v4222_v17 = vcombine.low %v1684_v57, %v1687_v24  ;;  %v1704_v57 = vrot.slane %v4059_v63, 5  ;;  %v1711_v1 = vrot.slane %v4095_v52, 5  ;;  %v1456_v14 = vsel %vm3969_vm5, %v1451_v61, %v4195_v33  ;;  %v3445_v52 = vld [vmem:[#allocation5 + $0x1b8] sm:$0xff]  }
  0xc6   : > { %2903 = vmatpush3.bf16.msra.mxu1 %v3437_v27  ;;  %v1693_v27 = vrot.slane %v4018_v22, 5  ;;  %3030 = vmatprep.subr.bf16.mxu0 %v3438_v13  ;;  %v3442_v22 = vld [vmem:[#allocation5 + $0xa8] sm:$0xff]   ;;  %v1466_v51 = vsel %vm3969_vm5, %v1461_v47, %v4207_v30  ;;  %v1666_v33 = vsel %vm3957_vm4, %v4192_v32, %v1665_v43  ;;  %v3447_v43 = vld [vmem:[#allocation5 + $0x40] sm:$0xff]   ;;  %v2657_v47 = vrot.slane %v4108_v7, 9 }
  0xc7   : > { %2904 = vmatprep.subr.bf16.mxu1 %v3439_v16  ;;  %v1705_v54 = vsel %vm3957_vm4, %v2639_v36, %v1704_v57  ;;  %v1706_v63 = vrot.slane %v1704_v57, 4  ;;  %v1712_v56 = vsel %vm3957_vm4, %v2640_v19, %v1711_v1  ;;  %v836_v36 = vshrl.u32 %v4142_v21, 16  ;;  %v3451_v19 = vld [vmem:[#allocation5 + $0x50] sm:$0xff]  }
  0xc8   : > { %v1694_v18 = vsel %vm3957_vm4, %v1692_v5, %v1693_v27  ;;  %v3444_v27 = vld [vmem:[#allocation5 + $0xb0] sm:$0xff]   ;;  %v2119_v7 = vrot.slane %v4171_v12, 5  ;;  %v839_v57 = vshll.u32 %v4142_v21, 16 }
  0xc9   : > { %2889 = vmatmul.mubr.bf16.gmra.mrb[8].mxu1 %v4068_v10  ;;  %3031 = vmatpush3.bf16.msra.mxu0 %v3438_v13  ;;  %v1701_v13 = vsel %vm3957_vm4, %v1699_v4, %v1700_v50  ;;  %v1708_v30 = vsel %vm3957_vm4, %v1706_v63, %v1707_v53  ;;  %v3449_v50 = vld [vmem:[#allocation5 + $0x48] sm:$0xff]  }
  0xca   : > { %2905 = vmatpush3.bf16.msra.mxu1 %v3439_v16  ;;  %2892 = vmatprep.mubr.bf16.mxu1 %v4089_v49  ;;  %v4234_v16 = vcombine.low %v1691_v45, %v1694_v18  ;;  %v4245_v40 = vcombine.low %v1698_v20, %v1701_v13  ;;  %v4270_v61 = vcombine.low %v1705_v54, %v1708_v30  ;;  %v1929_v18 = vrot.slane %v4111_v8, 5  ;;  %v3450_v13 = vld [vmem:[#allocation5 + $0x148] sm:$0xff]  }
  0xcb   : > { %2906 = vmatprep.subr.bf16.mxu1 %v3441_v62  ;;  %3032 = vmatprep.subr.bf16.mxu0 %v3440_v28  ;;  %v2624_v45 = vcombine.low %v1456_v14, %v1466_v51  ;;  %v1932_v20 = vrot.slane %v4123_v31, 5  ;;  %v2122_v8 = vrot.slane %v4177_v26, 5  ;;  %v849_v31 = vshrl.u32 %v4147_v3, 16 }
  0xcc   : > { %3017 = vmatmul.mubr.bf16.gmra.mrb[8].mxu0 %v4151_v38  ;;  %v1931_v4 = vrot.slane %v1929_v18, 4  ;;  %v2121_v26 = vrot.slane %v2119_v7, 4  ;;  %v841_v54 = vrot.slane %v839_v57, 5 }
  0xcd   : > { %3033 = vmatpush3.bf16.msra.mxu0 %v3440_v28  ;;  %3020 = vmatprep.mubr.bf16.mxu0 %v4161_v59  ;;  %v4587_v28 = vrot.slane %v4147_v3, 5  ;;  %v4588_v59 = vrot.slane %v4142_v21, 9  ;;  %v838_v21 = vrot.slane %v836_v36, 4  ;;  %v851_v14 = vrot.slane %v849_v31, 4 }
  0xce   : > { %2907 = vmatpush3.bf16.msra.mxu1 %v3441_v62  ;;  %v1713_v62 = vrot.slane %v1711_v1, 4  ;;  %3034 = vmatprep.subr.bf16.mxu0 %v3442_v22  ;;  %v1933_v53 = vsel %vm3957_vm4, %v1931_v4, %v1932_v20 }
  0xcf   : > { %2908 = vmatprep.subr.bf16.mxu1 %v3443_v48  ;;  %v1663_v24 = vsel %vm3957_vm4, %v4588_v59, %v4587_v28  ;;  %v842_v29 = vor.u32 %v841_v54, %v838_v21  ;;  %v3455_v28 = vld [vmem:[#allocation5 + $0x60] sm:$0xff]   ;;  %v3457_v59 = vld [vmem:[#allocation5 + $0x68] sm:$0xff]  }
  0xd0   : > { %v1715_v42 = vsel %vm3957_vm4, %v1713_v62, %v1714_v34  ;;  %v2641_v32 = vcombine.low %v1663_v24, %v1666_v33  ;;  %v3453_v34 = vld [vmem:[#allocation5 + $0x58] sm:$0xff]   ;;  %v855_v62 = vshll.u32 %v4202_v15, 16 }
  0xd1   : > { %2893 = vmatmul.mubr.bf16.gmra.mrb[12].mxu1 %v4104_v0  ;;  %v4275_v5 = vcombine.low %v1712_v56, %v1715_v42  ;;  %3035 = vmatpush3.bf16.msra.mxu0 %v3442_v22  ;;  %v1930_v22 = vsel %vm3957_vm4, %v2657_v47, %v1929_v18  ;;  %v3458_v42 = vld [vmem:[#allocation5 + $0x168] sm:$0xff]  }
  0xd2   : > { %2909 = vmatpush3.bf16.msra.mxu1 %v3443_v48  ;;  %2912 = vmatprep.mubr.bf16.mxu1 %v4009_v11  ;;  %v3448_v11 = vld [vmem:[#allocation5 + $0x140] sm:$0xff]   ;;  %v2667_v48 = vrot.slane %v4167_v60, 9  ;;  %v4293_v1 = vcombine.low %v1930_v22, %v1933_v53  ;;  %v857_v33 = vrot.slane %v855_v62, 5 }
  0xd3   : > { %2910 = vmatprep.subr.bf16.mxu1 %v3445_v52  ;;  %3036 = vmatprep.subr.bf16.mxu0 %v3444_v27 }
  0xd4   : > { %3021 = vmatmul.mubr.bf16.gmra.mrb[12].mxu0 %v2624_v45  ;;  %v3460_v45 = vld [vmem:[#allocation5 + $0x70] sm:$0xff]  }
  0xd5   : > { %3037 = vmatpush3.bf16.msra.mxu0 %v3444_v27  ;;  %3040 = vmatprep.mubr.bf16.mxu0 %v2641_v32  ;;  %v3454_v27 = vld [vmem:[#allocation5 + $0x158] sm:$0xff]   ;;  %v3461_v32 = vld [vmem:[#allocation5 + $0x170] sm:$0xff]  }
  0xd6   : > { %2911 = vmatpush3.bf16.msra.mxu1 %v3445_v52  ;;  %3038 = vmatprep.subr.bf16.mxu0 %v3446_v6  ;;  %v3452_v52 = vld [vmem:[#allocation5 + $0x150] sm:$0xff]  }
  0xd7   : > { %2928 = vmatprep.subr.bf16.mxu1 %v3447_v43 }
  0xd9   : > { %2913 = vmatmul.mubr.bf16.vlgmr.msra.gmra.mrb[0].mxu1 %v4027_v35  ;;  %3039 = vmatpush3.bf16.msra.mxu0 %v3446_v6  ;;  %v845_v35 = vshll.u32 %v4147_v3, 16  ;;  %v4302_v3 = vsel %vm3957_vm4, %v2121_v26, %v2122_v8  ;;  %v2590_v6 = vcombine.low %v4167_v60, %v4171_v12  ;;  %v3465_v60 = vld [vmem:[#allocation5 + $0x208] sm:$0xff]   ;;  %v3466_v12 = vld [vmem:[#allocation5 + $0x210] sm:$0xff]  }
  0xda   : > { %2929 = vmatpush3.bf16.msra.mxu1 %v3447_v43  ;;  %2916 = vmatprep.mubr.bf16.mxu1 %v4036_v44  ;;  %v4297_v44 = vsel %vm3957_vm4, %v2667_v48, %v2119_v7  ;;  %v3464_v43 = vld [vmem:[#allocation5 + $0x200] sm:$0xff]  }
  0xdb   : > { %2930 = vmatprep.subr.bf16.mxu1 %v3449_v50  ;;  %3056 = vmatprep.subr.bf16.mxu0 %v3448_v11  ;;  %v847_v63 = vrot.slane %v845_v35, 5  ;;  %v2668_v51 = vcombine.low %v4297_v44, %v4302_v3 }
  0xdc   : > { %3041 = vmatmul.mubr.bf16.vlgmr.msra.gmra.mrb[0].mxu0 %v3984_v58 }
  0xdd   : > { %3057 = vmatpush3.bf16.msra.mxu0 %v3448_v11  ;;  %3044 = vmatprep.mubr.bf16.mxu0 %v4209_v39  ;;  %v852_v56 = vor.u32 %v851_v14, %v847_v63 }
  0xde   : > { %2931 = vmatpush3.bf16.msra.mxu1 %v3449_v50  ;;  %3058 = vmatprep.subr.bf16.mxu0 %v3450_v13  ;;  %v3467_v50 = vld [vmem:[#allocation5 + $0x218] sm:$0xff]  }
  0xdf   : > { %2932 = vmatprep.subr.bf16.mxu1 %v3451_v19  ;;  %v853_v24 = vrot.slane %v852_v56, 4 }
  0xe1   : > { %2917 = vmatmul.mubr.bf16.gmra.mrb[4].mxu1 %v4068_v10  ;;  %3059 = vmatpush3.bf16.msra.mxu0 %v3450_v13  ;;  %v843_v10 = vrot.slane %v842_v29, 4  ;;  %v858_v30 = vsel %vm3969_vm5, %v853_v24, %v857_v33 }
  0xe2   : > { %2933 = vmatpush3.bf16.msra.mxu1 %v3451_v19  ;;  %2920 = vmatprep.mubr.bf16.mxu1 %v4089_v49  ;;  %v3456_v49 = vld [vmem:[#allocation5 + $0x160] sm:$0xff]  }
  0xe3   : > { %2934 = vmatprep.subr.bf16.mxu1 %v3453_v34  ;;  %3060 = vmatprep.subr.bf16.mxu0 %v3452_v52  ;;  %v848_v15 = vsel %vm3969_vm5, %v843_v10, %v847_v63 }
  0xe4   : > { %3045 = vmatmul.mubr.bf16.gmra.mrb[4].mxu0 %v4222_v17 }
  0xe5   : > { %3061 = vmatpush3.bf16.msra.mxu0 %v3452_v52  ;;  %3048 = vmatprep.mubr.bf16.mxu0 %v4234_v16 }
  0xe6   : > { %2935 = vmatpush3.bf16.msra.mxu1 %v3453_v34  ;;  %3062 = vmatprep.subr.bf16.mxu0 %v3454_v27 }
  0xe7   : > { %2936 = vmatprep.subr.bf16.mxu1 %v3455_v28 }
  0xe9   : > { %2921 = vmatmul.mubr.bf16.gmra.mrb[8].mxu1 %v4104_v0  ;;  %3063 = vmatpush3.bf16.msra.mxu0 %v3454_v27  ;;  %v2599_v0 = vcombine.low %v848_v15, %v858_v30 }
  0xea   : > { %2937 = vmatpush3.bf16.msra.mxu1 %v3455_v28  ;;  %2924 = vmatprep.mubr.bf16.mxu1 %v4139_v46  ;;  %v3462_v46 = vld [vmem:[#allocation5 + $0x78] sm:$0xff]  }
  0xeb   : > { %2938 = vmatprep.subr.bf16.mxu1 %v3457_v59  ;;  %3064 = vmatprep.subr.bf16.mxu0 %v3456_v49 }
  0xec   : > { %3049 = vmatmul.mubr.bf16.gmra.mrb[8].mxu0 %v4245_v40 }
  0xed   : > { %3065 = vmatpush3.bf16.msra.mxu0 %v3456_v49  ;;  %3052 = vmatprep.mubr.bf16.mxu0 %v4270_v61 }
  0xee   : > { %2939 = vmatpush3.bf16.msra.mxu1 %v3457_v59  ;;  %3066 = vmatprep.subr.bf16.mxu0 %v3458_v42 }
  0xef   : > { %2940 = vmatprep.subr.bf16.mxu1 %v3460_v45 }
  0xf1   : > { %2925 = vmatmul.mubr.bf16.gmra.mrb[12].mxu1 %v2590_v6  ;;  %3067 = vmatpush3.bf16.msra.mxu0 %v3458_v42 }
  0xf2   : > { %2941 = vmatpush3.bf16.msra.mxu1 %v3460_v45  ;;  %2944 = vmatprep.mubr.bf16.mxu1 %v2599_v0 }
  0xf3   : > { %2942 = vmatprep.subr.bf16.mxu1 %v3462_v46  ;;  %3068 = vmatprep.subr.bf16.mxu0 %v3461_v32 }
  0xf4   : > { %3053 = vmatmul.mubr.bf16.gmra.mrb[12].mxu0 %v4275_v5 }
  0xf5   : > { %3069 = vmatpush3.bf16.msra.mxu0 %v3461_v32  ;;  %3072 = vmatprep.mubr.bf16.mxu0 %v3984_v58  ;;  %v3468_v58 = vld [vmem:[#allocation5 + $0x220] sm:$0xff]  }
  0xf6   : > { %2943 = vmatpush3.bf16.msra.mxu1 %v3462_v46  ;;  %3070 = vmatprep.subr.bf16.mxu0 %v3463_v41 }
  0xf7   : > { %3120 = vmatprep.subr.bf16.mxu1 %v3464_v43 }
  0xf9   : > { %2945 = vmatmul.mubr.bf16.vlgmr.msra.gmra.mrb[0].mxu1 %v3996_v2  ;;  %3071 = vmatpush3.bf16.msra.mxu0 %v3463_v41  ;;  %v3469_v2 = vld [vmem:[#allocation5 + $0x228] sm:$0xff]  }
  0xfa   : > { %3128 = vmatpush3.bf16.msra.mxu1 %v3464_v43  ;;  %2948 = vmatprep.mubr.bf16.mxu1 %v4020_v23  ;;  %v3470_v23 = vld [vmem:[#allocation5 + $0x230] sm:$0xff]  }
  0xfb   : > { %3121 = vmatprep.subr.bf16.mxu1 %v3465_v60  ;;  %3088 = vmatprep.subr.bf16.mxu0 %v3464_v43 }
  0xfc   : > { %3073 = vmatmul.mubr.bf16.vlgmr.msra.gmra.mrb[0].mxu0 %v4209_v39 }
  0xfd   : > { %3089 = vmatpush3.bf16.msra.mxu0 %v3464_v43  ;;  %3076 = vmatprep.mubr.bf16.mxu0 %v4222_v17 }
  0xfe   : > { %3129 = vmatpush3.bf16.msra.mxu1 %v3465_v60  ;;  %3090 = vmatprep.subr.bf16.mxu0 %v3465_v60 }
  0xff   : > { %3122 = vmatprep.subr.bf16.mxu1 %v3466_v12 }
 0x101   : > { %2949 = vmatmul.mubr.bf16.gmra.mrb[4].mxu1 %v4054_v55  ;;  %3091 = vmatpush3.bf16.msra.mxu0 %v3465_v60  ;;  %v3471_v55 = vld [vmem:[#allocation5 + $0x238] sm:$0xff]  }
 0x102   : > { %3130 = vmatpush3.bf16.msra.mxu1 %v3466_v12  ;;  %2952 = vmatprep.mubr.bf16.mxu1 %v4076_v25 }
 0x103   : > { %3123 = vmatprep.subr.bf16.mxu1 %v3467_v50  ;;  %3092 = vmatprep.subr.bf16.mxu0 %v3466_v12 }
 0x104   : > { %3077 = vmatmul.mubr.bf16.gmra.mrb[4].mxu0 %v4234_v16 }
 0x105   : > { %3093 = vmatpush3.bf16.msra.mxu0 %v3466_v12  ;;  %3080 = vmatprep.mubr.bf16.mxu0 %v4245_v40 }
 0x106   : > { %3131 = vmatpush3.bf16.msra.mxu1 %v3467_v50  ;;  %3094 = vmatprep.subr.bf16.mxu0 %v3467_v50 }
 0x107   : > { %3124 = vmatprep.subr.bf16.mxu1 %v3468_v58 }
 0x109   : > { %2953 = vmatmul.mubr.bf16.gmra.mrb[8].mxu1 %v4113_v9  ;;  %3095 = vmatpush3.bf16.msra.mxu0 %v3467_v50 }
 0x10a   : > { %3132 = vmatpush3.bf16.msra.mxu1 %v3468_v58  ;;  %2956 = vmatprep.mubr.bf16.mxu1 %v4129_v37 }
 0x10b   : > { %3125 = vmatprep.subr.bf16.mxu1 %v3469_v2  ;;  %3096 = vmatprep.subr.bf16.mxu0 %v3468_v58 }
 0x10c   : > { %3081 = vmatmul.mubr.bf16.gmra.mrb[8].mxu0 %v4270_v61 }
 0x10d   : > { %3097 = vmatpush3.bf16.msra.mxu0 %v3468_v58  ;;  %3084 = vmatprep.mubr.bf16.mxu0 %v4275_v5 }
 0x10e   : > { %3133 = vmatpush3.bf16.msra.mxu1 %v3469_v2  ;;  %3098 = vmatprep.subr.bf16.mxu0 %v3469_v2 }
 0x10f   : > { %3126 = vmatprep.subr.bf16.mxu1 %v3470_v23 }
 0x111   : > { %2957 = vmatmul.mubr.bf16.gmra.mrb[12].mxu1 %v4151_v38  ;;  %3099 = vmatpush3.bf16.msra.mxu0 %v3469_v2 }
 0x112   : > { %3134 = vmatpush3.bf16.msra.mxu1 %v3470_v23  ;;  %3112 = vmatprep.mubr.bf16.mxu1 %v4270_v61 }
 0x113   : > { %3127 = vmatprep.subr.bf16.mxu1 %v3471_v55  ;;  %3100 = vmatprep.subr.bf16.mxu0 %v3470_v23 }
 0x114   : > { %3085 = vmatmul.mubr.bf16.gmra.mrb[12].mxu0 %v4293_v1 }
 0x115   : > { %3101 = vmatpush3.bf16.msra.mxu0 %v3470_v23  ;;  %3104 = vmatprep.mubr.bf16.mxu0 %v4209_v39 }
 0x116   : > { %3135 = vmatpush3.bf16.msra.mxu1 %v3471_v55  ;;  %3102 = vmatprep.subr.bf16.mxu0 %v3471_v55 }
 0x119   : > { %3113 = vmatmul.mubr.bf16.vlgmr.msra.gmra.mrb[16].mxu1 %v4275_v5  ;;  %3103 = vmatpush3.bf16.msra.mxu0 %v3471_v55 }
 0x11a   : > { %3116 = vmatprep.mubr.bf16.mxu1 %v4293_v1 }
 0x11c   : > { %3105 = vmatmul.mubr.bf16.vlgmr.msra.gmra.mrb[0].mxu0 %v4222_v17 }
 0x11d   : > { %3108 = vmatprep.mubr.bf16.mxu0 %v4234_v16 }
 0x121   : > { %3117 = vmatmul.mubr.bf16.gmra.mrb[20].mxu1 %v2668_v51 }
 0x124   : > { %3109 = vmatmul.mubr.bf16.gmra.mrb[4].mxu0 %v4245_v40 }
 0x1cc   : > { %v2946_v25 = vpop.f32.mrb[0].mxu1 }
 0x1cd   : > { %v1158_v9 = vpop.f32.mrb[1].mxu1 }
 0x1ce   : > { %v2947_v37 = vpop.f32.mrb[2].mxu1 }
 0x1cf   : > { %v1161_v38 = vpop.f32.mrb[3].mxu1 }
 0x1d4   : > { %v4348_v39 = vpop.f32.mrb[4].mxu1 }
 0x1d5   : > { %v4350_v61 = vpop.f32.mrb[5].mxu1 }
 0x1d6   : > { %v4352_v5 = vpop.f32.mrb[6].mxu1 }
 0x1d7   : > { %v4354_v47 = vpop.f32.mrb[7].mxu1 }
 0x1dc   : > { %v2954_v17 = vpop.f32.mrb[8].mxu1 }
 0x1dd   : > { %v1190_v16 = vpop.f32.mrb[9].mxu1 }
 0x1de   : > { %v2955_v18 = vpop.f32.mrb[10].mxu1 }
 0x1df   : > { %v1193_v11 = vpop.f32.mrb[11].mxu1  ;;  %v3082_v20 = vpop.f32.mrb[8].mxu0 }
 0x1e0   : > { %v3144_v22 = vadd.f32 %v3082_v20, %v2954_v17  ;;  %v2069_v40 = vpop.f32.mrb[9].mxu0 }
 0x1e1   : > { %v3146_v4 = vadd.f32 %v2069_v40, %v1190_v16  ;;  %v3083_v48 = vpop.f32.mrb[10].mxu0 }
 0x1e2   : > { %v3148_v36 = vadd.f32 %v3083_v48, %v2955_v18  ;;  %v2072_v7 = vpop.f32.mrb[11].mxu0 }
 0x1e3   : > { %v3150_v57 = vadd.f32 %v2072_v7, %v1193_v11 }
 0x1e4   : > { %v2958_v8 = vpop.f32.mrb[12].mxu1 }
 0x1e5   : > { %v1206_v31 = vpop.f32.mrb[13].mxu1 }
 0x1e6   : > { %v2959_v35 = vpop.f32.mrb[14].mxu1 }
 0x1e7   : > { %v1209_v53 = vpop.f32.mrb[15].mxu1  ;;  %v3086_v13 = vpop.f32.mrb[12].mxu0 }
 0x1e8   : > { %v3152_v19 = vadd.f32 %v3086_v13, %v2958_v8  ;;  %v2085_v1 = vpop.f32.mrb[13].mxu0 }
 0x1e9   : > { %v3154_v44 = vadd.f32 %v2085_v1, %v1206_v31  ;;  %v3087_v26 = vpop.f32.mrb[14].mxu0 }
 0x1ea   : > { %v3156_v21 = vadd.f32 %v3087_v26, %v2959_v35  ;;  %v2088_v3 = vpop.f32.mrb[15].mxu0 }
 0x1eb   : > { %v3158_v54 = vadd.f32 %v2088_v3, %v1209_v53 }
 0x1ec   : > { %v3114_v34 = vpop.f32.mrb[16].mxu1 }
 0x1ed   : > { %v4357_v63 = vadd.f32 %v3144_v22, %v3114_v34  ;;  %v2259_v14 = vpop.f32.mrb[17].mxu1 }
 0x1ee   : > { %v4359_v51 = vadd.f32 %v3146_v4, %v2259_v14  ;;  %v3115_v52 = vpop.f32.mrb[18].mxu1 }
 0x1ef   : > { %2316 = vst [vmem:[%s4361_s25 + $0x50] sm:$0xff] %v4357_v63  ;;  %v4365_v29 = vadd.f32 %v3148_v36, %v3115_v52  ;;  %v2262_v56 = vpop.f32.mrb[19].mxu1  ;;  %v3106_v27 = vpop.f32.mrb[0].mxu0 }
 0x1f0   : > { %2314 = vst [vmem:[%s4361_s25 + $0x40] sm:$0xff] %v4359_v51  ;;  %v4369_v62 = vadd.f32 %v3150_v57, %v2262_v56  ;;  %v3136_v28 = vadd.f32 %v3106_v27, %v2946_v25  ;;  %v2227_v59 = vpop.f32.mrb[1].mxu0 }
 0x1f1   : > { %2317 = vst [vmem:[%s4361_s25 + $0x58] sm:$0xff] %v4365_v29  ;;  %v3137_v10 = vadd.f32 %v2227_v59, %v1158_v9  ;;  %v3107_v24 = vpop.f32.mrb[2].mxu0 }
 0x1f2   : > { %2315 = vst [vmem:[%s4361_s25 + $0x48] sm:$0xff] %v4369_v62  ;;  %2308 = vst [vmem:[%s4361_s25 + $0x10] sm:$0xff] %v3136_v28  ;;  %v3138_v33 = vadd.f32 %v3107_v24, %v2947_v37  ;;  %v2230_v49 = vpop.f32.mrb[3].mxu0  ;;  %v2346_v50 = vmul.f32 %v3136_v28, %v3136_v28 }
 0x1f3   : > { %2306 = vst [vmem:[%s4361_s25] sm:$0xff] %v3137_v10  ;;  %v3139_v30 = vadd.f32 %v2230_v49, %v1161_v38  ;;  %v2344_v46 = vmul.f32 %v3137_v10, %v3137_v10 }
 0x1f4   : > { %v3118_v15 = vpop.f32.mrb[20].mxu1  ;;  %2309 = vst [vmem:[%s4361_s25 + $0x18] sm:$0xff] %v3138_v33  ;;  %v2347_v9 = vmul.f32 %v3138_v33, %v3138_v33 }
 0x1f5   : > { %v4379_v42 = vadd.f32 %v3152_v19, %v3118_v15  ;;  %v2275_v45 = vpop.f32.mrb[21].mxu1  ;;  %2307 = vst [vmem:[%s4361_s25 + $0x8] sm:$0xff] %v3139_v30  ;;  %v2322_v32 = vadd.f32 %v3139_v30, %v3137_v10  ;;  %v2345_v41 = vmul.f32 %v3139_v30, %v3139_v30 }
 0x1f6   : > { %v4382_v6 = vadd.f32 %v3154_v44, %v2275_v45  ;;  %v3119_v0 = vpop.f32.mrb[22].mxu1 }
 0x1f7   : > { %2320 = vst [vmem:[%s4361_s25 + $0x70] sm:$0xff] %v4379_v42  ;;  %v4387_v43 = vadd.f32 %v3156_v21, %v3119_v0  ;;  %v2278_v60 = vpop.f32.mrb[23].mxu1  ;;  %v2323_v58 = vadd.f32 %v3136_v28, %v2322_v32  ;;  %v2360_v2 = vadd.f32 %v2345_v41, %v2344_v46  ;;  %v3110_v23 = vpop.f32.mrb[4].mxu0 }
 0x1f8   : > { %2318 = vst [vmem:[%s4361_s25 + $0x60] sm:$0xff] %v4382_v6  ;;  %v4391_v12 = vadd.f32 %v3158_v54, %v2278_v60  ;;  %v3140_v55 = vadd.f32 %v3110_v23, %v4348_v39  ;;  %v2243_v25 = vpop.f32.mrb[5].mxu0 }
 0x1f9   : > { %2321 = vst [vmem:[%s4361_s25 + $0x78] sm:$0xff] %v4387_v43  ;;  %v2361_v37 = vadd.f32 %v2360_v2, %v2346_v50  ;;  %v3141_v38 = vadd.f32 %v2243_v25, %v4350_v61  ;;  %v2324_v17 = vadd.f32 %v3138_v33, %v2323_v58  ;;  %v3111_v16 = vpop.f32.mrb[6].mxu0 }
 0x1fa   : > { %2319 = vst [vmem:[%s4361_s25 + $0x68] sm:$0xff] %v4391_v12  ;;  %2312 = vst [vmem:[%s4361_s25 + $0x30] sm:$0xff] %v3140_v55  ;;  %v3142_v18 = vadd.f32 %v3111_v16, %v4352_v5  ;;  %v2246_v11 = vpop.f32.mrb[7].mxu0 }
 0x1fb   : > { %2310 = vst [vmem:[%s4361_s25 + $0x20] sm:$0xff] %v3141_v38  ;;  %v2325_v39 = vadd.f32 %v3141_v38, %v2324_v17  ;;  %v2348_v20 = vmul.f32 %v3141_v38, %v3141_v38  ;;  %v2362_v22 = vadd.f32 %v2361_v37, %v2347_v9  ;;  %v3143_v40 = vadd.f32 %v2246_v11, %v4354_v47 }
 0x1fc   : > { %2313 = vst [vmem:[%s4361_s25 + $0x38] sm:$0xff] %v3142_v18 }
 0x1fd   : > { %v2363_v61 = vadd.f32 %v2362_v22, %v2348_v20  ;;  %2311 = vst [vmem:[%s4361_s25 + $0x28] sm:$0xff] %v3143_v40  ;;  %v2326_v5 = vadd.f32 %v3143_v40, %v2325_v39  ;;  %v2349_v4 = vmul.f32 %v3143_v40, %v3143_v40 }
 0x1fe   : > { %3543 = shalt.err (!%p3540_p13)
}
 0x1ff   : > { %s3544_s10 = scalar_lea.hbm %s4409_s12, 2048  ;;  %s3548_s27 = scalar_lea.hbm %s4589_s1, 8192 }
 0x200   : > { %p3545_p2 = scmp.ne.s32.totalorder %s4409_s12, %s3544_s10  ;;  %p3549_p10 = scmp.lt.u32.totalorder %s4409_s12, %s4589_s1 }
 0x201   : > { %p3550_p1 = scmp.lt.u32.totalorder %s3548_s27, %s3544_s10  ;;  %p3552_p9 = scmp.lt.u32.totalorder %s3544_s10, %s4409_s12 }
 0x202   : > { %p3546_p4 = pnand %p3545_p2, %p3856_p11 }
 0x203   : > { %p3551_p7 = por %p3550_p1, %p3549_p10 }
 0x204   : > { %p3547_p5 = pneg %p3546_p4 }
 0x205   : > { %p3553_p12 = por %p3552_p9, %p3551_p7 }
 0x207   : > { %p3554_p0 = pnand %p3553_p12, %p3547_p5 }
 0x209   : > { %3557 = shalt.err (!%p3554_p0)
}
 0x20a   : > { %s3695_s5 = smov 128   ;;  %s3696_s7 = smov 8   ;;  %v2350_v47 = vmul.f32 %v3140_v55, %v3140_v55  ;;  %v2327_v48 = vadd.f32 %v3140_v55, %v2326_v5  ;;  %v2364_v36 = vadd.f32 %v2363_v61, %v2349_v4  ;;  %v2351_v7 = vmul.f32 %v3142_v18, %v3142_v18 }
 0x20b   : > { %3274 = dma.vmem_to_hbm [thread:$0]  (%p3856_p11), %s4402_s11, 2048, %s4409_s12, %s2383_s28, %s3695_s5, %s3695_s5, %s3696_s7   ;;  %v2352_v31 = vmul.f32 %v4359_v51, %v4359_v51  ;;  %v2353_v13 = vmul.f32 %v4369_v62, %v4369_v62  ;;  %v2354_v44 = vmul.f32 %v4357_v63, %v4357_v63  ;;  %v2355_v3 = vmul.f32 %v4365_v29, %v4365_v29 }
 0x20c   : > { %v2328_v8 = vadd.f32 %v3142_v18, %v2327_v48  ;;  %v2365_v57 = vadd.f32 %v2364_v36, %v2350_v47  ;;  %s4590_s6 = sld [smem:[#allocation15_spill]]  ;;  %v2356_v14 = vmul.f32 %v4382_v6, %v4382_v6  ;;  %v2358_v27 = vmul.f32 %v4379_v42, %v4379_v42  ;;  %s2683_s15 = sshll.u32 %s3676_s19, 1 }
 0x20d   : > { %v2359_v59 = vmul.f32 %v4387_v43, %v4387_v43  ;;  %s2415_s12 = sadd.s32 %s3672_s18, %s2683_s15  ;;  %s4591_s28 = sld [smem:[#allocation18_spill]] }
 0x20e   : > { %v2329_v35 = vadd.f32 %v4359_v51, %v2328_v8  ;;  %v2366_v53 = vadd.f32 %v2365_v57, %v2351_v7  ;;  %s2684_s8 = sshll.u32 %s2415_s12, 5  ;;  %s4592_s2 = sld [smem:[#allocation23_spill]] }
 0x20f   : > { %s3697_s27 = smov [#allocation8]  }
 0x210   : > { %v2367_v19 = vadd.f32 %v2366_v53, %v2352_v31  ;;  %v2330_v1 = vadd.f32 %v4369_v62, %v2329_v35  ;;  %s3562_s4 = sshll.u32 %s3697_s27, 4  ;;  %s3563_s4 = int_to_ptr.vmem [resolvable:$false] %s3562_s4 }
 0x211   : > { %s3564_s9 = scalar_lea.vmem %s3563_s4, 64 }
 0x212   : > { %v2331_v26 = vadd.f32 %v4357_v63, %v2330_v1  ;;  %v2368_v21 = vadd.f32 %v2367_v19, %v2353_v13  ;;  %v2357_v63 = vmul.f32 %v4391_v12, %v4391_v12  ;;  %s234_s13 = sand.u32 1, %s4590_s6  }
 0x213   : > { %s2564_s11 = sshll.u32 %s234_s13, 1  ;;  %s2388_s18 = scalar_lea.sflag [#allocation9], %s234_s13 }
 0x214   : > { %v2332_v34 = vadd.f32 %v4365_v29, %v2331_v26  ;;  %v2369_v54 = vadd.f32 %v2368_v21, %v2354_v44  ;;  %s236_s30 = scalar_lea.vmem [#allocation8], %s2564_s11  ;;  %s4467_s25 = scalar_lea.hbm %s4592_s2, %s2684_s8 }
 0x215   : > { %s2422_s24 = sshll.u32 %s236_s30, 4  ;;  %p4593_p3 = scmp.ne.s32.totalorder %s4591_s28, 0  ;;  %s4469_s24 = int_to_ptr.vmem [resolvable:$true] %s2422_s24 }
 0x216   : > { %v2333_v51 = vadd.f32 %v4382_v6, %v2332_v34  ;;  %v2370_v52 = vadd.f32 %v2369_v54, %v2355_v3  ;;  %s3558_s19 = scalar_lea.vmem %s4469_s24, 32  ;;  %p3565_p13 = scmp.lt.s32.totalorder %s4469_s24, %s3563_s4 }
 0x217   : > { %p3559_p11 = scmp.ne.s32.totalorder %s4469_s24, %s3558_s19  ;;  %p3566_p2 = scmp.lt.s32.totalorder %s3564_s9, %s3558_s19 }
 0x218   : > { %v2334_v56 = vadd.f32 %v4391_v12, %v2333_v51  ;;  %v2371_v62 = vadd.f32 %v2370_v52, %v2356_v14 }
 0x219   : > { %p3560_p6 = pnand %p3559_p11, %p4593_p3  ;;  %p3567_p4 = por %p3566_p2, %p3565_p13 }
 0x21a   : > { %v2335_v29 = vadd.f32 %v4379_v42, %v2334_v56  ;;  %v2372_v28 = vadd.f32 %v2371_v62, %v2357_v63 }
 0x21b   : > { %p3561_p8 = pneg %p3560_p6 }
 0x21c   : > { %v2336_v10 = vadd.f32 %v4387_v43, %v2335_v29  ;;  %v2373_v24 = vadd.f32 %v2372_v28, %v2358_v27 }
 0x21d   : > { %p3568_p5 = pnand %p3567_p4, %p3561_p8 }
 0x21e   : > { %v2337_v33 = vrot.slane %v2336_v10, 4  ;;  %v2374_v49 = vadd.f32 %v2373_v24, %v2359_v59 }
 0x220   : > { %v2338_v15 = vadd.f32 %v2337_v33, %v2336_v10  ;;  %v2375_v30 = vrot.slane %v2374_v49, 4 }
 0x222   : > { %v2339_v45 = vrot.slane %v2338_v15, 2  ;;  %v2376_v6 = vadd.f32 %v2375_v30, %v2374_v49 }
 0x224   : > { %v2340_v0 = vadd.f32 %v2339_v45, %v2338_v15  ;;  %v2377_v46 = vrot.slane %v2376_v6, 2 }
 0x226   : > { %v2341_v42 = vrot.slane %v2340_v0, 1  ;;  %v2378_v32 = vadd.f32 %v2377_v46, %v2376_v6 }
 0x228   : > { %v2342_v41 = vadd.f32 %v2341_v42, %v2340_v0  ;;  %v2379_v43 = vrot.slane %v2378_v32, 1 }
 0x22a   : > { %2343 = vst [vmem:[%s236_s30] sm:$0x1] %v2342_v41  ;;  %v2380_v60 = vadd.f32 %v2379_v43, %v2378_v32 }
 0x22c   : > { %2381 = vst [vmem:[%s236_s30 + $0x1] sm:$0x1] %v2380_v60 }
 0x22d   : > { %3571 = shalt.err (!%p3568_p5)
}
 0x22e   : > { %s3572_s5 = scalar_lea.hbm %s4467_s25, 32  ;;  %s3576_s13 = scalar_lea.hbm %s4592_s2, 128 }
 0x22f   : > { %p3573_p10 = scmp.ne.s32.totalorder %s4467_s25, %s3572_s5  ;;  %p3577_p9 = scmp.lt.u32.totalorder %s4467_s25, %s4592_s2 }
 0x230   : > { %p3578_p12 = scmp.lt.u32.totalorder %s3576_s13, %s3572_s5  ;;  %p3580_p11 = scmp.lt.u32.totalorder %s3572_s5, %s4467_s25 }
 0x231   : > { %p3574_p1 = pnand %p3573_p10, %p4593_p3 }
 0x232   : > { %p3579_p0 = por %p3578_p12, %p3577_p9 }
 0x233   : > { %p3575_p7 = pneg %p3574_p1 }
 0x234   : > { %p3581_p6 = por %p3580_p11, %p3579_p0 }
 0x236   : > { %p3582_p8 = pnand %p3581_p6, %p3575_p7 }
 0x238   : > { %3585 = shalt.err (!%p3582_p8)
}
 0x239   : > { %3275 = dma.vmem_to_hbm [thread:$0]  (%p4593_p3), %s4469_s24, 32, %s4467_s25, %s2388_s18  }
 0x23a PF: > { %s4594_s12 = sld [smem:[#allocation16_spill]]  ;;  %s4595_s8 = sld [smem:[#allocation17_spill]] }
 0x23b   : > { %p3296_p13 = scmp.ge.s32.totalorder %s3688_s22, 2 }
 0x240   : > { %s2434_s30 = sand.u32 1, %s4594_s12   ;;  %p4596_p2 = scmp.ne.s32.totalorder %s4595_s8, 0 }
 0x241   : > { %s2435_s26 = scalar_lea.sflag [#allocation4], %s2434_s30 }
 0x242   : > { %p3287_p4 = pnand %p3296_p13, %p4596_p2 }
 0x244   : > { %3639 = dma.done.wait (!%p3287_p4), %s2435_s26, 2048  }
 0x245   : > { %3641 = vsyncadd (!%p3287_p4), %s2435_s26, 4294965248  ;;  %s4597_s10 = sld [smem:[#allocation14_spill]]  ;;  %s4598_s19 = sld [smem:[#allocation19_spill]] }
 0x24b   : > { %s2443_s27 = sand.u32 1, %s4597_s10   ;;  %p4599_p5 = scmp.ne.s32.totalorder %s4598_s19, 0 }
 0x24c   : > { %s2444_s28 = scalar_lea.sflag [#allocation9], %s2443_s27 }
 0x24d   : > { %p3290_p10 = pnand %p3296_p13, %p4599_p5 }
 0x24f   : > { %3643 = dma.done.wait (!%p3290_p10), %s2444_s28, 32  }
 0x250   : > { %3645 = vsyncadd (!%p3290_p10), %s2444_s28, 4294967264  ;;  %s24_s22 = sadd.s32 1, %s3688_s22   ;;  %s4600_s12 = sld [smem:[#allocation15_spill]] }
 0x251   : > { %p21_p3 = scmp.ge.s32.totalorder %s24_s22, 6   ;;  %s4601_s24 = sld [smem:[#allocation20_spill]] }
 0x252   : > { %s4602_s13 = smov %s3656_s14  ;;  %s4603_s14 = smov %s3878_s29 }
 0x253   : > { %s4604_s15 = smov %s3664_s16  ;;  %s4605_s16 = smov %s3668_s17 }
 0x254   : > { %s4606_s17 = smov %s3875_s3  ;;  %s4607_s18 = smov %s3680_s20 }
 0x255   : > { %s4608_s19 = smov %s3684_s21  ;;  %s4609_s20 = smov %s4612_s23 }
 0x256   :  { %23 = sbr.rel (!%p21_p3) target bundleno = 16 (0x10), region = 102 }
 0x257   : > { %s4610_s21 = smov %s4601_s24 }
 0x25d   :  { %2449 = vsyncpa [#allocation3], 1 }
 0x25e   :  { %2451 = vsyncpa [#allocation3 + $0x1], 1 }
 0x25f   :  { %2452 = vsyncpa [#allocation6], 1 }
 0x260   :  { %2453 = vsyncpa [#allocation4], 1 }
 0x261   :  { %2455 = vsyncpa [#allocation4 + $0x1], 1 }
 0x262   :  { %2456 = vsyncpa [#allocation9], 1 }
 0x263   :  { %2458 = vsyncpa [#allocation9 + $0x1], 1 }

// kernel: double_conv.4
= control target key start
LH: loop header
LB: loop body
LE: loop exit
PB: predicated region body
PF: predicated region fallthrough
CT: control target
= control target key end

     0   :  { %s5287_s0 = inlined_call_operand.hbm [shape: f32[2,2,10,18,128], index: 0, kind: input, shape index: {}]   ;;  %s5288_s1 = inlined_call_operand.hbm [shape: f32[1,128], index: 1, kind: input, shape index: {}]   ;;  %s5289_s2 = inlined_call_operand.hbm [shape: f32[1,128], index: 2, kind: input, shape index: {}]   ;;  %s5290_s3 = inlined_call_operand.hbm [shape: bf16[3,3,128,128], index: 3, kind: input, shape index: {}]   ;;  %s5291_s4 = inlined_call_operand.hbm [shape: f32[2,16,16,128], index: 4, kind: output, shape index: {0}]   ;;  %s5292_s5 = inlined_call_operand.hbm [shape: f32[4,2,128], index: 5, kind: output, shape index: {1}]  }
   0x1   :  { %5320 = sst [smem:[#allocation28_spill]] %s5288_s1 }
   0x2   :  { %5321 = sst [smem:[#allocation29_spill]] %s5289_s2 }
   0x3   :  { %5322 = sst [smem:[#allocation30_spill]] %s5290_s3 }
   0x4   :  { %5323 = sst [smem:[#allocation31_spill]] %s5291_s4 }
   0x5   :  { %5324 = sst [smem:[#allocation32_spill]] %s5292_s5 }
   0x6   :  { %11 = vsyncpa [#allocation3], 0 }
   0x7   :  { %13 = vsyncpa [#allocation3 + $0x1], 0 }
   0x8   :  { %14 = vsyncpa [#allocation6], 0 }
   0x9   :  { %15 = vsyncpa [#allocation9], 0 }
   0xa   :  { %16 = vsyncpa [#allocation4], 0 }
   0xb   :  { %18 = vsyncpa [#allocation4 + $0x1], 0 }
   0xc   :  { %19 = vsyncpa [#allocation12], 0 }
   0xd   :  { %21 = vsyncpa [#allocation12 + $0x1], 0  ;;  %s3992_s18 = smov 0   ;;  %s3994_s19 = smov 0  }
   0xe   :  { %s3996_s20 = smov 0   ;;  %s3998_s21 = smov 0  }
   0xf   :  { %s4000_s22 = smov 0   ;;  %s4002_s23 = smov 0  }
  0x10   :  { %s4004_s24 = smov 0   ;;  %s4006_s25 = smov 0  }
  0x11   :  { %s4008_s26 = smov 0   ;;  %s4010_s27 = smov 0  }
  0x12   :  { %s4012_s28 = smov 0  }
  0x13 LB: > { %5325 = sst [smem:[#allocation18_spill]] %s3908_s18  ;;  %s2702_s29 = sadd.s32 4294967295, %s3948_s28   ;;  %s3948_s28 = sphi %s4012_s28, %s27_s28   ;;  %s3944_s27 = sphi %s4010_s27, %s5486_s27   ;;  %s3940_s26 = sphi %s4008_s26, %s5485_s26   ;;  %s3936_s25 = sphi %s4006_s25, %s5484_s25   ;;  %s3932_s24 = sphi %s4004_s24, %s5483_s24   ;;  %s3928_s23 = sphi %s4002_s23, %s5482_s23   ;;  %s3924_s22 = sphi %s4000_s22, %s5481_s22   ;;  %s3920_s21 = sphi %s3998_s21, %s5480_s21   ;;  %s3916_s20 = sphi %s3996_s20, %s5479_s20   ;;  %s3912_s19 = sphi %s3994_s19, %s5478_s19   ;;  %s3908_s18 = sphi %s3992_s18, %s5477_s18  }
  0x14   : > { %5326 = sst [smem:[#allocation19_spill]] %s3912_s19  ;;  %s2703_s30 = sadd.s32 4294967294, %s3948_s28  }
  0x15   : > { %5327 = sst [smem:[#allocation20_spill]] %s3920_s21  ;;  %p61_p0 = scmp.ne.s32.totalorder %s3924_s22, %s3920_s21 }
  0x16   : > { %p4051_p1 = scmp.eq.s32.totalorder %s2702_s29, 0  ;;  %p4055_p2 = scmp.eq.s32.totalorder %s2702_s29, 3 }
  0x17   : > { %p156_p3 = scmp.eq.s32.totalorder %s2703_s30, 3  ;;  %p179_p6 = scmp.ne.s32.totalorder %s3916_s20, %s3912_s19 }
  0x18   : > { %s5328_s6 = scalar_select %p4051_p1, 1, 0 }
  0x19   : > { %s5329_s7 = scalar_select %p4055_p2, 1, 0 }
  0x1a   : > { %p4061_p4 = por %p4051_p1, %p61_p0  ;;  %p4066_p5 = por %p156_p3, %p61_p0 }
  0x1b   : > { %p185_p7 = scmp.ne.s32.totalorder %s3912_s19, %s3908_s18  ;;  %p2706_p8 = scmp.ge.s32.totalorder %s3948_s28, 1 }
  0x1c   : > { %s5330_s8 = scalar_select %p4061_p4, 1, 0 }
  0x1d   : > { %s5331_s10 = scalar_select %p4066_p5, 1, 0 }
  0x1e   : > { %p4077_p9 = por %p179_p6, %p4055_p2  ;;  %p193_p10 = scmp.lt.s32.totalorder %s3948_s28, 5 }
  0x1f   : > { %5332 = sst [smem:[#allocation21_spill]] %s5331_s10  ;;  %p4082_p11 = por %p185_p7, %p156_p3 }
  0x20   : > { %s5333_s11 = scalar_select %p4077_p9, 1, 0 }
  0x21   : > { %s5335_s12 = scalar_select %p4082_p11, 1, 0 }
  0x22   : > { %5334 = sst [smem:[#allocation22_spill]] %s5333_s11  ;;  %p4086_p12 = pnand %p2706_p8, %p193_p10 }
  0x23   : > { %5336 = sst [smem:[#allocation23_spill]] %s5335_s12  ;;  %s3950_s14 = smov [#allocation5]  }
  0x24   : > { %s5337_s13 = scalar_select %p4086_p12, 1, 0 }
  0x25   : > { %s206_s15 = sshll.u32 %s3950_s14, 4  ;;  %p3474_p13 = pneg %p4086_p12  ;;  %s207_s15 = int_to_ptr.vmem [resolvable:$true] %s206_s15 }
  0x26   : > { %s3951_s17 = smov [#allocation7]   ;;  %s3952_s30 = smov [#allocation8]  }
  0x27   : > { %p4094_p0 = pnand %p3474_p13, %p4051_p1  ;;  %s217_s29 = sshll.u32 %s3951_s17, 4  ;;  %s4098_s29 = int_to_ptr.vmem [resolvable:$true] %s217_s29 }
  0x28   : > { %s227_s9 = sshll.u32 %s3952_s30, 4  ;;  %s5339_s1 = sld [smem:[#allocation28_spill]]  ;;  %s4100_s9 = int_to_ptr.vmem [resolvable:$true] %s227_s9 }
  0x29   : > { %p4110_p6 = pneg %p4094_p0 }
  0x2e   : > { %s3672_s14 = scalar_lea.hbm %s5339_s1, 16 }
  0x2f   : > { %p3673_p3 = scmp.ne.s32.totalorder %s5339_s1, %s3672_s14  ;;  %p3679_p10 = scmp.lt.u32.totalorder %s3672_s14, %s5339_s1 }
  0x31   : > { %p3675_p7 = pnand %p4110_p6, %p3673_p3 }
  0x33   : > { %p3676_p8 = pneg %p3675_p7 }
  0x35   : > { %p3681_p13 = pnand %p3679_p10, %p3676_p8 }
  0x37   : > { %3684 = shalt.err (!%p3681_p13)
}
  0x38   : > { %s3685_s18 = scalar_lea.vmem %s207_s15, 16  ;;  %s3692_s21 = scalar_lea.vmem %s207_s15, 32 }
  0x39   : > { %p3686_p11 = scmp.ne.s32.totalorder %s207_s15, %s3685_s18  ;;  %p3693_p1 = scmp.lt.s32.totalorder %s207_s15, %s207_s15 }
  0x3a   : > { %p3694_p4 = scmp.lt.s32.totalorder %s3692_s21, %s3685_s18 }
  0x3b   : > { %p3688_p5 = pnand %p3686_p11, %p4110_p6 }
  0x3c   : > { %p3695_p12 = por %p3694_p4, %p3693_p1 }
  0x3d   : > { %p3689_p9 = pneg %p3688_p5 }
  0x3f   : > { %p3696_p2 = pnand %p3695_p12, %p3689_p9 }
  0x41   : > { %3699 = shalt.err (!%p3696_p2)
}
  0x42   : > { %3477 = dma.hbm_to_vmem [thread:$0]  (!%p4094_p0), %s5339_s1, 16, %s207_s15, [#allocation6]  }
  0x43   : > { %s5341_s2 = sld [smem:[#allocation29_spill]] }
  0x49   : > { %s3700_s30 = scalar_lea.hbm %s5341_s2, 16 }
  0x4a   : > { %p3701_p5 = scmp.ne.s32.totalorder %s5341_s2, %s3700_s30  ;;  %p3707_p2 = scmp.lt.u32.totalorder %s3700_s30, %s5341_s2 }
  0x4c   : > { %p3703_p11 = pnand %p3701_p5, %p4110_p6 }
  0x4e   : > { %p3704_p1 = pneg %p3703_p11 }
  0x50   : > { %p3709_p4 = pnand %p3707_p2, %p3704_p1 }
  0x52   : > { %3712 = shalt.err (!%p3709_p4)
}
  0x53   : > { %s3713_s15 = scalar_lea.vmem %s4098_s29, 16  ;;  %s3720_s19 = scalar_lea.vmem %s4098_s29, 32 }
  0x54   : > { %p3714_p9 = scmp.ne.s32.totalorder %s4098_s29, %s3713_s15  ;;  %p3721_p7 = scmp.lt.s32.totalorder %s4098_s29, %s4098_s29 }
  0x55   : > { %p3722_p8 = scmp.lt.s32.totalorder %s3720_s19, %s3713_s15 }
  0x56   : > { %p3716_p12 = pnand %p3714_p9, %p4110_p6 }
  0x57   : > { %p3723_p10 = por %p3722_p8, %p3721_p7 }
  0x58   : > { %p3717_p3 = pneg %p3716_p12 }
  0x5a   : > { %p3724_p13 = pnand %p3723_p10, %p3717_p3 }
  0x5c   : > { %3727 = shalt.err (!%p3724_p13)
}
  0x5d   : > { %3480 = dma.hbm_to_vmem [thread:$0]  (!%p4094_p0), %s5341_s2, 16, %s4098_s29, [#allocation6]  }
  0x5e   : > { %s5342_s3 = sld [smem:[#allocation30_spill]] }
  0x64   : > { %s3728_s17 = scalar_lea.hbm %s5342_s3, 9216 }
  0x65   : > { %p3729_p5 = scmp.ne.s32.totalorder %s5342_s3, %s3728_s17  ;;  %p3735_p2 = scmp.lt.u32.totalorder %s3728_s17, %s5342_s3 }
  0x67   : > { %p3731_p11 = pnand %p3729_p5, %p4110_p6 }
  0x69   : > { %p3732_p1 = pneg %p3731_p11 }
  0x6b   : > { %p3737_p4 = pnand %p3735_p2, %p3732_p1 }
  0x6d   : > { %3740 = shalt.err (!%p3737_p4)
}
  0x6e   : > { %s3741_s29 = scalar_lea.vmem %s4100_s9, 9216  ;;  %p3749_p7 = scmp.lt.s32.totalorder %s4100_s9, %s4100_s9 }
  0x6f   : > { %p3742_p9 = scmp.ne.s32.totalorder %s4100_s9, %s3741_s29  ;;  %p3750_p8 = scmp.lt.s32.totalorder %s3741_s29, %s3741_s29 }
  0x71   : > { %p3744_p12 = pnand %p3742_p9, %p4110_p6  ;;  %p3751_p10 = por %p3750_p8, %p3749_p7 }
  0x73   : > { %p3745_p3 = pneg %p3744_p12 }
  0x75   : > { %p3752_p13 = pnand %p3751_p10, %p3745_p3 }
  0x77   : > { %3755 = shalt.err (!%p3752_p13)
}
  0x78   : > { %s3953_s19 = smov 64   ;;  %s3954_s5 = smov 4  }
  0x79   : > { %3483 = dma.hbm_to_vmem [thread:$0]  (!%p4094_p0), %s5342_s3, 9216, %s4100_s9, [#allocation9], %s3953_s19, %s3953_s19, %s3954_s5  }
  0x7a   : > { %s36_s12 = sadd.s32 1, %s3940_s26  ;;  %s39_s14 = sadd.s32 1, %s3944_s27 }
  0x7b   : > { %p37_p6 = scmp.ge.s32.totalorder %s36_s12, 2  ;;  %s48_s17 = sadd.s32 1, %s3928_s23 }
  0x7c   : > { %p55_p5 = scmp.ne.s32.totalorder %s3928_s23, %s3924_s22  ;;  %p56_p11 = scmp.eq.s32.totalorder %s3948_s28, 0 }
  0x7d   : > { %s5488_s12 = smov (%p37_p6, %s36_s12), 0  ;;  %s5490_s14 = smov (!%p37_p6, %s39_s14), %s3944_s27 }
  0x7e   : > { %s44_s30 = ssub.s32 %s3940_s26, %s5488_s12  ;;  %p4184_p1 = por %p56_p11, %p55_p5 }
  0x7f   : > { %p41_p0 = scmp.ge.s32.totalorder %s5490_s14, 2  ;;  %p5344_p2 = scmp.ne.s32.totalorder %s5329_s7, 0 }
  0x80   : > { %s2704_s18 = sshll.u32 %s3944_s27, 1  ;;  %p3498_p9 = scmp.lt.s32.totalorder %s3948_s28, 4 }
  0x81   : > { %p4190_p4 = por %p5344_p2, %p55_p5  ;;  %s5492_s14 = smov (%p41_p0, %s5490_s14), 0 }
  0x82   : > { %s163_s21 = sadd.s32 %s3940_s26, %s2704_s18  ;;  %s241_s15 = sand.u32 1, %s3928_s23  }
  0x83   : > { %s43_s29 = ssub.s32 %s3944_s27, %s5492_s14  ;;  %s2705_s19 = sshll.u32 %s5492_s14, 1 }
  0x84   : > { %s45_s5 = sor.u32 %s44_s30, %s43_s29  ;;  %s165_s7 = sadd.s32 %s2705_s19, %s5488_s12 }
  0x85   : > { %p46_p12 = scmp.eq.s32.totalorder %s45_s5, 0  ;;  %s166_s11 = ssub.s32 %s163_s21, %s165_s7 }
  0x86   : > { %p167_p3 = scmp.eq.s32.totalorder %s166_s11, 0  ;;  %s5346_s1 = sadd.s32 1, %s3916_s20 }
  0x87   : > { %s4205_s10 = scalar_select %p46_p12, %s3928_s23, %s48_s17  }
  0x88   : > { %s4210_s2 = scalar_select %p167_p3, %s3916_s20, %s5346_s1  }
  0x89   : > { %s3452_s3 = smul.u32 240, %s241_s15  ;;  %p4216_p7 = pnand %p3498_p9, %p4184_p1 }
  0x8a   : > { %s3453_s18 = smul.u32 30, %s3940_s26  ;;  %s4229_s16 = scalar_lea.sflag [#allocation3], %s241_s15 }
  0x8b   : > { %s3454_s30 = smul.u32 60, %s3944_s27  ;;  %s245_s29 = scalar_lea.vmem [#allocation2], %s3452_s3 }
  0x8c   : > { %s254_s19 = sshll.u32 %s245_s29, 4  ;;  %p3758_p10 = pneg %p4216_p7  ;;  %s4222_s19 = int_to_ptr.vmem [resolvable:$true] %s254_s19 }
  0x8d   : > { %s251_s21 = sadd.s32 %s3454_s30, %s3453_s18  ;;  %s3761_s30 = scalar_lea.hbm %s5287_s0, 15360 }
  0x8e   : > { %s2711_s17 = sshll.u32 %s251_s21, 7 }
  0x8f   : > { %s4227_s7 = scalar_lea.hbm %s5287_s0, %s2711_s17 }
  0x90   : > { %s3756_s11 = scalar_lea.hbm %s4227_s7, 3840  ;;  %p3762_p5 = scmp.lt.u32.totalorder %s4227_s7, %s5287_s0 }
  0x91   : > { %p3757_p8 = scmp.ne.s32.totalorder %s4227_s7, %s3756_s11  ;;  %p3763_p11 = scmp.lt.u32.totalorder %s3761_s30, %s3756_s11 }
  0x92   : > { %p3765_p0 = scmp.lt.u32.totalorder %s3756_s11, %s4227_s7 }
  0x93   : > { %p3759_p13 = pnand %p3758_p10, %p3757_p8  ;;  %p3764_p1 = por %p3763_p11, %p3762_p5 }
  0x95   : > { %p3760_p6 = pneg %p3759_p13  ;;  %p3766_p2 = por %p3765_p0, %p3764_p1 }
  0x97   : > { %p3767_p9 = pnand %p3766_p2, %p3760_p6 }
  0x99   : > { %3770 = shalt.err (!%p3767_p9)
}
  0x9a   : > { %s3771_s15 = scalar_lea.vmem %s4222_s19, 3840  ;;  %s3955_s17 = smov [#allocation2]  }
  0x9b   : > { %p3772_p12 = scmp.ne.s32.totalorder %s4222_s19, %s3771_s15  ;;  %s3776_s5 = sshll.u32 %s3955_s17, 4  ;;  %s3777_s5 = int_to_ptr.vmem [resolvable:$false] %s3776_s5 }
  0x9c   : > { %s3778_s1 = scalar_lea.vmem %s3777_s5, 7680  ;;  %p3779_p13 = scmp.lt.s32.totalorder %s4222_s19, %s3777_s5 }
  0x9d   : > { %p3774_p3 = pnand %p3772_p12, %p3758_p10  ;;  %p3780_p5 = scmp.lt.s32.totalorder %s3778_s1, %s3771_s15 }
  0x9f   : > { %p3775_p8 = pneg %p3774_p3  ;;  %p3781_p11 = por %p3780_p5, %p3779_p13 }
  0xa1   : > { %p3782_p1 = pnand %p3781_p11, %p3775_p8 }
  0xa3   : > { %3785 = shalt.err (!%p3782_p1)
}
  0xa4   : > { %s3956_s11 = smov 128   ;;  %s3957_s3 = smov 8  }
  0xa5   : > { %3487 = dma.hbm_to_vmem [thread:$0]  (!%p4216_p7), %s4227_s7, 3840, %s4222_s19, %s4229_s16, %s3956_s11, %s3956_s11, %s3957_s3  }
  0xa6   : > { %p5348_p10 = scmp.ne.s32.totalorder %s5337_s13, 0 }
  0xa8   : > { %266 = sbr.rel (%p5348_p10) target bundleno = 647 (0x287), region = 36 }
  0xaf   : > { %s4260_s18 = sand.u32 1, %s3924_s22   ;;  %p5349_p6 = scmp.ne.s32.totalorder %s5330_s8, 0 }
  0xb0   : > { %s3455_s30 = smul.u32 240, %s4260_s18  ;;  %s269_s29 = scalar_lea.sflag [#allocation3], %s4260_s18 }
  0xb2   : > { %s4264_s21 = scalar_lea.vmem [#allocation2], %s3455_s30 }
  0xb3   : > { %3887 = dma.done.wait (%p5349_p6), %s269_s29, 3840  }
  0xb4   : > { %3889 = vsyncadd (%p5349_p6), %s269_s29, 4294963456  ;;  %p5350_p7 = scmp.ne.s32.totalorder %s5328_s6, 0 }
  0xb6   : > { %3891 = dma.done.wait (%p5350_p7), [#allocation6], 32  }
  0xb7   : > { %3893 = vsyncadd (%p5350_p7), [#allocation6], 4294967264 }
  0xb8   : > { %3895 = dma.done.wait (%p5350_p7), [#allocation9], 9216  }
  0xb9   : > { %3897 = vsyncadd (%p5350_p7), [#allocation9], 4294958080  ;;  %v3600_v0 = vld [vmem:[#allocation8 + $0xc0] sm:$0xff]   ;;  %s2720_s4 = sshll.u32 %s3932_s24, 3  ;;  %v3602_v2 = vld [vmem:[#allocation8 + $0xc8] sm:$0xff]   ;;  %v465_v7 = vlaneseq  ;;  %s2716_s6 = sshll.u32 %s4260_s18, 7 }
  0xba   : > { %v3601_v1 = vld [vmem:[#allocation8 + $0x100] sm:$0xff]   ;;  %3020 = vmatprep.subr.bf16.mxu1 %v3600_v0  ;;  %v3603_v3 = vld [vmem:[#allocation8 + $0x108] sm:$0xff]   ;;  %v3604_v4 = vld [vmem:[#allocation8 + $0xd0] sm:$0xff]   ;;  %v4279_v5 = vstv %s2720_s4  ;;  %vm5311_vm14 = vsmask.f32 7424  ;;  %s5115_s8 = scalar_lea.vmem [#allocation10], %s2716_s6 }
  0xbb   : > { %3148 = vmatprep.subr.bf16.mxu0 %v3601_v1  ;;  %3021 = vmatpush3.bf16.msra.mxu1 %v3600_v0  ;;  %v3605_v6 = vld [vmem:[#allocation8 + $0x110] sm:$0xff]   ;;  %v456_v8 = vadd.s32 1, %v4279_v5  ;;  %v3606_v9 = vld [vmem:[#allocation8 + $0xd8] sm:$0xff]   ;;  %v4282_v11 = vshrl.u32 %v465_v7, 7  ;;  %v457_v12 = vadd.s32 2, %v4279_v5  ;;  %v4286_v13 = vadd.s32 3, %v4279_v5 }
  0xbc   : > { %3149 = vmatpush3.bf16.msra.mxu0 %v3601_v1  ;;  %3022 = vmatprep.subr.bf16.mxu1 %v3602_v2  ;;  %v3607_v10 = vld [vmem:[#allocation8 + $0x118] sm:$0xff]   ;;  %v3608_v14 = vld [vmem:[#allocation8 + $0xe0] sm:$0xff]   ;;  %v4289_v15 = vadd.s32 4, %v4279_v5  ;;  %v4292_v17 = vadd.s32 5, %v4279_v5  ;;  %v3610_v20 = vld [vmem:[#allocation8 + $0xe8] sm:$0xff]   ;;  %v4311_v28 = vadd.s32 6, %v4279_v5 }
  0xbd   : > { %3150 = vmatprep.subr.bf16.mxu0 %v3603_v3  ;;  %vm470_vm0 = vcmp.ge.s32.totalorder %v456_v8, 1  ;;  %vm480_vm1 = vcmp.le.s32.totalorder %v456_v8, 16  ;;  %v3609_v16 = vld [vmem:[#allocation8 + $0x120] sm:$0xff]   ;;  %v4295_v18 = vadd.s32 16, %v4282_v11  ;;  %vm5309_vm3 = vcmp.ge.s32.totalorder %v4282_v11, 1  ;;  %v3611_v24 = vld [vmem:[#allocation8 + $0x128] sm:$0xff]  }
  0xbe   : > { %vm4297_vm2 = vmand %vm470_vm0, %vm480_vm1  ;;  %vm471_vm4 = vcmp.ge.s32.totalorder %v457_v12, 1  ;;  %v4302_v21 = vld [vmem:[#allocation5] ss:$0 sm:$0xff]  ;;  %v4304_v22 = vld [vmem:[#allocation7] ss:$0 sm:$0xff]  ;;  %vm481_vm5 = vcmp.le.s32.totalorder %v457_v12, 16 }
  0xbf   : > { %3023 = vmatpush3.bf16.msra.mxu1 %v3602_v2  ;;  %v325_v23 = vld [vmem:[%s4264_s21 + $0x18] sm:$0xff]  ;;  %v326_v25 = vld [vmem:[%s4264_s21 + $0x20] sm:$0xff]  ;;  %v327_v27 = vld [vmem:[%s4264_s21 + $0x28] sm:$0x3]  ;;  %v4314_v29 = vadd.s32 7, %v4279_v5  ;;  %vm5310_vm7 = vcmp.le.s32.totalorder %v4295_v18, 16 }
  0xc0   : > { %3151 = vmatpush3.bf16.msra.mxu0 %v3603_v3  ;;  %3024 = vmatprep.subr.bf16.mxu1 %v3604_v4  ;;  %v361_v26 = vmul.f32 %v4302_v21, %v325_v23  ;;  %v362_v30 = vmul.f32 %v4302_v21, %v326_v25  ;;  %vm4321_vm6 = vmand %vm4297_vm2, %vm5309_vm3  ;;  %v363_v32 = vmul.f32 %v4302_v21, %v327_v27  ;;  %v328_v33 = vld [vmem:[%s4264_s21 + $0x30] sm:$0xff]  ;;  %v329_v34 = vld [vmem:[%s4264_s21 + $0x38] sm:$0xff]  ;;  %vm472_vm8 = vcmp.ge.s32.totalorder %v4286_v13, 1  ;;  %s2875_s13 = sshll.u32 %s3932_s24, 4  ;;  %s2869_s19 = sshll.u32 %s3936_s25, 5 }
  0xc1   : > { %3152 = vmatprep.subr.bf16.mxu0 %v3605_v6  ;;  %v364_v36 = vmul.f32 %v4302_v21, %v328_v33  ;;  %v365_v37 = vmul.f32 %v4302_v21, %v329_v34  ;;  %vm4335_vm9 = vmand %vm471_vm4, %vm481_vm5  ;;  %vm482_vm10 = vcmp.le.s32.totalorder %v4286_v13, 16  ;;  %v3612_v39 = vld [vmem:[#allocation8 + $0xf0] sm:$0xff]   ;;  %v330_v43 = vld [vmem:[%s4264_s21 + $0x40] sm:$0x3]  ;;  %vm473_vm11 = vcmp.ge.s32.totalorder %v4289_v15, 1  ;;  %s2531_s7 = sadd.s32 %s2875_s13, %s2869_s19  ;;  %s2534_s16 = sshll.u32 %s5115_s8, 4  ;;  %s5157_s16 = int_to_ptr.vmem [resolvable:$true] %s2534_s16 }
  0xc2   : > { %v397_v35 = vadd.f32 %v4304_v22, %v361_v26  ;;  %v3613_v40 = vld [vmem:[#allocation8 + $0x130] sm:$0xff]   ;;  %v398_v41 = vadd.f32 %v4304_v22, %v362_v30  ;;  %v399_v42 = vadd.f32 %v4304_v22, %v363_v32  ;;  %vm483_vm12 = vcmp.le.s32.totalorder %v4289_v15, 16  ;;  %vm4349_vm13 = vmand %vm4297_vm2, %vm5310_vm7  ;;  %v3614_v54 = vld [vmem:[#allocation8 + $0xf8] sm:$0xff]   ;;  %s2870_s15 = sshll.u32 %s2531_s7, 7  ;;  %s5466_s1 = sld [smem:[#allocation31_spill]] }
  0xc3   : > { %3025 = vmatpush3.bf16.msra.mxu1 %v3604_v4  ;;  %v400_v46 = vadd.f32 %v4304_v22, %v364_v36  ;;  %v401_v47 = vadd.f32 %v4304_v22, %v365_v37  ;;  %v366_v48 = vmul.f32 %v4302_v21, %v330_v43  ;;  %vm4360_vm15 = vmand %vm4335_vm9, %vm5309_vm3  ;;  %v4365_v52 = vadd.s32 8, %v4279_v5  ;;  %v3615_v62 = vld [vmem:[#allocation8 + $0x138] sm:$0xff]   ;;  %v4410_v8 = vld [vmem:[#allocation8] sm:$0xff]   ;;  %s2513_s3 = scalar_lea.sflag [#allocation4], %s4260_s18  ;;  %s3786_s30 = scalar_lea.vmem %s5157_s16, 2048 }
  0xc4   : > { %3153 = vmatpush3.bf16.msra.mxu0 %v3605_v6  ;;  %3026 = vmatprep.subr.bf16.mxu1 %v3606_v9  ;;  %v427_v44 = vmax.f32 %v397_v35, 0.0  ;;  %v428_v49 = vmax.f32 %v398_v41, 0.0  ;;  %v429_v50 = vmax.f32 %v399_v42, 0.0  ;;  %v4368_v53 = vadd.s32 9, %v4279_v5  ;;  %vm5308_vm0 = vmpackc.low %vm4297_vm2, %vm4321_vm6  ;;  %v331_v4 = vld [vmem:[%s4264_s21 + $0x48] sm:$0xff]  ;;  %v334_v25 = vld [vmem:[%s4264_s21 + $0x60] sm:$0xff]  ;;  %p3787_p0 = scmp.ne.s32.totalorder %s5157_s16, %s3786_s30 }
  0xc5   : > { %3154 = vmatprep.subr.bf16.mxu0 %v3607_v10  ;;  %v430_v56 = vmax.f32 %v400_v46, 0.0  ;;  %v431_v57 = vmax.f32 %v401_v47, 0.0  ;;  %v402_v58 = vadd.f32 %v4304_v22, %v366_v48  ;;  %vm4395_vm1 = vmand %vm4335_vm9, %vm5310_vm7  ;;  %v367_v12 = vmul.f32 %v4302_v21, %v331_v4  ;;  %v335_v26 = vld [vmem:[%s4264_s21 + $0x68] sm:$0xff]  ;;  %s3958_s29 = smov [#allocation10]  }
  0xc6   : > { %v628_v55 = vsel %vm4321_vm6, %v427_v44, 0.0  ;;  %v629_v59 = vsel %vm4297_vm2, %v428_v49, 0.0  ;;  %v4379_v60 = vpack.c.bf16 %v428_v49, %v427_v44  ;;  %v630_v61 = vsel %vm4349_vm13, %v429_v50, 0.0  ;;  %vm4432_vm13 = vmand %vm472_vm8, %vm482_vm10  ;;  %v4447_v42 = vld [vmem:[#allocation8 + $0x8] sm:$0xff]   ;;  %v3636_v19 = vld [vmem:[#allocation8 + $0x190] sm:$0xff]   ;;  %p3788_p2 = pnand %p3787_p0, %p4190_p4 }
  0xc7   : > { %3027 = vmatpush3.bf16.msra.mxu1 %v3606_v9  ;;  %v4383_v63 = vpack.c.bf16 %v629_v59, %v628_v55  ;;  %v4385_v0 = vpack.c.bf16 %v630_v61, %v630_v61  ;;  %v631_v1 = vsel %vm4360_vm15, %v430_v56, 0.0  ;;  %v632_v2 = vsel %vm4335_vm9, %v431_v57, 0.0  ;;  %vm4456_vm8 = vmand %vm473_vm11, %vm483_vm12  ;;  %v336_v50 = vld [vmem:[%s4264_s21 + $0x70] sm:$0x3]  ;;  %v3649_v37 = vld [vmem:[#allocation8 + $0x140] sm:$0xff]  }
  0xc8   : > { %3155 = vmatpush3.bf16.msra.mxu0 %v3607_v10  ;;  %3028 = vmatprep.subr.bf16.mxu1 %v3608_v14  ;;  %v4406_v6 = vpack.c.bf16 %v632_v2, %v631_v1  ;;  %v4408_v7 = vpack.c.bf16 %v431_v57, %v430_v56  ;;  %v432_v9 = vmax.f32 %v402_v58, 0.0  ;;  %v332_v10 = vld [vmem:[%s4264_s21 + $0x50] sm:$0xff]  ;;  %vm474_vm4 = vcmp.ge.s32.totalorder %v4292_v17, 1  ;;  %vm4480_vm11 = vmand %vm4432_vm13, %vm5310_vm7  ;;  %s5164_s11 = scalar_lea.hbm %s5466_s1, %s2870_s15  ;;  %p3789_p9 = pneg %p3788_p2 }
  0xc9   : > { %3156 = vmatprep.subr.bf16.mxu0 %v3609_v16  ;;  %3036 = vmatprep.mubr.msk.bf16.mxu1 %vm5308_vm0, %v4379_v60  ;;  %vm484_vm5 = vcmp.le.s32.totalorder %v4292_v17, 16  ;;  %v1192_v23 = vshll.u32 %v4383_v63, 16  ;;  %v368_v13 = vmul.f32 %v4302_v21, %v332_v10  ;;  %v403_v43 = vadd.f32 %v4304_v22, %v367_v12  ;;  %vm4493_vm12 = vmand %vm4456_vm8, %vm5309_vm3  ;;  %v3619_v2 = vld [vmem:[#allocation8 + $0x1c8] sm:$0xff]   ;;  %v3656_v4 = vld [vmem:[#allocation8 + $0x60] sm:$0xff]  }
  0xca   : > { %v633_v30 = vsel %vm4395_vm1, %v432_v9, 0.0  ;;  %v1202_v32 = vshrl.u32 %v4406_v6, 16  ;;  %v1204_v33 = vshll.u32 %v4406_v6, 16  ;;  %vm4440_vm1 = vmpackc.low %vm4335_vm9, %vm4360_vm15  ;;  %v370_v45 = vmul.f32 %v4302_v21, %v334_v25  ;;  %v3658_v15 = vld [vmem:[#allocation8 + $0x68] sm:$0xff]  }
  0xcb   : > { %3029 = vmatpush3.bf16.msra.mxu1 %v3608_v14  ;;  %v333_v14 = vld [vmem:[%s4264_s21 + $0x58] sm:$0x3]  ;;  %v1194_v35 = vrot.slane %v1192_v23, 1  ;;  %vm485_vm10 = vcmp.le.s32.totalorder %v4311_v28, 16  ;;  %v404_v48 = vadd.f32 %v4304_v22, %v368_v13  ;;  %vm4468_vm15 = vmand %vm4432_vm13, %vm5309_vm3  ;;  %v371_v49 = vmul.f32 %v4302_v21, %v335_v26 }
  0xcc   : > { %3157 = vmatpush3.bf16.msra.mxu0 %v3609_v16  ;;  %3030 = vmatprep.subr.bf16.mxu1 %v3610_v20  ;;  %v1206_v41 = vrot.slane %v1204_v33, 1  ;;  %v369_v44 = vmul.f32 %v4302_v21, %v333_v14  ;;  %v406_v57 = vadd.f32 %v4304_v22, %v370_v45  ;;  %vm4507_vm0 = vmpackc.low %vm4432_vm13, %vm4468_vm15  ;;  %v372_v12 = vmul.f32 %v4302_v21, %v336_v50  ;;  %v337_v14 = vld [vmem:[%s4264_s21 + $0x78] sm:$0xff]  ;;  %v340_v50 = vld [vmem:[%s4264_s21 + $0x90] sm:$0xff] }
  0xcd   : > { %3158 = vmatprep.subr.bf16.mxu0 %v3611_v24  ;;  %v434_v61 = vmax.f32 %v404_v48, 0.0  ;;  %v3620_v26 = vld [vmem:[#allocation8 + $0x10] sm:$0xff]   ;;  %vm486_vm9 = vcmp.le.s32.totalorder %v4314_v29, 16  ;;  %v373_v45 = vmul.f32 %v4302_v21, %v337_v14 }
  0xce   : > { %v1207_v51 = vor.u32 %v1206_v41, %v1202_v32  ;;  %v405_v55 = vadd.f32 %v4304_v22, %v369_v44  ;;  %v436_v10 = vmax.f32 %v406_v57, 0.0  ;;  %v339_v32 = vld [vmem:[%s4264_s21 + $0x88] sm:$0x3]  ;;  %v341_v57 = vld [vmem:[%s4264_s21 + $0x98] sm:$0xff] }
  0xcf   : > { %3031 = vmatpush3.bf16.msra.mxu1 %v3610_v20  ;;  %v1190_v20 = vshrl.u32 %v4383_v63, 16  ;;  %v635_v23 = vsel %vm4432_vm13, %v434_v61, 0.0  ;;  %vm4538_vm13 = vmand %vm4456_vm8, %vm5310_vm7  ;;  %v3621_v44 = vld [vmem:[#allocation8 + $0x1d0] sm:$0xff]   ;;  %v375_v56 = vmul.f32 %v4302_v21, %v339_v32 }
  0xd0   : > { %3159 = vmatpush3.bf16.msra.mxu0 %v3611_v24  ;;  %3032 = vmatprep.subr.bf16.mxu1 %v3612_v39  ;;  %v1197_v24 = vshll.u32 %v4385_v0, 16  ;;  %v435_v9 = vmax.f32 %v405_v55, 0.0  ;;  %v637_v34 = vsel %vm4493_vm12, %v436_v10, 0.0  ;;  %v409_v55 = vadd.f32 %v4304_v22, %v373_v45  ;;  %v342_v45 = vld [vmem:[%s4264_s21 + $0xa0] sm:$0x3] }
  0xd1   : > { %3160 = vmatprep.subr.bf16.mxu0 %v3613_v40  ;;  %v1195_v46 = vor.u32 %v1194_v35, %v1190_v20  ;;  %v408_v35 = vadd.f32 %v4304_v22, %v372_v12 }
  0xd2   : > { %v1199_v36 = vrot.slane %v1197_v24, 1 }
  0xd3   : > { %3033 = vmatpush3.bf16.msra.mxu1 %v3612_v39  ;;  %v4444_v39 = vpack.c.bf16 %v633_v30, %v633_v30  ;;  %v338_v30 = vld [vmem:[%s4264_s21 + $0x80] sm:$0xff]  ;;  %v438_v17 = vmax.f32 %v408_v35, 0.0 }
  0xd4   : > { %3161 = vmatpush3.bf16.msra.mxu0 %v3613_v40  ;;  %3034 = vmatprep.subr.bf16.mxu1 %v3614_v54  ;;  %v3617_v40 = vld [vmem:[#allocation8 + $0x1c0] sm:$0xff]   ;;  %v4486_v58 = vsel %vm5311_vm14, %v1195_v46, %v1199_v36  ;;  %v377_v36 = vmul.f32 %v4302_v21, %v341_v57 }
  0xd5   : > { %3162 = vmatprep.subr.bf16.mxu0 %v3615_v62  ;;  %v1209_v47 = vshll.u32 %v4444_v39, 16  ;;  %5373 = vst [vmem:[#allocation24_spill] sm:$0xff] %v4486_v58  ;;  %3164 = vmatprep.mubr.bf16.mxu0 %v4486_v58  ;;  %v346_v35 = vld [vmem:[%s4264_s21 + $0xc0] sm:$0xff] }
  0xd6   : > { %v3631_v58 = vld [vmem:[#allocation8 + $0x1f8] sm:$0xff]  }
  0xd7   : > { %3035 = vmatpush3.bf16.msra.mxu1 %v3614_v54  ;;  %v433_v54 = vmax.f32 %v403_v43, 0.0  ;;  %v1211_v59 = vrot.slane %v1209_v47, 1 }
  0xd8   : > { %3163 = vmatpush3.bf16.msra.mxu0 %v3615_v62  ;;  %3052 = vmatprep.subr.bf16.mxu1 %v4410_v8  ;;  %v407_v62 = vadd.f32 %v4304_v22, %v371_v49  ;;  %v4572_v49 = vld [vmem:[#allocation8 + $0x18] sm:$0xff]  }
  0xd9   : > { %3180 = vmatprep.subr.bf16.mxu0 %v3617_v40  ;;  %v634_v3 = vsel %vm4468_vm15, %v433_v54, 0.0  ;;  %v4514_v20 = vsel %vm5311_vm14, %v1207_v51, %v1211_v59  ;;  %v4519_v24 = vpack.c.bf16 %v434_v61, %v433_v54  ;;  %vm4568_vm15 = vmpackc.low %vm4456_vm8, %vm4493_vm12  ;;  %v374_v54 = vmul.f32 %v4302_v21, %v338_v30 }
  0xda   : > { %3037 = vmatmul.mubr.msk.bf16.vlgmr.msra.gmra.mrb[0].mxu1 %vm4440_vm1, %v4408_v7  ;;  %v437_v25 = vmax.f32 %v407_v62, 0.0  ;;  %v4527_v33 = vpack.c.bf16 %v635_v23, %v634_v3  ;;  %v639_v59 = vsel %vm4538_vm13, %v438_v17, 0.0  ;;  %vm5386_vm12 = vcmp.ge.s32.totalorder %v4311_v28, 1  ;;  %v3623_v23 = vld [vmem:[#allocation8 + $0x1d8] sm:$0xff]  }
  0xdb   : > { %3053 = vmatpush3.bf16.msra.mxu1 %v4410_v8  ;;  %3165 = vmatmul.mubr.bf16.vlgmr.msra.gmra.mrb[0].mxu0 %v4514_v20  ;;  %v636_v8 = vsel %vm4480_vm11, %v435_v9, 0.0  ;;  %vm4556_vm11 = vmand %vm474_vm4, %vm484_vm5  ;;  %v4595_v3 = vpack.c.bf16 %v639_v59, %v639_v59  ;;  %v410_v9 = vadd.f32 %v4304_v22, %v374_v54  ;;  %v411_v28 = vadd.f32 %v4304_v22, %v375_v56  ;;  %v343_v54 = vld [vmem:[%s4264_s21 + $0xa8] sm:$0xff]  ;;  %v344_v62 = vld [vmem:[%s4264_s21 + $0xb0] sm:$0xff] }
  0xdc   : > { %3054 = vmatprep.subr.bf16.mxu1 %v4447_v42  ;;  %3181 = vmatpush3.bf16.msra.mxu0 %v3617_v40  ;;  %v4545_v13 = vpack.c.bf16 %v636_v8, %v636_v8  ;;  %v638_v41 = vsel %vm4456_vm8, %v437_v25, 0.0  ;;  %v4549_v43 = vpack.c.bf16 %v437_v25, %v436_v10  ;;  %v1214_v46 = vshrl.u32 %v4527_v33, 16  ;;  %vm4591_vm8 = vmand %vm4556_vm11, %vm5309_vm3  ;;  %v3660_v25 = vld [vmem:[#allocation8 + $0x70] sm:$0xff]  }
  0xdd   : > { %3040 = vmatprep.mubr.msk.bf16.mxu1 %vm4507_vm0, %v4519_v24  ;;  %3182 = vmatprep.subr.bf16.mxu0 %v3619_v2  ;;  %v1216_v47 = vshll.u32 %v4527_v33, 16  ;;  %v4562_v48 = vpack.c.bf16 %v638_v41, %v637_v34  ;;  %v439_v10 = vmax.f32 %v409_v55, 0.0  ;;  %vm4602_vm13 = vmand %vm5386_vm12, %vm485_vm10  ;;  %v376_v30 = vmul.f32 %v4302_v21, %v340_v50  ;;  %v4631_v41 = vld [vmem:[#allocation8 + $0x20] sm:$0xff]  }
  0xde   : > { %v1221_v51 = vshll.u32 %v4545_v13, 16  ;;  %vm4613_vm4 = vmpackc.low %vm4556_vm11, %vm4591_vm8  ;;  %v1233_v32 = vshll.u32 %v4595_v3, 16  ;;  %v440_v8 = vmax.f32 %v410_v9, 0.0  ;;  %v5395_v59 = vmov 0  ;;  %v345_v9 = vld [vmem:[%s4264_s21 + $0xb8] sm:$0x3] }
  0xdf   : > { %3055 = vmatpush3.bf16.msra.mxu1 %v4447_v42  ;;  %v1218_v38 = vrot.slane %v1216_v47, 1  ;;  %v1226_v42 = vshrl.u32 %v4562_v48, 16  ;;  %v1228_v61 = vshll.u32 %v4562_v48, 16  ;;  %v640_v34 = vsel %vm4591_vm8, %v439_v10, 0.0  ;;  %vm4626_vm10 = vmand %vm4556_vm11, %vm5310_vm7 }
  0xe0   : > { %3056 = vmatprep.subr.bf16.mxu1 %v3620_v26  ;;  %3183 = vmatpush3.bf16.msra.mxu0 %v3619_v2  ;;  %v1223_v1 = vrot.slane %v1221_v51, 1  ;;  %v441_v47 = vmax.f32 %v411_v28, 0.0  ;;  %v412_v17 = vadd.f32 %v4304_v22, %v376_v30  ;;  %vm4643_vm8 = vmand %vm4602_vm13, %vm5309_vm3  ;;  %v4647_v51 = vld [vmem:[#allocation8 + $0x1e0] sm:$0xff]   ;;  %v1235_v55 = vrot.slane %v1233_v32, 1  ;;  %v3626_v28 = vld [vmem:[#allocation8 + $0x28] sm:$0xff]  }
  0xe1   : > { %v1219_v14 = vor.u32 %v1218_v38, %v1214_v46  ;;  %v1230_v2 = vrot.slane %v1228_v61, 1  ;;  %3184 = vmatprep.subr.bf16.mxu0 %v3621_v44  ;;  %v641_v56 = vsel %vm4556_vm11, %v440_v8, 0.0  ;;  %v4655_v57 = vpack.c.bf16 %v440_v8, %v439_v10  ;;  %vm4662_vm12 = vmpackc.low %vm4602_vm13, %vm4643_vm8 }
  0xe2   : > { %3041 = vmatmul.mubr.msk.bf16.gmra.mrb[4].mxu1 %vm4568_vm15, %v4549_v43  ;;  %v413_v38 = vadd.f32 %v4304_v22, %v377_v36  ;;  %v5396_v59 = vsel %vm4662_vm12, 4294967295, %v5395_v59  ;;  %v642_v40 = vsel %vm4626_vm10, %v441_v47, 0.0  ;;  %v378_v61 = vmul.f32 %v4302_v21, %v342_v45  ;;  %v3627_v47 = vld [vmem:[#allocation8 + $0x1e8] sm:$0xff]  }
  0xe3   : > { %3057 = vmatpush3.bf16.msra.mxu1 %v3620_v26  ;;  %v4635_v46 = vsel %vm5311_vm14, %v1219_v14, %v1223_v1  ;;  %v1231_v26 = vor.u32 %v1230_v2, %v1226_v42  ;;  %v442_v42 = vmax.f32 %v412_v17, 0.0  ;;  %vm5397_vm11 = vcmp.ge.s32.totalorder %v4314_v29, 1  ;;  %3044 = vmatprep.mubr.msk.bf16.mxu1 %vm4613_vm4, %v4655_v57 }
  0xe4   : > { %3058 = vmatprep.subr.bf16.mxu1 %v4572_v49  ;;  %3168 = vmatprep.mubr.bf16.mxu0 %v4635_v46  ;;  %vm4678_vm7 = vmand %vm5397_vm11, %vm486_vm9  ;;  %v4690_v14 = vpack.c.bf16 %v642_v40, %v642_v40  ;;  %v443_v2 = vmax.f32 %v413_v38, 0.0  ;;  %v379_v29 = vmul.f32 %v4302_v21, %v343_v54  ;;  %vm5400_vm9 = vcmp.le.s32.totalorder %v4295_v18, 16 }
  0xe5   : > { %3185 = vmatpush3.bf16.msra.mxu0 %v3621_v44  ;;  %v4668_v44 = vpack.c.bf16 %v641_v56, %v640_v34  ;;  %v4684_v10 = vsel %vm5311_vm14, %v1231_v26, %v1235_v55  ;;  %v643_v8 = vsel %vm4643_vm8, %v442_v42, 0.0  ;;  %vm4704_vm10 = vmand %vm4602_vm13, %vm5400_vm9  ;;  %v380_v17 = vmul.f32 %v4302_v21, %v344_v62 }
  0xe6   : > { %3186 = vmatprep.subr.bf16.mxu0 %v3623_v23  ;;  %3169 = vmatmul.mubr.bf16.gmra.mrb[4].mxu0 %v4684_v10  ;;  %v1245_v36 = vshll.u32 %v4690_v14, 16  ;;  %v644_v45 = vsel %vm4602_vm13, %v443_v2, 0.0  ;;  %v4712_v26 = vpack.c.bf16 %v443_v2, %v442_v42  ;;  %vm5403_vm8 = vcmp.ge.s32.totalorder %v4282_v11, 1 }
  0xe7   : > { %3059 = vmatpush3.bf16.msra.mxu1 %v4572_v49  ;;  %v1238_v30 = vshrl.u32 %v4668_v44, 16  ;;  %v1240_v32 = vshll.u32 %v4668_v44, 16  ;;  %v414_v49 = vadd.f32 %v4304_v22, %v378_v61  ;;  %vm4719_vm11 = vmand %vm4678_vm7, %vm5403_vm8  ;;  %v4723_v54 = vpack.c.bf16 %v644_v45, %v643_v8  ;;  %v347_v61 = vld [vmem:[%s4264_s21 + $0xc8] sm:$0xff] }
  0xe8   : > { %3060 = vmatprep.subr.bf16.mxu1 %v4631_v41  ;;  %v415_v12 = vadd.f32 %v4304_v22, %v379_v29  ;;  %vm5406_vm13 = vcmp.le.s32.totalorder %v4365_v52, 16  ;;  %vm5407_vm9 = vcmp.ge.s32.totalorder %v4365_v52, 1  ;;  %v5408_v56 = vmov 0  ;;  %vm4743_vm8 = vmpackc.low %vm4678_vm7, %vm4719_vm11 }
  0xe9   : > { %3187 = vmatpush3.bf16.msra.mxu0 %v3623_v23  ;;  %v1242_v23 = vrot.slane %v1240_v32, 1  ;;  %v444_v55 = vmax.f32 %v414_v49, 0.0  ;;  %vm4731_vm5 = vmand %vm5407_vm9, %vm5406_vm13  ;;  %v1247_v38 = vrot.slane %v1245_v36, 1  ;;  %v416_v40 = vadd.f32 %v4304_v22, %v380_v17  ;;  %v3628_v49 = vld [vmem:[#allocation8 + $0x30] sm:$0xff]  }
  0xea   : > { %3188 = vmatprep.subr.bf16.mxu0 %v4647_v51  ;;  %v5409_v56 = vsel %vm4731_vm5, 4294967295, %v5408_v56  ;;  %3045 = vmatmul.mubr.msk.bf16.gmra.mrb[8].mxu1 %vm4662_vm12, %v4712_v26  ;;  %v5411_v42 = vmov 0  ;;  %v381_v52 = vmul.f32 %v4302_v21, %v345_v9  ;;  %v382_v62 = vmul.f32 %v4302_v21, %v346_v35 }
  0xeb   : > { %5410 = vst [vmem:[#allocation25_spill] sm:$0xff] %v5409_v56  ;;  %v5412_v42 = vsel %vm4743_vm8, 4294967295, %v5411_v42  ;;  %v1243_v2 = vor.u32 %v1242_v23, %v1238_v30  ;;  %v645_v29 = vsel %vm4704_vm10, %v444_v55, 0.0  ;;  %v1250_v32 = vshrl.u32 %v4723_v54, 16  ;;  %3061 = vmatpush3.bf16.msra.mxu1 %v4631_v41  ;;  %v348_v30 = vld [vmem:[%s4264_s21 + $0xd0] sm:$0x3] }
  0xec   : > { %v1252_v8 = vshll.u32 %v4723_v54, 16  ;;  %vm5413_vm9 = vcmp.le.s32.totalorder %v4295_v18, 16  ;;  %v4764_v35 = vpack.c.bf16 %v645_v29, %v645_v29  ;;  %3062 = vmatprep.subr.bf16.mxu1 %v3626_v28  ;;  %v445_v34 = vmax.f32 %v415_v12, 0.0  ;;  %v3629_v12 = vld [vmem:[#allocation8 + $0x1f0] sm:$0xff]  }
  0xed   : > { %vm4759_vm3 = vmand %vm4678_vm7, %vm5413_vm9  ;;  %3189 = vmatpush3.bf16.msra.mxu0 %v4647_v51  ;;  %v446_v36 = vmax.f32 %v416_v40, 0.0  ;;  %v417_v41 = vadd.f32 %v4304_v22, %v381_v52  ;;  %vm5416_vm10 = vcmp.ge.s32.totalorder %v4282_v11, 1  ;;  %v5417_v45 = vmov 0  ;;  %v322_v40 = vld [vmem:[%s4264_s21] sm:$0xff] }
  0xee   : > { %vm4772_vm9 = vmand %vm4731_vm5, %vm5416_vm10  ;;  %v4777_v17 = vsel %vm5311_vm14, %v1243_v2, %v1247_v38  ;;  %v1254_v23 = vrot.slane %v1252_v8, 1  ;;  %3190 = vmatprep.subr.bf16.mxu0 %v3627_v47  ;;  %v383_v51 = vmul.f32 %v4302_v21, %v347_v61  ;;  %v418_v55 = vadd.f32 %v4304_v22, %v382_v62  ;;  %v3630_v2 = vld [vmem:[#allocation8 + $0x38] sm:$0xff]  }
  0xef   : > { %v5418_v45 = vsel %vm4772_vm9, 4294967295, %v5417_v45  ;;  %3172 = vmatprep.mubr.bf16.mxu0 %v4777_v17  ;;  %v1257_v52 = vshll.u32 %v4764_v35, 16  ;;  %v646_v29 = vsel %vm4719_vm11, %v445_v34, 0.0  ;;  %v647_v16 = vsel %vm4678_vm7, %v446_v36, 0.0  ;;  %v323_v8 = vld [vmem:[%s4264_s21 + $0x8] sm:$0xff]  ;;  %3063 = vmatpush3.bf16.msra.mxu1 %v3626_v28 }
  0xf0   : > { %5419 = vst [vmem:[#allocation26_spill] sm:$0xff] %v5418_v45  ;;  %v4788_v38 = vpack.c.bf16 %v446_v36, %v445_v34  ;;  %vm5420_vm10 = vcmp.le.s32.totalorder %v4368_v53, 16  ;;  %vm5421_vm13 = vcmp.ge.s32.totalorder %v4368_v53, 1  ;;  %v1255_v62 = vor.u32 %v1254_v23, %v1250_v32  ;;  %3064 = vmatprep.subr.bf16.mxu1 %v3628_v49  ;;  %v351_v45 = vld [vmem:[%s4264_s21 + $0xe8] sm:$0x3]  ;;  %v3663_v61 = vld [vmem:[#allocation8 + $0x178] sm:$0xff]  }
  0xf1   : > { %vm4795_vm14 = vmand %vm5421_vm13, %vm5420_vm10  ;;  %v4799_v27 = vpack.c.bf16 %v647_v16, %v646_v29  ;;  %v447_v50 = vmax.f32 %v417_v41, 0.0  ;;  %v419_v1 = vadd.f32 %v4304_v22, %v383_v51  ;;  %vm5424_vm7 = vcmp.le.s32.totalorder %v4279_v5, 16  ;;  %3191 = vmatpush3.bf16.msra.mxu0 %v3627_v47 }
  0xf2   : > { %vm5425_vm11 = vcmp.ge.s32.totalorder %v4279_v5, 1  ;;  %v1259_v53 = vrot.slane %v1257_v52, 1  ;;  %3048 = vmatprep.mubr.msk.bf16.mxu1 %vm4743_vm8, %v4788_v38  ;;  %v448_v16 = vmax.f32 %v418_v55, 0.0  ;;  %v384_v28 = vmul.f32 %v4302_v21, %v348_v30  ;;  %3192 = vmatprep.subr.bf16.mxu0 %v3629_v12  ;;  %vm5441_vm8 = vmpackc.low %vm4731_vm5, %vm4772_vm9  ;;  %v3640_v30 = vld [vmem:[#allocation8 + $0x1a0] sm:$0xff]   ;;  %v3665_v5 = vld [vmem:[#allocation8 + $0x208] sm:$0xff]  }
  0xf3   : > { %vm4806_vm12 = vmand %vm5425_vm11, %vm5424_vm7  ;;  %v358_v32 = vmul.f32 %v4302_v21, %v322_v40  ;;  %vm5428_vm13 = vcmp.ge.s32.totalorder %v4282_v11, 1  ;;  %v648_v47 = vsel %vm4759_vm3, %v447_v50, 0.0  ;;  %v1262_v36 = vshrl.u32 %v4799_v27, 16  ;;  %3065 = vmatpush3.bf16.msra.mxu1 %v3628_v49 }
  0xf4   : > { %vm4819_vm10 = vmand %vm4795_vm14, %vm5428_vm13  ;;  %v1264_v41 = vshll.u32 %v4799_v27, 16  ;;  %v449_v23 = vmax.f32 %v419_v1, 0.0  ;;  %vm5431_vm7 = vcmp.le.s32.totalorder %v4295_v18, 16  ;;  %vm5434_vm13 = vsmask.f32 7424  ;;  %3066 = vmatprep.subr.bf16.mxu1 %v3630_v2 }
  0xf5   : > { %vm4831_vm11 = vmand %vm4795_vm14, %vm5431_vm7  ;;  %v4836_v51 = vsel %vm5434_vm13, %v1255_v62, %v1259_v53  ;;  %v4838_v9 = vpack.c.bf16 %v648_v47, %v648_v47  ;;  %v649_v55 = vsel %vm4772_vm9, %v448_v16, 0.0  ;;  %v420_v40 = vadd.f32 %v4304_v22, %v384_v28  ;;  %v3632_v53 = vld [vmem:[#allocation8 + $0x180] sm:$0xff]   ;;  %3193 = vmatpush3.bf16.msra.mxu0 %v3629_v12 }
  0xf6   : > { %3173 = vmatmul.mubr.bf16.gmra.mrb[8].mxu0 %v4836_v51  ;;  %v1266_v52 = vrot.slane %v1264_v41, 1  ;;  %v650_v29 = vsel %vm4731_vm5, %v449_v23, 0.0  ;;  %v4850_v62 = vpack.c.bf16 %v449_v23, %v448_v16  ;;  %vm4856_vm13 = vmand %vm4731_vm5, %vm5431_vm7  ;;  %v359_v1 = vmul.f32 %v4302_v21, %v323_v8  ;;  %3194 = vmatprep.subr.bf16.mxu0 %v3631_v58  ;;  %v4884_v8 = vld [vmem:[#allocation8 + $0x80] sm:$0xff]  }
  0xf7   : > { %v1269_v28 = vshll.u32 %v4838_v9, 16  ;;  %v4862_v47 = vpack.c.bf16 %v650_v29, %v649_v55  ;;  %v450_v41 = vmax.f32 %v420_v40, 0.0  ;;  %v4865_v16 = vadd.f32 %v4304_v22, %v358_v32  ;;  %3067 = vmatpush3.bf16.msra.mxu1 %v3630_v2 }
  0xf8   : > { %5435 = vst [vmem:[#allocation27_spill] sm:$0xff] %v4850_v62  ;;  %vm5438_vm3 = vcmp.ge.s32.totalorder %v4282_v11, 1  ;;  %v1267_v49 = vor.u32 %v1266_v52, %v1262_v36  ;;  %3049 = vmatmul.mubr.msk.bf16.gmra.mrb[12].mxu1 %vm5441_vm8, %v4850_v62  ;;  %v4882_v12 = vadd.f32 %v4304_v22, %v359_v1  ;;  %v5442_v11 = vrot.slane %v4385_v0, 1  ;;  %3084 = vmatprep.subr.bf16.mxu1 %v3632_v53  ;;  %vm5446_vm8 = vmpackc.low %vm4297_vm2, %vm4321_vm6 }
  0xf9   : > { %vm4871_vm7 = vmand %vm4806_vm12, %vm5438_vm3  ;;  %v5443_v32 = vrot.slane %v4383_v63, 1  ;;  %vm5444_vm3 = vcmask 1046528   ;;  %v1271_v36 = vrot.slane %v1269_v28, 1  ;;  %v651_v40 = vsel %vm4856_vm13, %v450_v41, 0.0  ;;  %3195 = vmatpush3.bf16.msra.mxu0 %v3631_v58 }
  0xfa   : > { %v1460_v52 = vshrl.u32 %v4862_v47, 16  ;;  %v1462_v29 = vshll.u32 %v4862_v47, 16  ;;  %v4901_v1 = vpack.c.bf16 %v651_v40, %v651_v40  ;;  %v424_v63 = vmax.f32 %v4865_v16, 0.0  ;;  %vm2761_vm13 = vmpackc.low %vm4806_vm12, %vm4871_vm7  ;;  %3212 = vmatprep.subr.bf16.mxu0 %v4884_v8 }
  0xfb   : > { %v4891_v55 = vsel %vm5444_vm3, %v5443_v32, %v5442_v11  ;;  %v425_v0 = vmax.f32 %v4882_v12, 0.0  ;;  %vm5445_vm3 = vsmask.f32 7424  ;;  %v3634_v32 = vld [vmem:[#allocation8 + $0x188] sm:$0xff]   ;;  %v1865_v40 = vrot.slane %v4444_v39, 1  ;;  %v3644_v12 = vld [vmem:[#allocation8 + $0x1b0] sm:$0xff]  }
  0xfc   : > { %v4906_v50 = vsel %vm5445_vm3, %v1267_v49, %v1271_v36  ;;  %v1464_v28 = vrot.slane %v1462_v29, 1  ;;  %v1467_v2 = vshll.u32 %v4901_v1, 16  ;;  %v1864_v49 = vrot.slane %v4406_v6, 1  ;;  %v349_v36 = vld [vmem:[%s4264_s21 + $0xd8] sm:$0xff]  ;;  %v350_v29 = vld [vmem:[%s4264_s21 + $0xe0] sm:$0xff] }
  0xfd   : > { %3176 = vmatprep.mubr.bf16.mxu0 %v4906_v50  ;;  %v2762_v41 = vpack.c.bf16 %v425_v0, %v424_v63  ;;  %v385_v56 = vmul.f32 %v4302_v21, %v349_v36  ;;  %v386_v6 = vmul.f32 %v4302_v21, %v350_v29  ;;  %vm5449_vm6 = vcmp.le.s32.totalorder %v4295_v18, 16 }
  0xfe   : > { %v1465_v58 = vor.u32 %v1464_v28, %v1460_v52  ;;  %v1469_v11 = vrot.slane %v1467_v2, 1  ;;  %v387_v52 = vmul.f32 %v4302_v21, %v351_v45  ;;  %v1867_v2 = vrot.slane %v4527_v33, 1 }
  0xff   : > { %3068 = vmatprep.mubr.msk.bf16.mxu1 %vm2761_vm13, %v2762_v41  ;;  %vm5447_vm13 = vcmask 1046528   ;;  %v421_v28 = vadd.f32 %v4304_v22, %v385_v56  ;;  %v422_v31 = vadd.f32 %v4304_v22, %v386_v6  ;;  %v324_v41 = vld [vmem:[%s4264_s21 + $0x10] sm:$0x3]  ;;  %v1868_v45 = vrot.slane %v4545_v13, 1  ;;  %s3790_s21 = sshll.u32 %s3958_s29, 4  ;;  %s3791_s21 = int_to_ptr.vmem [resolvable:$false] %s3790_s21 }
 0x100   : > { %v4926_v62 = vsel %vm5445_vm3, %v1465_v58, %v1469_v11  ;;  %3069 = vmatmul.mubr.msk.bf16.vlgmr.msra.gmra.mrb[0].mxu1 %vm5446_vm8, %v4379_v60  ;;  %v4937_v39 = vsel %vm5447_vm13, %v1864_v49, %v1865_v40  ;;  %v423_v60 = vadd.f32 %v4304_v22, %v387_v52  ;;  %v360_v56 = vmul.f32 %v4302_v21, %v324_v41  ;;  %vm5448_vm2 = vmmov %vm5447_vm13  ;;  %v3635_v40 = vld [vmem:[#allocation8 + $0x88] sm:$0xff]   ;;  %s3792_s4 = scalar_lea.vmem %s3791_s21, 4096  ;;  %p3793_p12 = scmp.lt.s32.totalorder %s5157_s16, %s3791_s21 }
 0x101   : > { %3177 = vmatmul.mubr.bf16.gmra.mrb[12].mxu0 %v4926_v62  ;;  %3085 = vmatpush3.bf16.msra.mxu1 %v3632_v53  ;;  %v451_v53 = vmax.f32 %v421_v28, 0.0  ;;  %v452_v49 = vmax.f32 %v422_v31, 0.0  ;;  %v4952_v58 = vsel %vm5448_vm2, %v1867_v2, %v1868_v45  ;;  %vm537_vm8 = vmand %vm4806_vm12, %vm5449_vm6  ;;  %v1879_v34 = vrot.slane %v4799_v27, 1  ;;  %p3794_p3 = scmp.lt.s32.totalorder %s3792_s4, %s3786_s30 }
 0x102   : > { %3196 = vmatprep.mubr.bf16.mxu0 %v4514_v20  ;;  %3086 = vmatprep.subr.bf16.mxu1 %v3634_v32  ;;  %v453_v33 = vmax.f32 %v423_v60, 0.0  ;;  %v396_v36 = vadd.f32 %v4304_v22, %v360_v56  ;;  %v3637_v60 = vld [vmem:[#allocation8 + $0x90] sm:$0xff]   ;;  %v3639_v56 = vld [vmem:[#allocation8 + $0x98] sm:$0xff]   ;;  %vm5454_vm13 = vmmov %vm5448_vm2  ;;  %vm5456_vm6 = vnez %v5412_v42 }
 0x103   : > { %3072 = vmatprep.mubr.msk.bf16.mxu1 %vm4440_vm1, %v4408_v7  ;;  %v652_v11 = vsel %vm4819_vm10, %v451_v53, 0.0  ;;  %v653_v13 = vsel %vm4795_vm14, %v452_v49, 0.0  ;;  %v4965_v21 = vpack.c.bf16 %v452_v49, %v451_v53  ;;  %v1870_v53 = vrot.slane %v4562_v48, 1  ;;  %v3642_v49 = vld [vmem:[#allocation8 + $0x1a8] sm:$0xff]   ;;  %p3795_p8 = por %p3794_p3, %p3793_p12 }
 0x104   : > { %v654_v29 = vsel %vm4831_vm11, %v453_v33, 0.0  ;;  %v4967_v6 = vpack.c.bf16 %v653_v13, %v652_v11  ;;  %v426_v22 = vmax.f32 %v396_v36, 0.0  ;;  %v1873_v11 = vrot.slane %v4668_v44, 1  ;;  %vm5450_vm11 = vmmov %vm5448_vm2  ;;  %v3641_v13 = vld [vmem:[#allocation8 + $0xa0] sm:$0xff]   ;;  %v3659_v42 = vld [vmem:[#allocation8 + $0x168] sm:$0xff]  }
 0x105   : > { %3087 = vmatpush3.bf16.msra.mxu1 %v3634_v32  ;;  %v3638_v32 = vld [vmem:[#allocation8 + $0x198] sm:$0xff]   ;;  %v4969_v52 = vpack.c.bf16 %v654_v29, %v654_v29  ;;  %v1874_v36 = vrot.slane %v4690_v14, 1  ;;  %v1876_v44 = vrot.slane %v4723_v54, 1  ;;  %v1877_v14 = vrot.slane %v4764_v35, 1  ;;  %p3796_p13 = pnand %p3795_p8, %p3789_p9 }
 0x106   : > { %3088 = vmatprep.subr.bf16.mxu1 %v3636_v19  ;;  %v1651_v18 = vshrl.u32 %v4967_v6, 16  ;;  %v1653_v28 = vshll.u32 %v4967_v6, 16  ;;  %v627_v31 = vsel %vm537_vm8, %v426_v22, 0.0  ;;  %v3646_v22 = vld [vmem:[#allocation8 + $0x1b8] sm:$0xff]  }
 0x107   : > { %v1658_v2 = vshll.u32 %v4969_v52, 16 }
 0x108   : > { %3073 = vmatmul.mubr.msk.bf16.gmra.mrb[4].mxu1 %vm4507_vm0, %v4519_v24  ;;  %v1655_v41 = vrot.slane %v1653_v28, 1 }
 0x109   : > { %3197 = vmatmul.mubr.bf16.vlgmr.msra.gmra.mrb[0].mxu0 %v4635_v46  ;;  %3089 = vmatpush3.bf16.msra.mxu1 %v3636_v19  ;;  %v1660_v45 = vrot.slane %v1658_v2, 1  ;;  %v1871_v19 = vrot.slane %v4595_v3, 1  ;;  %v626_v3 = vsel %vm4806_vm12, %v425_v0, 0.0  ;;  %vm5453_vm12 = vmmov %vm5448_vm2 }
 0x10a   : > { %3213 = vmatpush3.bf16.msra.mxu0 %v4884_v8  ;;  %3200 = vmatprep.mubr.bf16.mxu0 %v4684_v10  ;;  %v625_v8 = vsel %vm4871_vm7, %v424_v63, 0.0  ;;  %v1656_v33 = vor.u32 %v1655_v41, %v1651_v18  ;;  %vm5451_vm7 = vmmov %vm5445_vm3  ;;  %v1880_v63 = vrot.slane %v4838_v9, 1  ;;  %v5012_v54 = vsel %vm5453_vm12, %v1876_v44, %v1877_v14  ;;  %v3667_v44 = vld [vmem:[#allocation8 + $0x218] sm:$0xff]   ;;  %v3668_v14 = vld [vmem:[#allocation8 + $0x220] sm:$0xff]  }
 0x10b   : > { %3214 = vmatprep.subr.bf16.mxu0 %v3635_v40  ;;  %3090 = vmatprep.subr.bf16.mxu1 %v3638_v32  ;;  %v4992_v48 = vsel %vm5450_vm11, %v1870_v53, %v1871_v19  ;;  %vm5452_vm3 = vmmov %vm5448_vm2  ;;  %v655_v0 = vpack.c.bf16 %v626_v3, %v625_v8  ;;  %vm5455_vm2 = vnez %v5396_v59  ;;  %v2071_v41 = vrot.slane %v4901_v1, 1  ;;  %v3647_v1 = vld [vmem:[#allocation8 + $0xb8] sm:$0xff]   ;;  %v3661_v3 = vld [vmem:[#allocation8 + $0x170] sm:$0xff]  }
 0x10c   : > { %3076 = vmatprep.mubr.msk.bf16.mxu1 %vm4568_vm15, %v4549_v43  ;;  %v1661_v16 = vsel %vm5451_vm7, %v1656_v33, %v1660_v45  ;;  %v5000_v23 = vsel %vm5452_vm3, %v1873_v11, %v1874_v36  ;;  %v5015_v35 = vsel %vm5454_vm13, %v1879_v34, %v1880_v63  ;;  %v3648_v45 = vld [vmem:[#allocation8 + $0x40] sm:$0xff]   ;;  %vm5457_vm8 = vmmov %vm5451_vm7  ;;  %v2254_v19 = vrot.slane %v4967_v6, 1  ;;  %v3654_v33 = vld [vmem:[#allocation8 + $0x58] sm:$0xff]  }
 0x10d   : > { %3091 = vmatpush3.bf16.msra.mxu1 %v3638_v32  ;;  %v1178_v27 = vshrl.u32 %v655_v0, 16  ;;  %v1180_v9 = vshll.u32 %v655_v0, 16  ;;  %v3643_v32 = vld [vmem:[#allocation8 + $0xa8] sm:$0xff]   ;;  %v1858_v28 = vrot.slane %v655_v0, 1  ;;  %vm5458_vm11 = vmmov %vm5452_vm3  ;;  %v5460_v59 = vld [vmem:[#allocation27_spill] sm:$0xff] }
 0x10e   : > { %3215 = vmatpush3.bf16.msra.mxu0 %v3635_v40  ;;  %3092 = vmatprep.subr.bf16.mxu1 %v3640_v30  ;;  %v656_v40 = vpack.c.bf16 %v627_v31, %v627_v31  ;;  %v2070_v31 = vrot.slane %v4862_v47, 1  ;;  %vm5459_vm7 = vmmov %vm5452_vm3  ;;  %v3664_v36 = vld [vmem:[#allocation8 + $0x200] sm:$0xff]  }
 0x10f   : > { %3216 = vmatprep.subr.bf16.mxu0 %v3637_v60 }
 0x110   : > { %3077 = vmatmul.mubr.msk.bf16.gmra.mrb[8].mxu1 %vm4613_vm4, %v4655_v57  ;;  %v1185_v29 = vshll.u32 %v656_v40, 16  ;;  %v1859_v8 = vrot.slane %v656_v40, 1  ;;  %v5032_v47 = vsel %vm5458_vm11, %v2070_v31, %v2071_v41 }
 0x111   : > { %3201 = vmatmul.mubr.bf16.gmra.mrb[4].mxu0 %v4777_v17  ;;  %3093 = vmatpush3.bf16.msra.mxu1 %v3640_v30  ;;  %v1182_v30 = vrot.slane %v1180_v9, 1 }
 0x112   : > { %3217 = vmatpush3.bf16.msra.mxu0 %v3637_v60  ;;  %3204 = vmatprep.mubr.bf16.mxu0 %v4836_v51  ;;  %v1187_v18 = vrot.slane %v1185_v29, 1  ;;  %v3645_v60 = vld [vmem:[#allocation8 + $0xb0] sm:$0xff]   ;;  %v1860_v6 = vsel %vm5452_vm3, %v1858_v28, %v1859_v8 }
 0x113   : > { %3218 = vmatprep.subr.bf16.mxu0 %v3639_v56  ;;  %3094 = vmatprep.subr.bf16.mxu1 %v3642_v49  ;;  %v1183_v2 = vor.u32 %v1182_v30, %v1178_v27 }
 0x114   : > { %3080 = vmatprep.mubr.msk.bf16.mxu1 %vm5455_vm2, %v4712_v26 }
 0x115   : > { %3095 = vmatpush3.bf16.msra.mxu1 %v3642_v49  ;;  %v5028_v53 = vsel %vm5457_vm8, %v1183_v2, %v1187_v18  ;;  %v3650_v49 = vld [vmem:[#allocation8 + $0x48] sm:$0xff]  }
 0x116   : > { %3219 = vmatpush3.bf16.msra.mxu0 %v3639_v56  ;;  %3096 = vmatprep.subr.bf16.mxu1 %v3644_v12  ;;  %v2255_v56 = vrot.slane %v4969_v52, 1  ;;  %v3651_v52 = vld [vmem:[#allocation8 + $0x148] sm:$0xff]  }
 0x117   : > { %3220 = vmatprep.subr.bf16.mxu0 %v3641_v13 }
 0x118   : > { %3081 = vmatmul.mubr.msk.bf16.gmra.mrb[12].mxu1 %vm5456_vm6, %v4788_v38 }
 0x119   : > { %3205 = vmatmul.mubr.bf16.gmra.mrb[8].mxu0 %v4906_v50  ;;  %3097 = vmatpush3.bf16.msra.mxu1 %v3644_v12 }
 0x11a   : > { %3221 = vmatpush3.bf16.msra.mxu0 %v3641_v13  ;;  %3208 = vmatprep.mubr.bf16.mxu0 %v4926_v62  ;;  %v5039_v62 = vsel %vm5459_vm7, %v2254_v19, %v2255_v56 }
 0x11b   : > { %3222 = vmatprep.subr.bf16.mxu0 %v3643_v32  ;;  %3098 = vmatprep.subr.bf16.mxu1 %v3646_v22 }
 0x11c   : > { %3100 = vmatprep.mubr.msk.bf16.mxu1 %vm4440_vm1, %v4408_v7  ;;  %v3652_v7 = vld [vmem:[#allocation8 + $0x50] sm:$0xff]   ;;  %vm5464_vm1 = vmpackc.low %vm4795_vm14, %vm4819_vm10 }
 0x11d   : > { %3099 = vmatpush3.bf16.msra.mxu1 %v3646_v22 }
 0x11e   : > { %3223 = vmatpush3.bf16.msra.mxu0 %v3643_v32  ;;  %3116 = vmatprep.subr.bf16.mxu1 %v3648_v45 }
 0x11f   : > { %3224 = vmatprep.subr.bf16.mxu0 %v3645_v60 }
 0x120   : > { %3101 = vmatmul.mubr.msk.bf16.vlgmr.msra.gmra.mrb[0].mxu1 %vm4507_vm0, %v4519_v24  ;;  %v3653_v24 = vld [vmem:[#allocation8 + $0x150] sm:$0xff]   ;;  %vm5463_vm0 = vmpackc.low %vm4731_vm5, %vm4772_vm9 }
 0x121   : > { %3209 = vmatmul.mubr.bf16.gmra.mrb[12].mxu0 %v1661_v16  ;;  %3117 = vmatpush3.bf16.msra.mxu1 %v3648_v45  ;;  %v5465_v16 = vld [vmem:[#allocation24_spill] sm:$0xff] }
 0x122   : > { %3225 = vmatpush3.bf16.msra.mxu0 %v3645_v60  ;;  %3228 = vmatprep.mubr.bf16.mxu0 %v1860_v6 }
 0x123   : > { %3226 = vmatprep.subr.bf16.mxu0 %v3647_v1  ;;  %3118 = vmatprep.subr.bf16.mxu1 %v3650_v49 }
 0x124   : > { %3104 = vmatprep.mubr.msk.bf16.mxu1 %vm4568_vm15, %v4549_v43  ;;  %v3655_v43 = vld [vmem:[#allocation8 + $0x158] sm:$0xff]  }
 0x125   : > { %3119 = vmatpush3.bf16.msra.mxu1 %v3650_v49 }
 0x126   : > { %3227 = vmatpush3.bf16.msra.mxu0 %v3647_v1  ;;  %3120 = vmatprep.subr.bf16.mxu1 %v3652_v7 }
 0x127   : > { %3244 = vmatprep.subr.bf16.mxu0 %v3649_v37 }
 0x128   : > { %3105 = vmatmul.mubr.msk.bf16.gmra.mrb[4].mxu1 %vm4613_vm4, %v4655_v57  ;;  %v3657_v57 = vld [vmem:[#allocation8 + $0x160] sm:$0xff]  }
 0x129   : > { %3229 = vmatmul.mubr.bf16.vlgmr.msra.gmra.mrb[0].mxu0 %v4891_v55  ;;  %3121 = vmatpush3.bf16.msra.mxu1 %v3652_v7 }
 0x12a   : > { %3245 = vmatpush3.bf16.msra.mxu0 %v3649_v37  ;;  %3232 = vmatprep.mubr.bf16.mxu0 %v4937_v39 }
 0x12b   : > { %3246 = vmatprep.subr.bf16.mxu0 %v3651_v52  ;;  %3122 = vmatprep.subr.bf16.mxu1 %v3654_v33 }
 0x12c   : > { %3108 = vmatprep.mubr.msk.bf16.mxu1 %vm5455_vm2, %v4712_v26 }
 0x12d   : > { %3123 = vmatpush3.bf16.msra.mxu1 %v3654_v33 }
 0x12e   : > { %3247 = vmatpush3.bf16.msra.mxu0 %v3651_v52  ;;  %3124 = vmatprep.subr.bf16.mxu1 %v3656_v4 }
 0x12f   : > { %3248 = vmatprep.subr.bf16.mxu0 %v3653_v24 }
 0x130   : > { %3109 = vmatmul.mubr.msk.bf16.gmra.mrb[8].mxu1 %vm5456_vm6, %v4788_v38  ;;  %v3662_v38 = vld [vmem:[#allocation8 + $0x78] sm:$0xff]  }
 0x131   : > { %3233 = vmatmul.mubr.bf16.gmra.mrb[4].mxu0 %v4952_v58  ;;  %3125 = vmatpush3.bf16.msra.mxu1 %v3656_v4 }
 0x132   : > { %3249 = vmatpush3.bf16.msra.mxu0 %v3653_v24  ;;  %3236 = vmatprep.mubr.bf16.mxu0 %v4992_v48 }
 0x133   : > { %3250 = vmatprep.subr.bf16.mxu0 %v3655_v43  ;;  %3126 = vmatprep.subr.bf16.mxu1 %v3658_v15 }
 0x134   : > { %3112 = vmatprep.mubr.msk.bf16.mxu1 %vm5463_vm0, %v5460_v59 }
 0x135   : > { %3127 = vmatpush3.bf16.msra.mxu1 %v3658_v15 }
 0x136   : > { %3251 = vmatpush3.bf16.msra.mxu0 %v3655_v43  ;;  %3128 = vmatprep.subr.bf16.mxu1 %v3660_v25 }
 0x137   : > { %3252 = vmatprep.subr.bf16.mxu0 %v3657_v57 }
 0x138   : > { %3113 = vmatmul.mubr.msk.bf16.gmra.mrb[12].mxu1 %vm5464_vm1, %v4965_v21  ;;  %v3666_v21 = vld [vmem:[#allocation8 + $0x210] sm:$0xff]  }
 0x139   : > { %3237 = vmatmul.mubr.bf16.gmra.mrb[8].mxu0 %v5000_v23  ;;  %3129 = vmatpush3.bf16.msra.mxu1 %v3660_v25 }
 0x13a   : > { %3253 = vmatpush3.bf16.msra.mxu0 %v3657_v57  ;;  %3240 = vmatprep.mubr.bf16.mxu0 %v5012_v54 }
 0x13b   : > { %3254 = vmatprep.subr.bf16.mxu0 %v3659_v42  ;;  %3130 = vmatprep.subr.bf16.mxu1 %v3662_v38 }
 0x13c   : > { %3132 = vmatprep.mubr.bf16.mxu1 %v5028_v53 }
 0x13d   : > { %3131 = vmatpush3.bf16.msra.mxu1 %v3662_v38 }
 0x13e   : > { %3255 = vmatpush3.bf16.msra.mxu0 %v3659_v42  ;;  %3308 = vmatprep.subr.bf16.mxu1 %v3664_v36 }
 0x13f   : > { %3256 = vmatprep.subr.bf16.mxu0 %v3661_v3 }
 0x140   : > { %3133 = vmatmul.mubr.bf16.vlgmr.msra.gmra.mrb[0].mxu1 %v5465_v16 }
 0x141   : > { %3241 = vmatmul.mubr.bf16.gmra.mrb[12].mxu0 %v5015_v35  ;;  %3316 = vmatpush3.bf16.msra.mxu1 %v3664_v36 }
 0x142   : > { %3257 = vmatpush3.bf16.msra.mxu0 %v3661_v3  ;;  %3260 = vmatprep.mubr.bf16.mxu0 %v4891_v55 }
 0x143   : > { %3258 = vmatprep.subr.bf16.mxu0 %v3663_v61  ;;  %3309 = vmatprep.subr.bf16.mxu1 %v3665_v5 }
 0x144   : > { %3136 = vmatprep.mubr.bf16.mxu1 %v4514_v20  ;;  %v3669_v20 = vld [vmem:[#allocation8 + $0x228] sm:$0xff]  }
 0x145   : > { %3317 = vmatpush3.bf16.msra.mxu1 %v3665_v5 }
 0x146   : > { %3259 = vmatpush3.bf16.msra.mxu0 %v3663_v61  ;;  %3310 = vmatprep.subr.bf16.mxu1 %v3666_v21 }
 0x147   : > { %3276 = vmatprep.subr.bf16.mxu0 %v3664_v36 }
 0x148   : > { %3137 = vmatmul.mubr.bf16.gmra.mrb[4].mxu1 %v4635_v46  ;;  %v3670_v46 = vld [vmem:[#allocation8 + $0x230] sm:$0xff]  }
 0x149   : > { %3261 = vmatmul.mubr.bf16.vlgmr.msra.gmra.mrb[0].mxu0 %v4937_v39  ;;  %3318 = vmatpush3.bf16.msra.mxu1 %v3666_v21 }
 0x14a   : > { %3277 = vmatpush3.bf16.msra.mxu0 %v3664_v36  ;;  %3264 = vmatprep.mubr.bf16.mxu0 %v4952_v58 }
 0x14b   : > { %3278 = vmatprep.subr.bf16.mxu0 %v3665_v5  ;;  %3311 = vmatprep.subr.bf16.mxu1 %v3667_v44 }
 0x14c   : > { %3140 = vmatprep.mubr.bf16.mxu1 %v4684_v10  ;;  %v3671_v10 = vld [vmem:[#allocation8 + $0x238] sm:$0xff]  }
 0x14d   : > { %3319 = vmatpush3.bf16.msra.mxu1 %v3667_v44 }
 0x14e   : > { %3279 = vmatpush3.bf16.msra.mxu0 %v3665_v5  ;;  %3312 = vmatprep.subr.bf16.mxu1 %v3668_v14 }
 0x14f   : > { %3280 = vmatprep.subr.bf16.mxu0 %v3666_v21 }
 0x150   : > { %3141 = vmatmul.mubr.bf16.gmra.mrb[8].mxu1 %v4777_v17 }
 0x151   : > { %3265 = vmatmul.mubr.bf16.gmra.mrb[4].mxu0 %v4992_v48  ;;  %3320 = vmatpush3.bf16.msra.mxu1 %v3668_v14 }
 0x152   : > { %3281 = vmatpush3.bf16.msra.mxu0 %v3666_v21  ;;  %3268 = vmatprep.mubr.bf16.mxu0 %v5000_v23 }
 0x153   : > { %3282 = vmatprep.subr.bf16.mxu0 %v3667_v44  ;;  %3313 = vmatprep.subr.bf16.mxu1 %v3669_v20 }
 0x154   : > { %3144 = vmatprep.mubr.bf16.mxu1 %v4836_v51 }
 0x155   : > { %3321 = vmatpush3.bf16.msra.mxu1 %v3669_v20 }
 0x156   : > { %3283 = vmatpush3.bf16.msra.mxu0 %v3667_v44  ;;  %3314 = vmatprep.subr.bf16.mxu1 %v3670_v46 }
 0x157   : > { %3284 = vmatprep.subr.bf16.mxu0 %v3668_v14 }
 0x158   : > { %3145 = vmatmul.mubr.bf16.gmra.mrb[12].mxu1 %v4906_v50 }
 0x159   : > { %3269 = vmatmul.mubr.bf16.gmra.mrb[8].mxu0 %v5012_v54  ;;  %3322 = vmatpush3.bf16.msra.mxu1 %v3670_v46 }
 0x15a   : > { %3285 = vmatpush3.bf16.msra.mxu0 %v3668_v14  ;;  %3272 = vmatprep.mubr.bf16.mxu0 %v5015_v35 }
 0x15b   : > { %3286 = vmatprep.subr.bf16.mxu0 %v3669_v20  ;;  %3315 = vmatprep.subr.bf16.mxu1 %v3671_v10 }
 0x15c   : > { %3300 = vmatprep.mubr.bf16.mxu1 %v5012_v54 }
 0x15d   : > { %3323 = vmatpush3.bf16.msra.mxu1 %v3671_v10 }
 0x15e   : > { %3287 = vmatpush3.bf16.msra.mxu0 %v3669_v20 }
 0x15f   : > { %3288 = vmatprep.subr.bf16.mxu0 %v3670_v46 }
 0x160   : > { %3301 = vmatmul.mubr.bf16.vlgmr.msra.gmra.mrb[16].mxu1 %v5015_v35 }
 0x161   : > { %3273 = vmatmul.mubr.bf16.gmra.mrb[12].mxu0 %v5032_v47  ;;  %3304 = vmatprep.mubr.bf16.mxu1 %v5032_v47 }
 0x162   : > { %3289 = vmatpush3.bf16.msra.mxu0 %v3670_v46  ;;  %3292 = vmatprep.mubr.bf16.mxu0 %v4937_v39 }
 0x163   : > { %3290 = vmatprep.subr.bf16.mxu0 %v3671_v10 }
 0x166   : > { %3291 = vmatpush3.bf16.msra.mxu0 %v3671_v10 }
 0x168   : > { %3305 = vmatmul.mubr.bf16.gmra.mrb[20].mxu1 %v5039_v62 }
 0x169   : > { %3293 = vmatmul.mubr.bf16.vlgmr.msra.gmra.mrb[0].mxu0 %v4952_v58 }
 0x16a   : > { %3296 = vmatprep.mubr.bf16.mxu0 %v4992_v48 }
 0x171   : > { %3297 = vmatmul.mubr.bf16.gmra.mrb[4].mxu0 %v5000_v23 }
 0x213   : > { %v3134_v17 = vpop.f32.mrb[0].mxu1 }
 0x214   : > { %v1380_v51 = vpop.f32.mrb[1].mxu1 }
 0x215   : > { %v3135_v55 = vpop.f32.mrb[2].mxu1 }
 0x216   : > { %v5100_v50 = vpop.f32.mrb[3].mxu1 }
 0x21b   : > { %v5102_v12 = vpop.f32.mrb[4].mxu1 }
 0x21c   : > { %v5104_v34 = vpop.f32.mrb[5].mxu1 }
 0x21d   : > { %v5106_v39 = vpop.f32.mrb[6].mxu1 }
 0x21e   : > { %v5108_v63 = vpop.f32.mrb[7].mxu1 }
 0x223   : > { %v3142_v0 = vpop.f32.mrb[8].mxu1 }
 0x224   : > { %v1412_v58 = vpop.f32.mrb[9].mxu1 }
 0x225   : > { %v3143_v40 = vpop.f32.mrb[10].mxu1 }
 0x226   : > { %v1415_v48 = vpop.f32.mrb[11].mxu1 }
 0x22b   : > { %v3146_v54 = vpop.f32.mrb[12].mxu1 }
 0x22c   : > { %v3270_v23 = vpop.f32.mrb[8].mxu0  ;;  %v1428_v13 = vpop.f32.mrb[13].mxu1 }
 0x22d   : > { %v3332_v35 = vadd.f32 %v3270_v23, %v3142_v0  ;;  %v2205_v27 = vpop.f32.mrb[9].mxu0  ;;  %v3147_v9 = vpop.f32.mrb[14].mxu1 }
 0x22e   : > { %v3334_v29 = vadd.f32 %v2205_v27, %v1412_v58  ;;  %v3271_v32 = vpop.f32.mrb[10].mxu0  ;;  %v1431_v22 = vpop.f32.mrb[15].mxu1 }
 0x22f   : > { %v3336_v30 = vadd.f32 %v3271_v32, %v3143_v40  ;;  %v2208_v18 = vpop.f32.mrb[11].mxu0 }
 0x230   : > { %v3338_v28 = vadd.f32 %v2208_v18, %v1415_v48 }
 0x233   : > { %v3302_v2 = vpop.f32.mrb[16].mxu1 }
 0x234   : > { %v3274_v31 = vpop.f32.mrb[12].mxu0  ;;  %v5111_v60 = vadd.f32 %v3332_v35, %v3302_v2  ;;  %v2389_v41 = vpop.f32.mrb[17].mxu1 }
 0x235   : > { %v3340_v45 = vadd.f32 %v3274_v31, %v3146_v54  ;;  %v2221_v53 = vpop.f32.mrb[13].mxu0  ;;  %v5113_v19 = vadd.f32 %v3334_v29, %v2389_v41  ;;  %v3303_v8 = vpop.f32.mrb[18].mxu1 }
 0x236   : > { %v3342_v47 = vadd.f32 %v2221_v53, %v1428_v13  ;;  %v3275_v56 = vpop.f32.mrb[14].mxu0  ;;  %2446 = vst [vmem:[%s5115_s8 + $0x50] sm:$0xff] %v5111_v60  ;;  %v5119_v62 = vadd.f32 %v3336_v30, %v3303_v8  ;;  %v2392_v1 = vpop.f32.mrb[19].mxu1 }
 0x237   : > { %v3344_v6 = vadd.f32 %v3275_v56, %v3147_v9  ;;  %v2224_v49 = vpop.f32.mrb[15].mxu0  ;;  %2444 = vst [vmem:[%s5115_s8 + $0x40] sm:$0xff] %v5113_v19  ;;  %v5123_v7 = vadd.f32 %v3338_v28, %v2392_v1 }
 0x238   : > { %v3346_v37 = vadd.f32 %v2224_v49, %v1431_v22  ;;  %2447 = vst [vmem:[%s5115_s8 + $0x58] sm:$0xff] %v5119_v62 }
 0x239   : > { %2445 = vst [vmem:[%s5115_s8 + $0x48] sm:$0xff] %v5123_v7 }
 0x23b   : > { %v3306_v52 = vpop.f32.mrb[20].mxu1 }
 0x23c   : > { %v3294_v33 = vpop.f32.mrb[0].mxu0  ;;  %v5129_v4 = vadd.f32 %v3340_v45, %v3306_v52  ;;  %v2405_v24 = vpop.f32.mrb[21].mxu1 }
 0x23d   : > { %v3324_v43 = vadd.f32 %v3294_v33, %v3134_v17  ;;  %v2357_v15 = vpop.f32.mrb[1].mxu0  ;;  %v5131_v25 = vadd.f32 %v3342_v47, %v2405_v24  ;;  %v3307_v57 = vpop.f32.mrb[22].mxu1 }
 0x23e   : > { %v3325_v59 = vadd.f32 %v2357_v15, %v1380_v51  ;;  %v3295_v26 = vpop.f32.mrb[2].mxu0  ;;  %2450 = vst [vmem:[%s5115_s8 + $0x70] sm:$0xff] %v5129_v4  ;;  %v5135_v11 = vadd.f32 %v3344_v6, %v3307_v57  ;;  %v2408_v42 = vpop.f32.mrb[23].mxu1 }
 0x23f   : > { %2438 = vst [vmem:[%s5115_s8 + $0x10] sm:$0xff] %v3324_v43  ;;  %v3326_v38 = vadd.f32 %v3295_v26, %v3135_v55  ;;  %v2360_v36 = vpop.f32.mrb[3].mxu0  ;;  %2448 = vst [vmem:[%s5115_s8 + $0x60] sm:$0xff] %v5131_v25  ;;  %v5140_v3 = vadd.f32 %v3346_v37, %v2408_v42  ;;  %v2476_v44 = vmul.f32 %v3324_v43, %v3324_v43 }
 0x240   : > { %2436 = vst [vmem:[%s5115_s8] sm:$0xff] %v3325_v59  ;;  %v3327_v61 = vadd.f32 %v2360_v36, %v5100_v50  ;;  %2451 = vst [vmem:[%s5115_s8 + $0x78] sm:$0xff] %v5135_v11  ;;  %v2474_v5 = vmul.f32 %v3325_v59, %v3325_v59 }
 0x241   : > { %2439 = vst [vmem:[%s5115_s8 + $0x18] sm:$0xff] %v3326_v38  ;;  %2449 = vst [vmem:[%s5115_s8 + $0x68] sm:$0xff] %v5140_v3  ;;  %v2477_v51 = vmul.f32 %v3326_v38, %v3326_v38 }
 0x242   : > { %2437 = vst [vmem:[%s5115_s8 + $0x8] sm:$0xff] %v3327_v61  ;;  %v2452_v16 = vadd.f32 %v3327_v61, %v3325_v59  ;;  %v2475_v21 = vmul.f32 %v3327_v61, %v3327_v61 }
 0x244   : > { %v2453_v14 = vadd.f32 %v3324_v43, %v2452_v16  ;;  %v2490_v20 = vadd.f32 %v2475_v21, %v2474_v5  ;;  %v3298_v46 = vpop.f32.mrb[4].mxu0 }
 0x245   : > { %v3328_v10 = vadd.f32 %v3298_v46, %v5102_v12  ;;  %v2373_v17 = vpop.f32.mrb[5].mxu0 }
 0x246   : > { %v2491_v55 = vadd.f32 %v2490_v20, %v2476_v44  ;;  %v3329_v50 = vadd.f32 %v2373_v17, %v5104_v34  ;;  %v2454_v0 = vadd.f32 %v3326_v38, %v2453_v14  ;;  %v3299_v58 = vpop.f32.mrb[6].mxu0 }
 0x247   : > { %2442 = vst [vmem:[%s5115_s8 + $0x30] sm:$0xff] %v3328_v10  ;;  %v3330_v40 = vadd.f32 %v3299_v58, %v5106_v39  ;;  %v2376_v48 = vpop.f32.mrb[7].mxu0 }
 0x248   : > { %2440 = vst [vmem:[%s5115_s8 + $0x20] sm:$0xff] %v3329_v50  ;;  %v2455_v12 = vadd.f32 %v3329_v50, %v2454_v0  ;;  %v2478_v54 = vmul.f32 %v3329_v50, %v3329_v50  ;;  %v2492_v23 = vadd.f32 %v2491_v55, %v2477_v51  ;;  %v3331_v13 = vadd.f32 %v2376_v48, %v5108_v63 }
 0x249   : > { %2443 = vst [vmem:[%s5115_s8 + $0x38] sm:$0xff] %v3330_v40 }
 0x24a   : > { %v2493_v34 = vadd.f32 %v2492_v23, %v2478_v54  ;;  %2441 = vst [vmem:[%s5115_s8 + $0x28] sm:$0xff] %v3331_v13  ;;  %v2456_v39 = vadd.f32 %v3331_v13, %v2455_v12  ;;  %v2479_v35 = vmul.f32 %v3331_v13, %v3331_v13 }
 0x24b   : > { %3799 = shalt.err (!%p3796_p13)
}
 0x24c   : > { %s3800_s6 = scalar_lea.hbm %s5164_s11, 2048  ;;  %s3804_s19 = scalar_lea.hbm %s5466_s1, 8192 }
 0x24d   : > { %p3801_p5 = scmp.ne.s32.totalorder %s5164_s11, %s3800_s6  ;;  %p3805_p10 = scmp.lt.u32.totalorder %s5164_s11, %s5466_s1 }
 0x24e   : > { %p3806_p6 = scmp.lt.u32.totalorder %s3804_s19, %s3800_s6  ;;  %p3808_p0 = scmp.lt.u32.totalorder %s3800_s6, %s5164_s11 }
 0x24f   : > { %p3802_p11 = pnand %p3801_p5, %p4190_p4 }
 0x250   : > { %p3807_p7 = por %p3806_p6, %p3805_p10 }
 0x251   : > { %p3803_p1 = pneg %p3802_p11 }
 0x252   : > { %p3809_p2 = por %p3808_p0, %p3807_p7 }
 0x254   : > { %p3810_p9 = pnand %p3809_p2, %p3803_p1 }
 0x256   : > { %3813 = shalt.err (!%p3810_p9)
}
 0x257   : > { %s3959_s17 = smov 128   ;;  %s3960_s5 = smov 8   ;;  %v2480_v63 = vmul.f32 %v3328_v10, %v3328_v10  ;;  %v2457_v27 = vadd.f32 %v3328_v10, %v2456_v39  ;;  %v2494_v9 = vadd.f32 %v2493_v34, %v2479_v35  ;;  %v2481_v29 = vmul.f32 %v3330_v40, %v3330_v40 }
 0x258   : > { %3470 = dma.vmem_to_hbm [thread:$0]  (%p4190_p4), %s5157_s16, 2048, %s5164_s11, %s2513_s3, %s3959_s17, %s3959_s17, %s3960_s5   ;;  %v2482_v30 = vmul.f32 %v5113_v19, %v5113_v19  ;;  %v2483_v2 = vmul.f32 %v5123_v7, %v5123_v7  ;;  %v2484_v45 = vmul.f32 %v5111_v60, %v5111_v60  ;;  %v2485_v47 = vmul.f32 %v5119_v62, %v5119_v62 }
 0x259   : > { %v2458_v32 = vadd.f32 %v3330_v40, %v2457_v27  ;;  %v2495_v22 = vadd.f32 %v2494_v9, %v2480_v63  ;;  %s5467_s9 = sld [smem:[#allocation19_spill]]  ;;  %v2486_v1 = vmul.f32 %v5131_v25, %v5131_v25  ;;  %v2488_v52 = vmul.f32 %v5129_v4, %v5129_v4  ;;  %s2871_s11 = sshll.u32 %s3936_s25, 1 }
 0x25a   : > { %v2489_v24 = vmul.f32 %v5135_v11, %v5135_v11  ;;  %s2545_s3 = sadd.s32 %s3932_s24, %s2871_s11  ;;  %s5468_s30 = sld [smem:[#allocation22_spill]] }
 0x25b   : > { %v2459_v18 = vadd.f32 %v5113_v19, %v2458_v32  ;;  %v2496_v28 = vadd.f32 %v2495_v22, %v2481_v29  ;;  %s2872_s29 = sshll.u32 %s2545_s3, 5  ;;  %s5469_s13 = sld [smem:[#allocation32_spill]] }
 0x25c   : > { %s3961_s7 = smov [#allocation11]  }
 0x25d   : > { %v2497_v31 = vadd.f32 %v2496_v28, %v2482_v30  ;;  %v2460_v41 = vadd.f32 %v5123_v7, %v2459_v18  ;;  %s3818_s15 = sshll.u32 %s3961_s7, 4  ;;  %s3819_s15 = int_to_ptr.vmem [resolvable:$false] %s3818_s15 }
 0x25e   : > { %s3820_s17 = scalar_lea.vmem %s3819_s15, 64 }
 0x25f   : > { %v2461_v53 = vadd.f32 %v5111_v60, %v2460_v41  ;;  %v2498_v8 = vadd.f32 %v2497_v31, %v2483_v2  ;;  %v2487_v60 = vmul.f32 %v5140_v3, %v5140_v3  ;;  %s313_s18 = sand.u32 1, %s5467_s9  }
 0x260   : > { %s2717_s16 = sshll.u32 %s313_s18, 1  ;;  %s2518_s24 = scalar_lea.sflag [#allocation12], %s313_s18 }
 0x261   : > { %v2462_v56 = vadd.f32 %v5119_v62, %v2461_v53  ;;  %v2499_v19 = vadd.f32 %v2498_v8, %v2484_v45  ;;  %s315_s21 = scalar_lea.vmem [#allocation11], %s2717_s16  ;;  %s5222_s19 = scalar_lea.hbm %s5469_s13, %s2872_s29 }
 0x262   : > { %s2552_s4 = sshll.u32 %s315_s21, 4  ;;  %p5470_p12 = scmp.ne.s32.totalorder %s5468_s30, 0  ;;  %s5224_s4 = int_to_ptr.vmem [resolvable:$true] %s2552_s4 }
 0x263   : > { %v2463_v6 = vadd.f32 %v5131_v25, %v2462_v56  ;;  %v2500_v49 = vadd.f32 %v2499_v19, %v2485_v47  ;;  %s3814_s25 = scalar_lea.vmem %s5224_s4, 32  ;;  %p3821_p13 = scmp.lt.s32.totalorder %s5224_s4, %s3819_s15 }
 0x264   : > { %p3815_p4 = scmp.ne.s32.totalorder %s5224_s4, %s3814_s25  ;;  %p3822_p5 = scmp.lt.s32.totalorder %s3820_s17, %s3814_s25 }
 0x265   : > { %v2464_v7 = vadd.f32 %v5140_v3, %v2463_v6  ;;  %v2501_v37 = vadd.f32 %v2500_v49, %v2486_v1 }
 0x266   : > { %p3816_p3 = pnand %p3815_p4, %p5470_p12  ;;  %p3823_p11 = por %p3822_p5, %p3821_p13 }
 0x267   : > { %v2465_v62 = vadd.f32 %v5129_v4, %v2464_v7  ;;  %v2502_v33 = vadd.f32 %v2501_v37, %v2487_v60 }
 0x268   : > { %p3817_p8 = pneg %p3816_p3 }
 0x269   : > { %v2466_v43 = vadd.f32 %v5135_v11, %v2465_v62  ;;  %v2503_v15 = vadd.f32 %v2502_v33, %v2488_v52 }
 0x26a   : > { %p3824_p1 = pnand %p3823_p11, %p3817_p8 }
 0x26b   : > { %v2467_v25 = vrot.slane %v2466_v43, 4  ;;  %v2504_v57 = vadd.f32 %v2503_v15, %v2489_v24 }
 0x26d   : > { %v2468_v59 = vadd.f32 %v2467_v25, %v2466_v43  ;;  %v2505_v26 = vrot.slane %v2504_v57, 4 }
 0x26f   : > { %v2469_v42 = vrot.slane %v2468_v59, 2  ;;  %v2506_v38 = vadd.f32 %v2505_v26, %v2504_v57 }
 0x271   : > { %v2470_v36 = vadd.f32 %v2469_v42, %v2468_v59  ;;  %v2507_v3 = vrot.slane %v2506_v38, 2 }
 0x273   : > { %v2471_v4 = vrot.slane %v2470_v36, 1  ;;  %v2508_v61 = vadd.f32 %v2507_v3, %v2506_v38 }
 0x275   : > { %v2472_v11 = vadd.f32 %v2471_v4, %v2470_v36  ;;  %v2509_v5 = vrot.slane %v2508_v61, 1 }
 0x277   : > { %2473 = vst [vmem:[%s315_s21] sm:$0x1] %v2472_v11  ;;  %v2510_v16 = vadd.f32 %v2509_v5, %v2508_v61 }
 0x279   : > { %2511 = vst [vmem:[%s315_s21 + $0x1] sm:$0x1] %v2510_v16 }
 0x27a   : > { %3827 = shalt.err (!%p3824_p1)
}
 0x27b   : > { %s3828_s5 = scalar_lea.hbm %s5222_s19, 32  ;;  %s3832_s16 = scalar_lea.hbm %s5469_s13, 128 }
 0x27c   : > { %p3829_p10 = scmp.ne.s32.totalorder %s5222_s19, %s3828_s5  ;;  %p3833_p0 = scmp.lt.u32.totalorder %s5222_s19, %s5469_s13 }
 0x27d   : > { %p3834_p2 = scmp.lt.u32.totalorder %s3832_s16, %s3828_s5  ;;  %p3836_p4 = scmp.lt.u32.totalorder %s3828_s5, %s5222_s19 }
 0x27e   : > { %p3830_p6 = pnand %p3829_p10, %p5470_p12 }
 0x27f   : > { %p3835_p9 = por %p3834_p2, %p3833_p0 }
 0x280   : > { %p3831_p7 = pneg %p3830_p6 }
 0x281   : > { %p3837_p3 = por %p3836_p4, %p3835_p9 }
 0x283   : > { %p3838_p8 = pnand %p3837_p3, %p3831_p7 }
 0x285   : > { %3841 = shalt.err (!%p3838_p8)
}
 0x286   : > { %3471 = dma.vmem_to_hbm [thread:$0]  (%p5470_p12), %s5224_s4, 32, %s5222_s19, %s2518_s24  }
 0x287 PF: > { %s5471_s29 = sld [smem:[#allocation20_spill]]  ;;  %s5472_s21 = sld [smem:[#allocation21_spill]] }
 0x288   : > { %p3502_p13 = scmp.ge.s32.totalorder %s3948_s28, 2 }
 0x28d   : > { %s2564_s6 = sand.u32 1, %s5471_s29   ;;  %p5473_p5 = scmp.ne.s32.totalorder %s5472_s21, 0 }
 0x28e   : > { %s2565_s8 = scalar_lea.sflag [#allocation4], %s2564_s6 }
 0x28f   : > { %p3489_p11 = pnand %p3502_p13, %p5473_p5 }
 0x291   : > { %3899 = dma.done.wait (!%p3489_p11), %s2565_s8, 2048  }
 0x292   : > { %3901 = vsyncadd (!%p3489_p11), %s2565_s8, 4294965248  ;;  %s5474_s25 = sld [smem:[#allocation18_spill]]  ;;  %s5475_s7 = sld [smem:[#allocation23_spill]] }
 0x298   : > { %s2573_s15 = sand.u32 1, %s5474_s25   ;;  %p5476_p1 = scmp.ne.s32.totalorder %s5475_s7, 0 }
 0x299   : > { %s2574_s30 = scalar_lea.sflag [#allocation12], %s2573_s15 }
 0x29a   : > { %p3492_p10 = pnand %p3502_p13, %p5476_p1 }
 0x29c   : > { %3903 = dma.done.wait (!%p3492_p10), %s2574_s30, 32  }
 0x29d   : > { %3905 = vsyncadd (!%p3492_p10), %s2574_s30, 4294967264  ;;  %s27_s28 = sadd.s32 1, %s3948_s28   ;;  %s5477_s18 = sld [smem:[#allocation19_spill]] }
 0x29e   : > { %p24_p12 = scmp.ge.s32.totalorder %s27_s28, 6   ;;  %s5478_s19 = smov %s3916_s20 }
 0x29f   : > { %s5479_s20 = smov %s4210_s2  ;;  %s5480_s21 = smov %s3924_s22 }
 0x2a0   : > { %s5481_s22 = smov %s3928_s23  ;;  %s5482_s23 = smov %s4205_s10 }
 0x2a1   : > { %s5483_s24 = smov %s3940_s26  ;;  %s5484_s25 = smov %s3944_s27 }
 0x2a2   : > { %s5485_s26 = smov %s5488_s12  ;;  %s5486_s27 = smov %s5492_s14 }
 0x2a3   :  { %26 = sbr.rel (!%p24_p12) target bundleno = 19 (0x13), region = 118 }
 0x2aa   :  { %2579 = vsyncpa [#allocation3], 1 }
 0x2ab   :  { %2581 = vsyncpa [#allocation3 + $0x1], 1 }
 0x2ac   :  { %2582 = vsyncpa [#allocation6], 1 }
 0x2ad   :  { %2583 = vsyncpa [#allocation9], 1 }
 0x2ae   :  { %2584 = vsyncpa [#allocation4], 1 }
 0x2af   :  { %2586 = vsyncpa [#allocation4 + $0x1], 1 }
 0x2b0   :  { %2587 = vsyncpa [#allocation12], 1 }
 0x2b1   :  { %2589 = vsyncpa [#allocation12 + $0x1], 1 }

</bundles_post_ra>
